<compile_context>
chip_gen: v7x
topology: tpu7x:2x2x1
jax: 0.10.0
libtpu: 0.0.40
codegen_flags: <defaults>
</compile_context>

<pallas_src>
import functools
import math

import jax
import jax.numpy as jnp
from jax.experimental import pallas as pl
from jax.experimental.pallas import tpu as pltpu

LN_EPS = 1e-5           # torch.nn.LayerNorm default
NEG_INF = -1e9

VMEM_SPEC = pl.BlockSpec(memory_space=pltpu.MemorySpace.VMEM)
SMEM_SPEC = pl.BlockSpec(memory_space=pltpu.MemorySpace.SMEM)


# ----------------------- in-kernel math helpers (traced) -----------------------

def _layer_norm(x, gamma, beta, eps=LN_EPS):
    mean = jnp.mean(x, axis=-1, keepdims=True)
    var = jnp.mean(jnp.square(x - mean), axis=-1, keepdims=True)
    return (x - mean) * jax.lax.rsqrt(var + eps) * gamma + beta


def _softmax(logits, approx=True):
    logits = logits - jnp.max(logits, axis=-1, keepdims=True)
    p = jnp.exp(logits)
    s = jnp.sum(p, axis=-1, keepdims=True)
    if approx:
        return p * pl.reciprocal(s, approx=True)
    return p / s


def _bf16_dot(a, b):
    # MXU matmul in bf16 with f32 accumulation.
    return jnp.dot(a.astype(jnp.bfloat16), b.astype(jnp.bfloat16),
                   preferred_element_type=jnp.float32)


def _scores(q, k):
    # q @ k^T without materializing a transpose (contract last dims).
    return jax.lax.dot_general(q.astype(jnp.bfloat16), k.astype(jnp.bfloat16),
                               (((1,), (1,)), ((), ())),
                               preferred_element_type=jnp.float32)


def _build_mask(pad_row, seq_len, diagonal):
    # pad_row: (1, S) float {0,1}.  True = attend.
    # (1 - triu(ones, diagonal)).bool() == tril(ones, k=diagonal-1).
    row = jax.lax.broadcasted_iota(jnp.int32, (seq_len, seq_len), 0)
    col = jax.lax.broadcasted_iota(jnp.int32, (seq_len, seq_len), 1)
    causal = (col - row) <= (diagonal - 1)
    return jnp.logical_and(causal, pad_row > 0.5)


def _mha_block(q_in, kv_in, wqkv, bqkv, wo, bo, ln_g, ln_b, mask, n_head,
               self_attention):
    """Fused QKV proj + all-heads attention + out proj + residual + LayerNorm."""
    d_model = q_in.shape[-1]
    dh = d_model // n_head
    scale = 1.0 / math.sqrt(dh)

    if self_attention:
        qkv = _bf16_dot(q_in, wqkv) + bqkv                       # one (D,3D) matmul
        q = qkv[:, :d_model]
        k = qkv[:, d_model:2 * d_model]
        v = qkv[:, 2 * d_model:]
    else:
        q = _bf16_dot(q_in, wqkv[:, :d_model]) + bqkv[:, :d_model]
        kv = _bf16_dot(kv_in, wqkv[:, d_model:]) + bqkv[:, d_model:]
        k = kv[:, :d_model]
        v = kv[:, d_model:]

    ctx = []
    for h in range(n_head):                                      # static unroll
        sl = slice(h * dh, (h + 1) * dh)
        s = _scores(q[:, sl], k[:, sl]) * scale                  # (Sq, Sk) f32
        if mask is not None:
            s = jnp.where(mask, s, NEG_INF)
        p = _softmax(s, approx=True)
        ctx.append(_bf16_dot(p, v[:, sl]))                       # (Sq, dh)
    ctx = jnp.concatenate(ctx, axis=-1)                          # (Sq, D)

    out = _bf16_dot(ctx, wo) + bo + q_in                         # residual
    return _layer_norm(out, ln_g, ln_b)


def _ffn_block(x, w1, b1, w2, b2, ln_g, ln_b):
    h = jnp.maximum(_bf16_dot(x, w1) + b1, 0.0)
    h = _bf16_dot(h, w2) + b2
    return _layer_norm(h + x, ln_g, ln_b)


# --------------------------------- kernels ---------------------------------

def _child_encode_kernel(x_ref, w_ref, b_ref, o_ref):
    o_ref[...] = (_bf16_dot(x_ref[...], w_ref[...]) + b_ref[...]).astype(o_ref.dtype)


def _encoder_stack_kernel(diag_ref, x_ref, pad_ref,
                          a_wqkv, a_bqkv, a_wo, a_bo, a_g, a_b,
                          f_w1, f_b1, f_w2, f_b2, f_g, f_b,
                          o_ref, *, n_head, n_layer):
    b = pl.program_id(0)
    x = x_ref[0]                                                 # (S, D) f32
    seq_len = x.shape[0]
    mask = _build_mask(pad_ref[0], seq_len, diag_ref[b])         # per-batch diagonal (SMEM)
    for l in range(n_layer):                                     # static unroll over layers
        x = _mha_block(x, x, a_wqkv[l], a_bqkv[l], a_wo[l], a_bo[l],
                       a_g[l], a_b[l], mask, n_head, self_attention=True)
        x = _ffn_block(x, f_w1[l], f_b1[l], f_w2[l], f_b2[l], f_g[l], f_b[l])
    o_ref[0] = x.astype(o_ref.dtype)


def _decoder_stack_kernel(x_ref, enc_ref, pad_ref,
                          s_wqkv, s_bqkv, s_wo, s_bo, s_g, s_b,
                          c_wqkv, c_bqkv, c_wo, c_bo, c_g, c_b,
                          f_w1, f_b1, f_w2, f_b2, f_g, f_b,
                          o_ref, *, n_head, n_layer, diagonal):
    x = x_ref[0]                                                 # (S, D) f32
    enc = enc_ref[0]                                             # (S, D) f32
    seq_len = x.shape[0]
    mask = _build_mask(pad_ref[0], seq_len, diagonal)
    for l in range(n_layer):                                     # static unroll over layers
        x = _mha_block(x, x, s_wqkv[l], s_bqkv[l], s_wo[l], s_bo[l],
                       s_g[l], s_b[l], mask, n_head, self_attention=True)
        # TODO(synk): reference DecoderLayer receives a single mask; cross-attention is unmasked.
        x = _mha_block(x, enc, c_wqkv[l], c_bqkv[l], c_wo[l], c_bo[l],
                       c_g[l], c_b[l], None, n_head, self_attention=False)
        x = _ffn_block(x, f_w1[l], f_b1[l], f_w2[l], f_b2[l], f_g[l], f_b[l])
    o_ref[0] = x.astype(o_ref.dtype)


def _output_heads_kernel(pdec_ref, cdec_ref, wp_ref, bp_ref, wd_ref, bd_ref,
                         op_ref, od_ref):
    xp = pdec_ref[0]
    xd = cdec_ref[0]
    op_ref[0] = _softmax(_bf16_dot(xp, wp_ref[...]) + bp_ref[...],
                         approx=False).astype(op_ref.dtype)
    # dir weights/bias lane-padded to 128; padded bias columns hold -1e30 so exp()==0.
    od_ref[0] = _softmax(_bf16_dot(xd, wd_ref[...]) + bd_ref[...],
                         approx=False).astype(od_ref.dtype)


# ------------------------------ pallas wrappers ------------------------------

def _const(arr):
    zeros = (0,) * arr.ndim
    return pl.BlockSpec(arr.shape, lambda b, zeros=zeros: zeros)


def _per_batch(shape):
    tail = tuple(shape[1:])
    return pl.BlockSpec((1,) + tail, lambda b, n=len(tail): (b,) + (0,) * n)


def child_encode(x, w, b):
    B, S, K = x.shape
    D = w.shape[1]
    x2 = x.reshape(B * S, K)
    out = pl.pallas_call(
        _child_encode_kernel,
        out_shape=jax.ShapeDtypeStruct((B * S, D), jnp.float32),
        in_specs=[VMEM_SPEC, VMEM_SPEC, VMEM_SPEC],
        out_specs=VMEM_SPEC,
    )(x2, w, b)
    return out.reshape(B, S, D)


def encoder_stack(weights, x, pad3, diag, n_head, n_layer):
    Bt, S, D = x.shape
    in_specs = [SMEM_SPEC, _per_batch(x.shape), _per_batch(pad3.shape)]
    in_specs += [_const(w) for w in weights]
    return pl.pallas_call(
        functools.partial(_encoder_stack_kernel, n_head=n_head, n_layer=n_layer),
        out_shape=jax.ShapeDtypeStruct((Bt, S, D), jnp.float32),
        grid=(Bt,),
        in_specs=in_specs,
        out_specs=_per_batch((Bt, S, D)),
        compiler_params=pltpu.CompilerParams(dimension_semantics=("parallel",)),
    )(diag, x, pad3, *weights)


def decoder_stack(weights, x, enc_out, pad3, n_head, n_layer, diagonal):
    Bt, S, D = x.shape
    in_specs = [_per_batch(x.shape), _per_batch(enc_out.shape), _per_batch(pad3.shape)]
    in_specs += [_const(w) for w in weights]
    return pl.pallas_call(
        functools.partial(_decoder_stack_kernel, n_head=n_head,
                          n_layer=n_layer, diagonal=diagonal),
        out_shape=jax.ShapeDtypeStruct((Bt, S, D), jnp.float32),
        grid=(Bt,),
        in_specs=in_specs,
        out_specs=_per_batch((Bt, S, D)),
        compiler_params=pltpu.CompilerParams(dimension_semantics=("parallel",)),
    )(x, enc_out, pad3, *weights)


def output_heads(dec_out, batch, wp, bp, wd_pad, bd_pad, n_dir):
    Bt, S, D = dec_out.shape                      # Bt = 2*batch
    n_parent = wp.shape[1]
    n_dir_pad = wd_pad.shape[1]
    # Index the same (2B,S,D) slab twice: rows [0,B) are the parent-stream
    # decoder output, rows [B,2B) the child-stream one — no HBM slice copies.
    out_p, out_d = pl.pallas_call(
        _output_heads_kernel,
        out_shape=(jax.ShapeDtypeStruct((batch, S, n_parent), jnp.float32),
                   jax.ShapeDtypeStruct((batch, S, n_dir_pad), jnp.float32)),
        grid=(batch,),
        in_specs=[pl.BlockSpec((1, S, D), lambda b: (b, 0, 0)),
                  pl.BlockSpec((1, S, D), lambda b, off=batch: (b + off, 0, 0)),
                  _const(wp), _const(bp), _const(wd_pad), _const(bd_pad)],
        out_specs=(pl.BlockSpec((1, S, n_parent), lambda b: (b, 0, 0)),
                   pl.BlockSpec((1, S, n_dir_pad), lambda b: (b, 0, 0))),
        compiler_params=pltpu.CompilerParams(dimension_semantics=("parallel",)),
    )(dec_out, dec_out, wp, bp, wd_pad, bd_pad)
    return out_p, out_d[..., :n_dir]


# ------------------------------- forward pass -------------------------------

def transformer_forward(params, parent_seq, child_seq, pad_mask, n_head):
    B, S = parent_seq.shape
    n_layer = params["enc_weights"][0].shape[0]

    # embedding gather + tiny 3->D projection (glue, not hot path)
    parent_embedd = jnp.take(params["embedding"], parent_seq, axis=0)       # (B,S,D)
    child_encode_x = child_encode(child_seq, params["child_enc_w"], params["child_enc_b"])
    pad3 = pad_mask.astype(jnp.float32).reshape(B, 1, S)                    # (B,1,S)
    pad3x2 = jnp.concatenate([pad3, pad3], axis=0)                          # (2B,1,S)

    # Both streams share the reference's parent_encoder / parent_decoder, so
    # they are batch-concatenated and run through one fused stack each.
    # Encoder: [parent stream (input=child_encode, diag 1); child stream (input=parent_embedd, diag 2)]
    enc_in = jnp.concatenate([child_encode_x, parent_embedd], axis=0)       # (2B,S,D)
    diag = jnp.concatenate([jnp.full((B,), 1, jnp.int32),
                            jnp.full((B,), 2, jnp.int32)])                  # (2B,)
    enc_out = encoder_stack(params["enc_weights"], enc_in, pad3x2, diag,
                            n_head, n_layer)                                # [parent_enc; child_enc]

    # Decoder: [parent stream (input=parent_embedd, enc=parent_enc); child stream (input=child_encode, enc=child_enc)]
    dec_in = jnp.concatenate([parent_embedd, child_encode_x], axis=0)       # (2B,S,D)
    dec_out = decoder_stack(params["dec_weights"], dec_in, enc_out, pad3x2,
                            n_head, n_layer, diagonal=1)                    # [parent_dec; child_dec]

    return output_heads(dec_out, B,
                        params["parent_dec_w"], params["parent_dec_b"],
                        params["dir_dec_w_pad"], params["dir_dec_b_pad"], n_dir=6)


# ----------------------------- parameter init -----------------------------

_MHA_KEYS = ("wqkv", "bqkv", "wo", "bo", "ln_g", "ln_b")
_FFN_KEYS = ("w1", "b1", "w2", "b2", "ln_g", "ln_b")


def _init_dense(key, d_in, d_out):
    w = jax.random.normal(key, (d_in, d_out), jnp.float32) * 0.02
    b = jnp.zeros((1, d_out), jnp.float32)
    return w, b


def _init_mha(key, d_model):
    ks = jax.random.split(key, 4)
    wq, _ = _init_dense(ks[0], d_model, d_model)
    wk, _ = _init_dense(ks[1], d_model, d_model)
    wv, _ = _init_dense(ks[2], d_model, d_model)
    wo, bo = _init_dense(ks[3], d_model, d_model)
    return dict(wqkv=jnp.concatenate([wq, wk, wv], axis=1).astype(jnp.bfloat16),
                bqkv=jnp.zeros((1, 3 * d_model), jnp.float32),
                wo=wo.astype(jnp.bfloat16), bo=bo,
                ln_g=jnp.ones((1, d_model), jnp.float32),
                ln_b=jnp.zeros((1, d_model), jnp.float32))


def _init_ffn(key, d_model, d_inner):
    k1, k2 = jax.random.split(key)
    w1, b1 = _init_dense(k1, d_model, d_inner)
    w2, b2 = _init_dense(k2, d_inner, d_model)
    return dict(w1=w1.astype(jnp.bfloat16), b1=b1,
                w2=w2.astype(jnp.bfloat16), b2=b2,
                ln_g=jnp.ones((1, d_model), jnp.float32),
                ln_b=jnp.zeros((1, d_model), jnp.float32))


def _stack(layers, sub, keys):
    return [jnp.stack([l[sub][k] for l in layers], axis=0) for k in keys]


def init_params(key, d_model, d_hidden, n_layer, n_vocab=256, n_dir=6, dir_pad=128):
    keys = jax.random.split(key, 4 + 2 * n_layer)
    params = {}
    params["embedding"] = jax.random.normal(keys[0], (n_vocab, d_model), jnp.float32) * 0.02

    w, b = _init_dense(keys[1], 3, d_model)
    params["child_enc_w"] = w.astype(jnp.bfloat16)
    params["child_enc_b"] = b

    w, b = _init_dense(keys[2], d_model, n_vocab)
    params["parent_dec_w"] = w.astype(jnp.bfloat16)
    params["parent_dec_b"] = b

    # dir head lane-padded to 128 for dense stores; padded bias = -1e30 -> softmax 0.
    w, b = _init_dense(keys[3], d_model, n_dir)
    wd = jnp.zeros((d_model, dir_pad), jnp.float32).at[:, :n_dir].set(w)
    bd = jnp.full((1, dir_pad), -1e30, jnp.float32).at[:, :n_dir].set(b)
    params["dir_dec_w_pad"] = wd.astype(jnp.bfloat16)
    params["dir_dec_b_pad"] = bd

    enc_layers = []
    for i in range(n_layer):
        k1, k2 = jax.random.split(keys[4 + i])
        enc_layers.append(dict(slf=_init_mha(k1, d_model), ffn=_init_ffn(k2, d_model, d_hidden)))
    dec_layers = []
    for i in range(n_layer):
        k1, k2, k3 = jax.random.split(keys[4 + n_layer + i], 3)
        dec_layers.append(dict(slf=_init_mha(k1, d_model), crs=_init_mha(k2, d_model),
                               ffn=_init_ffn(k3, d_model, d_hidden)))

    # Stack per-layer weights along a leading layer axis so a single kernel can
    # statically loop over all layers of the stack.
    params["enc_weights"] = tuple(_stack(enc_layers, "slf", _MHA_KEYS) +
                                  _stack(enc_layers, "ffn", _FFN_KEYS))
    params["dec_weights"] = tuple(_stack(dec_layers, "slf", _MHA_KEYS) +
                                  _stack(dec_layers, "crs", _MHA_KEYS) +
                                  _stack(dec_layers, "ffn", _FFN_KEYS))
    # child_encoder / child_decoder exist in __init__ of the reference but are never used.
    return params


# ----------------------------------- main -----------------------------------

if __name__ == "__main__":
    B, S = 2, 8
    d_model, d_hidden, n_head, n_layer = 32, 64, 4, 2

    key = jax.random.PRNGKey(0)
    k_param, k_seq, k_child = jax.random.split(key, 3)

    params = init_params(k_param, d_model, d_hidden, n_layer)

    parent_seq = jax.random.randint(k_seq, (B, S), 0, 256, dtype=jnp.int32)
    child_seq = jax.random.normal(k_child, (B, S, 3), jnp.float32)
    lengths = jnp.array([8, 6], jnp.int32)
    pad_mask = (jnp.arange(S)[None, :] < lengths[:, None])          # (B, S) bool

    fwd = jax.jit(functools.partial(transformer_forward, n_head=n_head))
    out_parent, out_dir = fwd(params, parent_seq, child_seq, pad_mask)
    jax.block_until_ready((out_parent, out_dir))

    assert out_parent.shape == (B, S, 256)
    assert out_dir.shape == (B, S, 6)
    assert bool(jnp.all(jnp.isfinite(out_parent))) and bool(jnp.all(jnp.isfinite(out_dir)))
    # softmax rows must sum to ~1
    assert bool(jnp.allclose(jnp.sum(out_parent, -1), 1.0, atol=1e-3))
    assert bool(jnp.allclose(jnp.sum(out_dir, -1), 1.0, atol=1e-3))
    print("KERNEL_OK")
</pallas_src>

<mosaic_0001>
module attributes {stable_mosaic.version = 11 : i64} {
  func.func @_child_encode_kernel(%arg0: memref<16x3xf32, #tpu.memory_space<vmem>>, %arg1: memref<3x32xbf16, #tpu.memory_space<vmem>>, %arg2: memref<1x32xf32, #tpu.memory_space<vmem>>, %arg3: memref<16x32xf32, #tpu.memory_space<vmem>>) attributes {dimension_semantics = [], scalar_prefetch = 0 : i64, scratch_operands = 0 : i64, tpu.core_type = #tpu.core_type<tc>} {
    %c0 = arith.constant 0 : index
    %c0_0 = arith.constant 0 : index
    %0 = vector.load %arg0[%c0, %c0_0] : memref<16x3xf32, #tpu.memory_space<vmem>>, vector<16x3xf32>
    %c0_1 = arith.constant 0 : index
    %c0_2 = arith.constant 0 : index
    %1 = vector.load %arg1[%c0_1, %c0_2] : memref<3x32xbf16, #tpu.memory_space<vmem>>, vector<3x32xbf16>
    %2 = arith.truncf %0 : vector<16x3xf32> to vector<16x3xbf16>
    %cst = arith.constant dense<0.000000e+00> : vector<16x32xf32>
    %3 = tpu.matmul %2, %1, %cst {dimension_numbers = #tpu.dot_dimension_numbers<[1], [0], [0], [1], [0, 0, 1, 1], [], []>} : vector<16x3xbf16>, vector<3x32xbf16>, vector<16x32xf32> -> vector<16x32xf32>
    %c0_3 = arith.constant 0 : index
    %c0_4 = arith.constant 0 : index
    %4 = vector.load %arg2[%c0_3, %c0_4] : memref<1x32xf32, #tpu.memory_space<vmem>>, vector<1x32xf32>
    %5 = vector.broadcast %4 : vector<1x32xf32> to vector<16x32xf32>
    %6 = arith.addf %3, %5 : vector<16x32xf32>
    %c0_5 = arith.constant 0 : index
    %c0_6 = arith.constant 0 : index
    %7 = vector.load %arg3[%c0_5, %c0_6] : memref<16x32xf32, #tpu.memory_space<vmem>>, vector<16x32xf32>
    tpu.vector_store %arg3[%c0_5, %c0_6], %6 {strides = array<i32>} : memref<16x32xf32, #tpu.memory_space<vmem>>, vector<16x32xf32>,
    return
  }
}

module attributes {stable_mosaic.version = 11 : i64} {
  func.func @_encoder_stack_kernel(%arg0: i32, %arg1: memref<4xi32, #tpu.memory_space<smem>>, %arg2: memref<1x8x32xf32, #tpu.memory_space<vmem>>, %arg3: memref<1x1x8xf32, #tpu.memory_space<vmem>>, %arg4: memref<2x32x96xbf16, #tpu.memory_space<vmem>>, %arg5: memref<2x1x96xf32, #tpu.memory_space<vmem>>, %arg6: memref<2x32x32xbf16, #tpu.memory_space<vmem>>, %arg7: memref<2x1x32xf32, #tpu.memory_space<vmem>>, %arg8: memref<2x1x32xf32, #tpu.memory_space<vmem>>, %arg9: memref<2x1x32xf32, #tpu.memory_space<vmem>>, %arg10: memref<2x32x64xbf16, #tpu.memory_space<vmem>>, %arg11: memref<2x1x64xf32, #tpu.memory_space<vmem>>, %arg12: memref<2x64x32xbf16, #tpu.memory_space<vmem>>, %arg13: memref<2x1x32xf32, #tpu.memory_space<vmem>>, %arg14: memref<2x1x32xf32, #tpu.memory_space<vmem>>, %arg15: memref<2x1x32xf32, #tpu.memory_space<vmem>>, %arg16: memref<1x8x32xf32, #tpu.memory_space<vmem>>) attributes {dimension_semantics = [#tpu.dimension_semantics<parallel>], iteration_bounds = array<i64: 4>, scalar_prefetch = 0 : i64, scratch_operands = 0 : i64, tpu.core_type = #tpu.core_type<tc>, window_params = [{transform_indices = @transform_0, window_bounds = array<i64: 4>}, {transform_indices = @transform_1, window_bounds = array<i64: 1, 8, 32>}, {transform_indices = @transform_2, window_bounds = array<i64: 1, 1, 8>}, {pipeline_mode = #tpu.pipeline_mode<synchronous>, transform_indices = @transform_3, window_bounds = array<i64: 2, 32, 96>}, {pipeline_mode = #tpu.pipeline_mode<synchronous>, transform_indices = @transform_4, window_bounds = array<i64: 2, 1, 96>}, {pipeline_mode = #tpu.pipeline_mode<synchronous>, transform_indices = @transform_5, window_bounds = array<i64: 2, 32, 32>}, {pipeline_mode = #tpu.pipeline_mode<synchronous>, transform_indices = @transform_6, window_bounds = array<i64: 2, 1, 32>}, {pipeline_mode = #tpu.pipeline_mode<synchronous>, transform_indices = @transform_7, window_bounds = array<i64: 2, 1, 32>}, {pipeline_mode = #tpu.pipeline_mode<synchronous>, transform_indices = @transform_8, window_bounds = array<i64: 2, 1, 32>}, {pipeline_mode = #tpu.pipeline_mode<synchronous>, transform_indices = @transform_9, window_bounds = array<i64: 2, 32, 64>}, {pipeline_mode = #tpu.pipeline_mode<synchronous>, transform_indices = @transform_10, window_bounds = array<i64: 2, 1, 64>}, {pipeline_mode = #tpu.pipeline_mode<synchronous>, transform_indices = @transform_11, window_bounds = array<i64: 2, 64, 32>}, {pipeline_mode = #tpu.pipeline_mode<synchronous>, transform_indices = @transform_12, window_bounds = array<i64: 2, 1, 32>}, {pipeline_mode = #tpu.pipeline_mode<synchronous>, transform_indices = @transform_13, window_bounds = array<i64: 2, 1, 32>}, {pipeline_mode = #tpu.pipeline_mode<synchronous>, transform_indices = @transform_14, window_bounds = array<i64: 2, 1, 32>}, {transform_indices = @transform_15, window_bounds = array<i64: 1, 8, 32>}]} {
    %c0 = arith.constant 0 : index
    %c0_0 = arith.constant 0 : index
    %c0_1 = arith.constant 0 : index
    %0 = vector.load %arg2[%c0, %c0_0, %c0_1] : memref<1x8x32xf32, #tpu.memory_space<vmem>>, vector<1x8x32xf32>
    %1 = vector.shape_cast %0 : vector<1x8x32xf32> to vector<8x32xf32>
    %c0_2 = arith.constant 0 : index
    %c0_3 = arith.constant 0 : index
    %c0_4 = arith.constant 0 : index
    %2 = vector.load %arg3[%c0_2, %c0_3, %c0_4] : memref<1x1x8xf32, #tpu.memory_space<vmem>>, vector<1x1x8xf32>
    %3 = vector.shape_cast %2 : vector<1x1x8xf32> to vector<1x8xf32>
    %4 = arith.index_cast %arg0 : i32 to index
    %5 = memref.load %arg1[%4] : memref<4xi32, #tpu.memory_space<smem>>
    %6 = tpu.iota {dimensions = array<i32: 0>} : vector<8x8xi32>
    %7 = tpu.iota {dimensions = array<i32: 1>} : vector<8x8xi32>
    %8 = arith.subi %7, %6 : vector<8x8xi32>
    %c1_i32 = arith.constant 1 : i32
    %9 = arith.subi %5, %c1_i32 : i32
    %10 = vector.broadcast %9 : i32 to vector<8x8xi32>
    %11 = arith.cmpi sle, %8, %10 : vector<8x8xi32>
    %cst = arith.constant 5.000000e-01 : f32
    %12 = vector.broadcast %cst : f32 to vector<1x8xf32>
    %13 = arith.cmpf ogt, %3, %12 : vector<1x8xf32>
    %14 = vector.broadcast %13 : vector<1x8xi1> to vector<8x8xi1>
    %15 = arith.andi %11, %14 : vector<8x8xi1>
    %c0_5 = arith.constant 0 : index
    %c0_6 = arith.constant 0 : index
    %c0_7 = arith.constant 0 : index
    %16 = vector.load %arg4[%c0_5, %c0_6, %c0_7] : memref<2x32x96xbf16, #tpu.memory_space<vmem>>, vector<1x32x96xbf16>
    %17 = vector.shape_cast %16 : vector<1x32x96xbf16> to vector<32x96xbf16>
    %c0_8 = arith.constant 0 : index
    %c0_9 = arith.constant 0 : index
    %c0_10 = arith.constant 0 : index
    %18 = vector.load %arg5[%c0_8, %c0_9, %c0_10] : memref<2x1x96xf32, #tpu.memory_space<vmem>>, vector<1x1x96xf32>
    %19 = vector.shape_cast %18 : vector<1x1x96xf32> to vector<1x96xf32>
    %c0_11 = arith.constant 0 : index
    %c0_12 = arith.constant 0 : index
    %c0_13 = arith.constant 0 : index
    %20 = vector.load %arg6[%c0_11, %c0_12, %c0_13] : memref<2x32x32xbf16, #tpu.memory_space<vmem>>, vector<1x32x32xbf16>
    %21 = vector.shape_cast %20 : vector<1x32x32xbf16> to vector<32x32xbf16>
    %c0_14 = arith.constant 0 : index
    %c0_15 = arith.constant 0 : index
    %c0_16 = arith.constant 0 : index
    %22 = vector.load %arg7[%c0_14, %c0_15, %c0_16] : memref<2x1x32xf32, #tpu.memory_space<vmem>>, vector<1x1x32xf32>
    %23 = vector.shape_cast %22 : vector<1x1x32xf32> to vector<1x32xf32>
    %c0_17 = arith.constant 0 : index
    %c0_18 = arith.constant 0 : index
    %c0_19 = arith.constant 0 : index
    %24 = vector.load %arg8[%c0_17, %c0_18, %c0_19] : memref<2x1x32xf32, #tpu.memory_space<vmem>>, vector<1x1x32xf32>
    %25 = vector.shape_cast %24 : vector<1x1x32xf32> to vector<1x32xf32>
    %c0_20 = arith.constant 0 : index
    %c0_21 = arith.constant 0 : index
    %c0_22 = arith.constant 0 : index
    %26 = vector.load %arg9[%c0_20, %c0_21, %c0_22] : memref<2x1x32xf32, #tpu.memory_space<vmem>>, vector<1x1x32xf32>
    %27 = vector.shape_cast %26 : vector<1x1x32xf32> to vector<1x32xf32>
    %28 = arith.truncf %1 : vector<8x32xf32> to vector<8x32xbf16>
    %cst_23 = arith.constant dense<0.000000e+00> : vector<8x96xf32>
    %29 = tpu.matmul %28, %17, %cst_23 {dimension_numbers = #tpu.dot_dimension_numbers<[1], [0], [0], [1], [0, 0, 1, 1], [], []>} : vector<8x32xbf16>, vector<32x96xbf16>, vector<8x96xf32> -> vector<8x96xf32>
    %30 = vector.broadcast %19 : vector<1x96xf32> to vector<8x96xf32>
    %31 = arith.addf %29, %30 : vector<8x96xf32>
    %32 = vector.extract_strided_slice %31 {offsets = [0, 0], sizes = [8, 32], strides = [1, 1]} : vector<8x96xf32> to vector<8x32xf32>
    %33 = vector.extract_strided_slice %31 {offsets = [0, 32], sizes = [8, 32], strides = [1, 1]} : vector<8x96xf32> to vector<8x32xf32>
    %34 = vector.extract_strided_slice %31 {offsets = [0, 64], sizes = [8, 32], strides = [1, 1]} : vector<8x96xf32> to vector<8x32xf32>
    %35 = vector.extract_strided_slice %32 {offsets = [0, 0], sizes = [8, 8], strides = [1, 1]} : vector<8x32xf32> to vector<8x8xf32>
    %36 = vector.extract_strided_slice %33 {offsets = [0, 0], sizes = [8, 8], strides = [1, 1]} : vector<8x32xf32> to vector<8x8xf32>
    %37 = arith.truncf %35 : vector<8x8xf32> to vector<8x8xbf16>
    %38 = arith.truncf %36 : vector<8x8xf32> to vector<8x8xbf16>
    %cst_24 = arith.constant dense<0.000000e+00> : vector<8x8xf32>
    %39 = tpu.matmul %37, %38, %cst_24 {dimension_numbers = #tpu.dot_dimension_numbers<[1], [1], [0], [0], [0, 0, 1, 0], [], []>} : vector<8x8xbf16>, vector<8x8xbf16>, vector<8x8xf32> -> vector<8x8xf32>
    %cst_25 = arith.constant 0.353553385 : f32
    %40 = vector.broadcast %cst_25 : f32 to vector<8x8xf32>
    %41 = arith.mulf %39, %40 : vector<8x8xf32>
    %cst_26 = arith.constant -1.000000e+09 : f32
    %42 = vector.broadcast %cst_26 : f32 to vector<8x8xf32>
    %43 = arith.select %15, %41, %42 : vector<8x8xi1>, vector<8x8xf32>
    %cst_27 = arith.constant dense<0xFF800000> : vector<8xf32>
    %44 = vector.multi_reduction <maximumf>, %43, %cst_27 [1] : vector<8x8xf32> to vector<8xf32>
    %45 = vector.shape_cast %44 : vector<8xf32> to vector<8x1xf32>
    %46 = vector.broadcast %45 : vector<8x1xf32> to vector<8x8xf32>
    %47 = arith.subf %43, %46 : vector<8x8xf32>
    %48 = math.exp %47 : vector<8x8xf32>
    %cst_28 = arith.constant dense<0.000000e+00> : vector<8xf32>
    %49 = vector.multi_reduction <add>, %48, %cst_28 [1] : vector<8x8xf32> to vector<8xf32>
    %50 = vector.shape_cast %49 : vector<8xf32> to vector<8x1xf32>
    %51 = tpu.reciprocal %50 {approx = true} : vector<8x1xf32> -> vector<8x1xf32>
    %52 = vector.broadcast %51 : vector<8x1xf32> to vector<8x8xf32>
    %53 = arith.mulf %48, %52 : vector<8x8xf32>
    %54 = vector.extract_strided_slice %34 {offsets = [0, 0], sizes = [8, 8], strides = [1, 1]} : vector<8x32xf32> to vector<8x8xf32>
    %55 = arith.truncf %53 : vector<8x8xf32> to vector<8x8xbf16>
    %56 = arith.truncf %54 : vector<8x8xf32> to vector<8x8xbf16>
    %cst_29 = arith.constant dense<0.000000e+00> : vector<8x8xf32>
    %57 = tpu.matmul %55, %56, %cst_29 {dimension_numbers = #tpu.dot_dimension_numbers<[1], [0], [0], [1], [0, 0, 1, 1], [], []>} : vector<8x8xbf16>, vector<8x8xbf16>, vector<8x8xf32> -> vector<8x8xf32>
    %58 = vector.extract_strided_slice %32 {offsets = [0, 8], sizes = [8, 8], strides = [1, 1]} : vector<8x32xf32> to vector<8x8xf32>
    %59 = vector.extract_strided_slice %33 {offsets = [0, 8], sizes = [8, 8], strides = [1, 1]} : vector<8x32xf32> to vector<8x8xf32>
    %60 = arith.truncf %58 : vector<8x8xf32> to vector<8x8xbf16>
    %61 = arith.truncf %59 : vector<8x8xf32> to vector<8x8xbf16>
    %cst_30 = arith.constant dense<0.000000e+00> : vector<8x8xf32>
    %62 = tpu.matmul %60, %61, %cst_30 {dimension_numbers = #tpu.dot_dimension_numbers<[1], [1], [0], [0], [0, 0, 1, 0], [], []>} : vector<8x8xbf16>, vector<8x8xbf16>, vector<8x8xf32> -> vector<8x8xf32>
    %cst_31 = arith.constant 0.353553385 : f32
    %63 = vector.broadcast %cst_31 : f32 to vector<8x8xf32>
    %64 = arith.mulf %62, %63 : vector<8x8xf32>
    %cst_32 = arith.constant -1.000000e+09 : f32
    %65 = vector.broadcast %cst_32 : f32 to vector<8x8xf32>
    %66 = arith.select %15, %64, %65 : vector<8x8xi1>, vector<8x8xf32>
    %cst_33 = arith.constant dense<0xFF800000> : vector<8xf32>
    %67 = vector.multi_reduction <maximumf>, %66, %cst_33 [1] : vector<8x8xf32> to vector<8xf32>
    %68 = vector.shape_cast %67 : vector<8xf32> to vector<8x1xf32>
    %69 = vector.broadcast %68 : vector<8x1xf32> to vector<8x8xf32>
    %70 = arith.subf %66, %69 : vector<8x8xf32>
    %71 = math.exp %70 : vector<8x8xf32>
    %cst_34 = arith.constant dense<0.000000e+00> : vector<8xf32>
    %72 = vector.multi_reduction <add>, %71, %cst_34 [1] : vector<8x8xf32> to vector<8xf32>
    %73 = vector.shape_cast %72 : vector<8xf32> to vector<8x1xf32>
    %74 = tpu.reciprocal %73 {approx = true} : vector<8x1xf32> -> vector<8x1xf32>
    %75 = vector.broadcast %74 : vector<8x1xf32> to vector<8x8xf32>
    %76 = arith.mulf %71, %75 : vector<8x8xf32>
    %77 = vector.extract_strided_slice %34 {offsets = [0, 8], sizes = [8, 8], strides = [1, 1]} : vector<8x32xf32> to vector<8x8xf32>
    %78 = arith.truncf %76 : vector<8x8xf32> to vector<8x8xbf16>
    %79 = arith.truncf %77 : vector<8x8xf32> to vector<8x8xbf16>
    %cst_35 = arith.constant dense<0.000000e+00> : vector<8x8xf32>
    %80 = tpu.matmul %78, %79, %cst_35 {dimension_numbers = #tpu.dot_dimension_numbers<[1], [0], [0], [1], [0, 0, 1, 1], [], []>} : vector<8x8xbf16>, vector<8x8xbf16>, vector<8x8xf32> -> vector<8x8xf32>
    %81 = vector.extract_strided_slice %32 {offsets = [0, 16], sizes = [8, 8], strides = [1, 1]} : vector<8x32xf32> to vector<8x8xf32>
    %82 = vector.extract_strided_slice %33 {offsets = [0, 16], sizes = [8, 8], strides = [1, 1]} : vector<8x32xf32> to vector<8x8xf32>
    %83 = arith.truncf %81 : vector<8x8xf32> to vector<8x8xbf16>
    %84 = arith.truncf %82 : vector<8x8xf32> to vector<8x8xbf16>
    %cst_36 = arith.constant dense<0.000000e+00> : vector<8x8xf32>
    %85 = tpu.matmul %83, %84, %cst_36 {dimension_numbers = #tpu.dot_dimension_numbers<[1], [1], [0], [0], [0, 0, 1, 0], [], []>} : vector<8x8xbf16>, vector<8x8xbf16>, vector<8x8xf32> -> vector<8x8xf32>
    %cst_37 = arith.constant 0.353553385 : f32
    %86 = vector.broadcast %cst_37 : f32 to vector<8x8xf32>
    %87 = arith.mulf %85, %86 : vector<8x8xf32>
    %cst_38 = arith.constant -1.000000e+09 : f32
    %88 = vector.broadcast %cst_38 : f32 to vector<8x8xf32>
    %89 = arith.select %15, %87, %88 : vector<8x8xi1>, vector<8x8xf32>
    %cst_39 = arith.constant dense<0xFF800000> : vector<8xf32>
    %90 = vector.multi_reduction <maximumf>, %89, %cst_39 [1] : vector<8x8xf32> to vector<8xf32>
    %91 = vector.shape_cast %90 : vector<8xf32> to vector<8x1xf32>
    %92 = vector.broadcast %91 : vector<8x1xf32> to vector<8x8xf32>
    %93 = arith.subf %89, %92 : vector<8x8xf32>
    %94 = math.exp %93 : vector<8x8xf32>
    %cst_40 = arith.constant dense<0.000000e+00> : vector<8xf32>
    %95 = vector.multi_reduction <add>, %94, %cst_40 [1] : vector<8x8xf32> to vector<8xf32>
    %96 = vector.shape_cast %95 : vector<8xf32> to vector<8x1xf32>
    %97 = tpu.reciprocal %96 {approx = true} : vector<8x1xf32> -> vector<8x1xf32>
    %98 = vector.broadcast %97 : vector<8x1xf32> to vector<8x8xf32>
    %99 = arith.mulf %94, %98 : vector<8x8xf32>
    %100 = vector.extract_strided_slice %34 {offsets = [0, 16], sizes = [8, 8], strides = [1, 1]} : vector<8x32xf32> to vector<8x8xf32>
    %101 = arith.truncf %99 : vector<8x8xf32> to vector<8x8xbf16>
    %102 = arith.truncf %100 : vector<8x8xf32> to vector<8x8xbf16>
    %cst_41 = arith.constant dense<0.000000e+00> : vector<8x8xf32>
    %103 = tpu.matmul %101, %102, %cst_41 {dimension_numbers = #tpu.dot_dimension_numbers<[1], [0], [0], [1], [0, 0, 1, 1], [], []>} : vector<8x8xbf16>, vector<8x8xbf16>, vector<8x8xf32> -> vector<8x8xf32>
    %104 = vector.extract_strided_slice %32 {offsets = [0, 24], sizes = [8, 8], strides = [1, 1]} : vector<8x32xf32> to vector<8x8xf32>
    %105 = vector.extract_strided_slice %33 {offsets = [0, 24], sizes = [8, 8], strides = [1, 1]} : vector<8x32xf32> to vector<8x8xf32>
    %106 = arith.truncf %104 : vector<8x8xf32> to vector<8x8xbf16>
    %107 = arith.truncf %105 : vector<8x8xf32> to vector<8x8xbf16>
    %cst_42 = arith.constant dense<0.000000e+00> : vector<8x8xf32>
    %108 = tpu.matmul %106, %107, %cst_42 {dimension_numbers = #tpu.dot_dimension_numbers<[1], [1], [0], [0], [0, 0, 1, 0], [], []>} : vector<8x8xbf16>, vector<8x8xbf16>, vector<8x8xf32> -> vector<8x8xf32>
    %cst_43 = arith.constant 0.353553385 : f32
    %109 = vector.broadcast %cst_43 : f32 to vector<8x8xf32>
    %110 = arith.mulf %108, %109 : vector<8x8xf32>
    %cst_44 = arith.constant -1.000000e+09 : f32
    %111 = vector.broadcast %cst_44 : f32 to vector<8x8xf32>
    %112 = arith.select %15, %110, %111 : vector<8x8xi1>, vector<8x8xf32>
    %cst_45 = arith.constant dense<0xFF800000> : vector<8xf32>
    %113 = vector.multi_reduction <maximumf>, %112, %cst_45 [1] : vector<8x8xf32> to vector<8xf32>
    %114 = vector.shape_cast %113 : vector<8xf32> to vector<8x1xf32>
    %115 = vector.broadcast %114 : vector<8x1xf32> to vector<8x8xf32>
    %116 = arith.subf %112, %115 : vector<8x8xf32>
    %117 = math.exp %116 : vector<8x8xf32>
    %cst_46 = arith.constant dense<0.000000e+00> : vector<8xf32>
    %118 = vector.multi_reduction <add>, %117, %cst_46 [1] : vector<8x8xf32> to vector<8xf32>
    %119 = vector.shape_cast %118 : vector<8xf32> to vector<8x1xf32>
    %120 = tpu.reciprocal %119 {approx = true} : vector<8x1xf32> -> vector<8x1xf32>
    %121 = vector.broadcast %120 : vector<8x1xf32> to vector<8x8xf32>
    %122 = arith.mulf %117, %121 : vector<8x8xf32>
    %123 = vector.extract_strided_slice %34 {offsets = [0, 24], sizes = [8, 8], strides = [1, 1]} : vector<8x32xf32> to vector<8x8xf32>
    %124 = arith.truncf %122 : vector<8x8xf32> to vector<8x8xbf16>
    %125 = arith.truncf %123 : vector<8x8xf32> to vector<8x8xbf16>
    %cst_47 = arith.constant dense<0.000000e+00> : vector<8x8xf32>
    %126 = tpu.matmul %124, %125, %cst_47 {dimension_numbers = #tpu.dot_dimension_numbers<[1], [0], [0], [1], [0, 0, 1, 1], [], []>} : vector<8x8xbf16>, vector<8x8xbf16>, vector<8x8xf32> -> vector<8x8xf32>
    %127 = tpu.concatenate %57, %80, %103, %126 in 1 : vector<8x8xf32>, vector<8x8xf32>, vector<8x8xf32>, vector<8x8xf32> -> vector<8x32xf32>
    %128 = arith.truncf %127 : vector<8x32xf32> to vector<8x32xbf16>
    %cst_48 = arith.constant dense<0.000000e+00> : vector<8x32xf32>
    %129 = tpu.matmul %128, %21, %cst_48 {dimension_numbers = #tpu.dot_dimension_numbers<[1], [0], [0], [1], [0, 0, 1, 1], [], []>} : vector<8x32xbf16>, vector<32x32xbf16>, vector<8x32xf32> -> vector<8x32xf32>
    %130 = vector.broadcast %23 : vector<1x32xf32> to vector<8x32xf32>
    %131 = arith.addf %129, %130 : vector<8x32xf32>
    %132 = arith.addf %131, %1 : vector<8x32xf32>
    %cst_49 = arith.constant dense<0.000000e+00> : vector<8xf32>
    %133 = vector.multi_reduction <add>, %132, %cst_49 [1] : vector<8x32xf32> to vector<8xf32>
    %134 = vector.shape_cast %133 : vector<8xf32> to vector<8x1xf32>
    %cst_50 = arith.constant 3.200000e+01 : f32
    %135 = vector.broadcast %cst_50 : f32 to vector<8x1xf32>
    %136 = arith.divf %134, %135 : vector<8x1xf32>
    %137 = vector.broadcast %136 : vector<8x1xf32> to vector<8x32xf32>
    %138 = arith.subf %132, %137 : vector<8x32xf32>
    %139 = arith.mulf %138, %138 : vector<8x32xf32>
    %cst_51 = arith.constant dense<0.000000e+00> : vector<8xf32>
    %140 = vector.multi_reduction <add>, %139, %cst_51 [1] : vector<8x32xf32> to vector<8xf32>
    %141 = vector.shape_cast %140 : vector<8xf32> to vector<8x1xf32>
    %cst_52 = arith.constant 3.200000e+01 : f32
    %142 = vector.broadcast %cst_52 : f32 to vector<8x1xf32>
    %143 = arith.divf %141, %142 : vector<8x1xf32>
    %144 = vector.broadcast %136 : vector<8x1xf32> to vector<8x32xf32>
    %145 = arith.subf %132, %144 : vector<8x32xf32>
    %cst_53 = arith.constant 9.99999974E-6 : f32
    %146 = vector.broadcast %cst_53 : f32 to vector<8x1xf32>
    %147 = arith.addf %143, %146 : vector<8x1xf32>
    %148 = math.rsqrt %147 : vector<8x1xf32>
    %149 = vector.broadcast %148 : vector<8x1xf32> to vector<8x32xf32>
    %150 = arith.mulf %145, %149 : vector<8x32xf32>
    %151 = vector.broadcast %25 : vector<1x32xf32> to vector<8x32xf32>
    %152 = arith.mulf %150, %151 : vector<8x32xf32>
    %153 = vector.broadcast %27 : vector<1x32xf32> to vector<8x32xf32>
    %154 = arith.addf %152, %153 : vector<8x32xf32>
    %c0_54 = arith.constant 0 : index
    %c0_55 = arith.constant 0 : index
    %c0_56 = arith.constant 0 : index
    %155 = vector.load %arg10[%c0_54, %c0_55, %c0_56] : memref<2x32x64xbf16, #tpu.memory_space<vmem>>, vector<1x32x64xbf16>
    %156 = vector.shape_cast %155 : vector<1x32x64xbf16> to vector<32x64xbf16>
    %c0_57 = arith.constant 0 : index
    %c0_58 = arith.constant 0 : index
    %c0_59 = arith.constant 0 : index
    %157 = vector.load %arg11[%c0_57, %c0_58, %c0_59] : memref<2x1x64xf32, #tpu.memory_space<vmem>>, vector<1x1x64xf32>
    %158 = vector.shape_cast %157 : vector<1x1x64xf32> to vector<1x64xf32>
    %c0_60 = arith.constant 0 : index
    %c0_61 = arith.constant 0 : index
    %c0_62 = arith.constant 0 : index
    %159 = vector.load %arg12[%c0_60, %c0_61, %c0_62] : memref<2x64x32xbf16, #tpu.memory_space<vmem>>, vector<1x64x32xbf16>
    %160 = vector.shape_cast %159 : vector<1x64x32xbf16> to vector<64x32xbf16>
    %c0_63 = arith.constant 0 : index
    %c0_64 = arith.constant 0 : index
    %c0_65 = arith.constant 0 : index
    %161 = vector.load %arg13[%c0_63, %c0_64, %c0_65] : memref<2x1x32xf32, #tpu.memory_space<vmem>>, vector<1x1x32xf32>
    %162 = vector.shape_cast %161 : vector<1x1x32xf32> to vector<1x32xf32>
    %c0_66 = arith.constant 0 : index
    %c0_67 = arith.constant 0 : index
    %c0_68 = arith.constant 0 : index
    %163 = vector.load %arg14[%c0_66, %c0_67, %c0_68] : memref<2x1x32xf32, #tpu.memory_space<vmem>>, vector<1x1x32xf32>
    %164 = vector.shape_cast %163 : vector<1x1x32xf32> to vector<1x32xf32>
    %c0_69 = arith.constant 0 : index
    %c0_70 = arith.constant 0 : index
    %c0_71 = arith.constant 0 : index
    %165 = vector.load %arg15[%c0_69, %c0_70, %c0_71] : memref<2x1x32xf32, #tpu.memory_space<vmem>>, vector<1x1x32xf32>
    %166 = vector.shape_cast %165 : vector<1x1x32xf32> to vector<1x32xf32>
    %167 = arith.truncf %154 : vector<8x32xf32> to vector<8x32xbf16>
    %cst_72 = arith.constant dense<0.000000e+00> : vector<8x64xf32>
    %168 = tpu.matmul %167, %156, %cst_72 {dimension_numbers = #tpu.dot_dimension_numbers<[1], [0], [0], [1], [0, 0, 1, 1], [], []>} : vector<8x32xbf16>, vector<32x64xbf16>, vector<8x64xf32> -> vector<8x64xf32>
    %169 = vector.broadcast %158 : vector<1x64xf32> to vector<8x64xf32>
    %170 = arith.addf %168, %169 : vector<8x64xf32>
    %cst_73 = arith.constant 0.000000e+00 : f32
    %171 = vector.broadcast %cst_73 : f32 to vector<8x64xf32>
    %172 = arith.maximumf %170, %171 : vector<8x64xf32>
    %173 = arith.truncf %172 : vector<8x64xf32> to vector<8x64xbf16>
    %cst_74 = arith.constant dense<0.000000e+00> : vector<8x32xf32>
    %174 = tpu.matmul %173, %160, %cst_74 {dimension_numbers = #tpu.dot_dimension_numbers<[1], [0], [0], [1], [0, 0, 1, 1], [], []>} : vector<8x64xbf16>, vector<64x32xbf16>, vector<8x32xf32> -> vector<8x32xf32>
    %175 = vector.broadcast %162 : vector<1x32xf32> to vector<8x32xf32>
    %176 = arith.addf %174, %175 : vector<8x32xf32>
    %177 = arith.addf %176, %154 : vector<8x32xf32>
    %cst_75 = arith.constant dense<0.000000e+00> : vector<8xf32>
    %178 = vector.multi_reduction <add>, %177, %cst_75 [1] : vector<8x32xf32> to vector<8xf32>
    %179 = vector.shape_cast %178 : vector<8xf32> to vector<8x1xf32>
    %cst_76 = arith.constant 3.200000e+01 : f32
    %180 = vector.broadcast %cst_76 : f32 to vector<8x1xf32>
    %181 = arith.divf %179, %180 : vector<8x1xf32>
    %182 = vector.broadcast %181 : vector<8x1xf32> to vector<8x32xf32>
    %183 = arith.subf %177, %182 : vector<8x32xf32>
    %184 = arith.mulf %183, %183 : vector<8x32xf32>
    %cst_77 = arith.constant dense<0.000000e+00> : vector<8xf32>
    %185 = vector.multi_reduction <add>, %184, %cst_77 [1] : vector<8x32xf32> to vector<8xf32>
    %186 = vector.shape_cast %185 : vector<8xf32> to vector<8x1xf32>
    %cst_78 = arith.constant 3.200000e+01 : f32
    %187 = vector.broadcast %cst_78 : f32 to vector<8x1xf32>
    %188 = arith.divf %186, %187 : vector<8x1xf32>
    %189 = vector.broadcast %181 : vector<8x1xf32> to vector<8x32xf32>
    %190 = arith.subf %177, %189 : vector<8x32xf32>
    %cst_79 = arith.constant 9.99999974E-6 : f32
    %191 = vector.broadcast %cst_79 : f32 to vector<8x1xf32>
    %192 = arith.addf %188, %191 : vector<8x1xf32>
    %193 = math.rsqrt %192 : vector<8x1xf32>
    %194 = vector.broadcast %193 : vector<8x1xf32> to vector<8x32xf32>
    %195 = arith.mulf %190, %194 : vector<8x32xf32>
    %196 = vector.broadcast %164 : vector<1x32xf32> to vector<8x32xf32>
    %197 = arith.mulf %195, %196 : vector<8x32xf32>
    %198 = vector.broadcast %166 : vector<1x32xf32> to vector<8x32xf32>
    %199 = arith.addf %197, %198 : vector<8x32xf32>
    %c1 = arith.constant 1 : index
    %c0_80 = arith.constant 0 : index
    %c0_81 = arith.constant 0 : index
    %200 = vector.load %arg4[%c1, %c0_80, %c0_81] : memref<2x32x96xbf16, #tpu.memory_space<vmem>>, vector<1x32x96xbf16>
    %201 = vector.shape_cast %200 : vector<1x32x96xbf16> to vector<32x96xbf16>
    %c1_82 = arith.constant 1 : index
    %c0_83 = arith.constant 0 : index
    %c0_84 = arith.constant 0 : index
    %202 = vector.load %arg5[%c1_82, %c0_83, %c0_84] : memref<2x1x96xf32, #tpu.memory_space<vmem>>, vector<1x1x96xf32>
    %203 = vector.shape_cast %202 : vector<1x1x96xf32> to vector<1x96xf32>
    %c1_85 = arith.constant 1 : index
    %c0_86 = arith.constant 0 : index
    %c0_87 = arith.constant 0 : index
    %204 = vector.load %arg6[%c1_85, %c0_86, %c0_87] : memref<2x32x32xbf16, #tpu.memory_space<vmem>>, vector<1x32x32xbf16>
    %205 = vector.shape_cast %204 : vector<1x32x32xbf16> to vector<32x32xbf16>
    %c1_88 = arith.constant 1 : index
    %c0_89 = arith.constant 0 : index
    %c0_90 = arith.constant 0 : index
    %206 = vector.load %arg7[%c1_88, %c0_89, %c0_90] : memref<2x1x32xf32, #tpu.memory_space<vmem>>, vector<1x1x32xf32>
    %207 = vector.shape_cast %206 : vector<1x1x32xf32> to vector<1x32xf32>
    %c1_91 = arith.constant 1 : index
    %c0_92 = arith.constant 0 : index
    %c0_93 = arith.constant 0 : index
    %208 = vector.load %arg8[%c1_91, %c0_92, %c0_93] : memref<2x1x32xf32, #tpu.memory_space<vmem>>, vector<1x1x32xf32>
    %209 = vector.shape_cast %208 : vector<1x1x32xf32> to vector<1x32xf32>
    %c1_94 = arith.constant 1 : index
    %c0_95 = arith.constant 0 : index
    %c0_96 = arith.constant 0 : index
    %210 = vector.load %arg9[%c1_94, %c0_95, %c0_96] : memref<2x1x32xf32, #tpu.memory_space<vmem>>, vector<1x1x32xf32>
    %211 = vector.shape_cast %210 : vector<1x1x32xf32> to vector<1x32xf32>
    %212 = arith.truncf %199 : vector<8x32xf32> to vector<8x32xbf16>
    %cst_97 = arith.constant dense<0.000000e+00> : vector<8x96xf32>
    %213 = tpu.matmul %212, %201, %cst_97 {dimension_numbers = #tpu.dot_dimension_numbers<[1], [0], [0], [1], [0, 0, 1, 1], [], []>} : vector<8x32xbf16>, vector<32x96xbf16>, vector<8x96xf32> -> vector<8x96xf32>
    %214 = vector.broadcast %203 : vector<1x96xf32> to vector<8x96xf32>
    %215 = arith.addf %213, %214 : vector<8x96xf32>
    %216 = vector.extract_strided_slice %215 {offsets = [0, 0], sizes = [8, 32], strides = [1, 1]} : vector<8x96xf32> to vector<8x32xf32>
    %217 = vector.extract_strided_slice %215 {offsets = [0, 32], sizes = [8, 32], strides = [1, 1]} : vector<8x96xf32> to vector<8x32xf32>
    %218 = vector.extract_strided_slice %215 {offsets = [0, 64], sizes = [8, 32], strides = [1, 1]} : vector<8x96xf32> to vector<8x32xf32>
    %219 = vector.extract_strided_slice %216 {offsets = [0, 0], sizes = [8, 8], strides = [1, 1]} : vector<8x32xf32> to vector<8x8xf32>
    %220 = vector.extract_strided_slice %217 {offsets = [0, 0], sizes = [8, 8], strides = [1, 1]} : vector<8x32xf32> to vector<8x8xf32>
    %221 = arith.truncf %219 : vector<8x8xf32> to vector<8x8xbf16>
    %222 = arith.truncf %220 : vector<8x8xf32> to vector<8x8xbf16>
    %cst_98 = arith.constant dense<0.000000e+00> : vector<8x8xf32>
    %223 = tpu.matmul %221, %222, %cst_98 {dimension_numbers = #tpu.dot_dimension_numbers<[1], [1], [0], [0], [0, 0, 1, 0], [], []>} : vector<8x8xbf16>, vector<8x8xbf16>, vector<8x8xf32> -> vector<8x8xf32>
    %cst_99 = arith.constant 0.353553385 : f32
    %224 = vector.broadcast %cst_99 : f32 to vector<8x8xf32>
    %225 = arith.mulf %223, %224 : vector<8x8xf32>
    %cst_100 = arith.constant -1.000000e+09 : f32
    %226 = vector.broadcast %cst_100 : f32 to vector<8x8xf32>
    %227 = arith.select %15, %225, %226 : vector<8x8xi1>, vector<8x8xf32>
    %cst_101 = arith.constant dense<0xFF800000> : vector<8xf32>
    %228 = vector.multi_reduction <maximumf>, %227, %cst_101 [1] : vector<8x8xf32> to vector<8xf32>
    %229 = vector.shape_cast %228 : vector<8xf32> to vector<8x1xf32>
    %230 = vector.broadcast %229 : vector<8x1xf32> to vector<8x8xf32>
    %231 = arith.subf %227, %230 : vector<8x8xf32>
    %232 = math.exp %231 : vector<8x8xf32>
    %cst_102 = arith.constant dense<0.000000e+00> : vector<8xf32>
    %233 = vector.multi_reduction <add>, %232, %cst_102 [1] : vector<8x8xf32> to vector<8xf32>
    %234 = vector.shape_cast %233 : vector<8xf32> to vector<8x1xf32>
    %235 = tpu.reciprocal %234 {approx = true} : vector<8x1xf32> -> vector<8x1xf32>
    %236 = vector.broadcast %235 : vector<8x1xf32> to vector<8x8xf32>
    %237 = arith.mulf %232, %236 : vector<8x8xf32>
    %238 = vector.extract_strided_slice %218 {offsets = [0, 0], sizes = [8, 8], strides = [1, 1]} : vector<8x32xf32> to vector<8x8xf32>
    %239 = arith.truncf %237 : vector<8x8xf32> to vector<8x8xbf16>
    %240 = arith.truncf %238 : vector<8x8xf32> to vector<8x8xbf16>
    %cst_103 = arith.constant dense<0.000000e+00> : vector<8x8xf32>
    %241 = tpu.matmul %239, %240, %cst_103 {dimension_numbers = #tpu.dot_dimension_numbers<[1], [0], [0], [1], [0, 0, 1, 1], [], []>} : vector<8x8xbf16>, vector<8x8xbf16>, vector<8x8xf32> -> vector<8x8xf32>
    %242 = vector.extract_strided_slice %216 {offsets = [0, 8], sizes = [8, 8], strides = [1, 1]} : vector<8x32xf32> to vector<8x8xf32>
    %243 = vector.extract_strided_slice %217 {offsets = [0, 8], sizes = [8, 8], strides = [1, 1]} : vector<8x32xf32> to vector<8x8xf32>
    %244 = arith.truncf %242 : vector<8x8xf32> to vector<8x8xbf16>
    %245 = arith.truncf %243 : vector<8x8xf32> to vector<8x8xbf16>
    %cst_104 = arith.constant dense<0.000000e+00> : vector<8x8xf32>
    %246 = tpu.matmul %244, %245, %cst_104 {dimension_numbers = #tpu.dot_dimension_numbers<[1], [1], [0], [0], [0, 0, 1, 0], [], []>} : vector<8x8xbf16>, vector<8x8xbf16>, vector<8x8xf32> -> vector<8x8xf32>
    %cst_105 = arith.constant 0.353553385 : f32
    %247 = vector.broadcast %cst_105 : f32 to vector<8x8xf32>
    %248 = arith.mulf %246, %247 : vector<8x8xf32>
    %cst_106 = arith.constant -1.000000e+09 : f32
    %249 = vector.broadcast %cst_106 : f32 to vector<8x8xf32>
    %250 = arith.select %15, %248, %249 : vector<8x8xi1>, vector<8x8xf32>
    %cst_107 = arith.constant dense<0xFF800000> : vector<8xf32>
    %251 = vector.multi_reduction <maximumf>, %250, %cst_107 [1] : vector<8x8xf32> to vector<8xf32>
    %252 = vector.shape_cast %251 : vector<8xf32> to vector<8x1xf32>
    %253 = vector.broadcast %252 : vector<8x1xf32> to vector<8x8xf32>
    %254 = arith.subf %250, %253 : vector<8x8xf32>
    %255 = math.exp %254 : vector<8x8xf32>
    %cst_108 = arith.constant dense<0.000000e+00> : vector<8xf32>
    %256 = vector.multi_reduction <add>, %255, %cst_108 [1] : vector<8x8xf32> to vector<8xf32>
    %257 = vector.shape_cast %256 : vector<8xf32> to vector<8x1xf32>
    %258 = tpu.reciprocal %257 {approx = true} : vector<8x1xf32> -> vector<8x1xf32>
    %259 = vector.broadcast %258 : vector<8x1xf32> to vector<8x8xf32>
    %260 = arith.mulf %255, %259 : vector<8x8xf32>
    %261 = vector.extract_strided_slice %218 {offsets = [0, 8], sizes = [8, 8], strides = [1, 1]} : vector<8x32xf32> to vector<8x8xf32>
    %262 = arith.truncf %260 : vector<8x8xf32> to vector<8x8xbf16>
    %263 = arith.truncf %261 : vector<8x8xf32> to vector<8x8xbf16>
    %cst_109 = arith.constant dense<0.000000e+00> : vector<8x8xf32>
    %264 = tpu.matmul %262, %263, %cst_109 {dimension_numbers = #tpu.dot_dimension_numbers<[1], [0], [0], [1], [0, 0, 1, 1], [], []>} : vector<8x8xbf16>, vector<8x8xbf16>, vector<8x8xf32> -> vector<8x8xf32>
    %265 = vector.extract_strided_slice %216 {offsets = [0, 16], sizes = [8, 8], strides = [1, 1]} : vector<8x32xf32> to vector<8x8xf32>
    %266 = vector.extract_strided_slice %217 {offsets = [0, 16], sizes = [8, 8], strides = [1, 1]} : vector<8x32xf32> to vector<8x8xf32>
    %267 = arith.truncf %265 : vector<8x8xf32> to vector<8x8xbf16>
    %268 = arith.truncf %266 : vector<8x8xf32> to vector<8x8xbf16>
    %cst_110 = arith.constant dense<0.000000e+00> : vector<8x8xf32>
    %269 = tpu.matmul %267, %268, %cst_110 {dimension_numbers = #tpu.dot_dimension_numbers<[1], [1], [0], [0], [0, 0, 1, 0], [], []>} : vector<8x8xbf16>, vector<8x8xbf16>, vector<8x8xf32> -> vector<8x8xf32>
    %cst_111 = arith.constant 0.353553385 : f32
    %270 = vector.broadcast %cst_111 : f32 to vector<8x8xf32>
    %271 = arith.mulf %269, %270 : vector<8x8xf32>
    %cst_112 = arith.constant -1.000000e+09 : f32
    %272 = vector.broadcast %cst_112 : f32 to vector<8x8xf32>
    %273 = arith.select %15, %271, %272 : vector<8x8xi1>, vector<8x8xf32>
    %cst_113 = arith.constant dense<0xFF800000> : vector<8xf32>
    %274 = vector.multi_reduction <maximumf>, %273, %cst_113 [1] : vector<8x8xf32> to vector<8xf32>
    %275 = vector.shape_cast %274 : vector<8xf32> to vector<8x1xf32>
    %276 = vector.broadcast %275 : vector<8x1xf32> to vector<8x8xf32>
    %277 = arith.subf %273, %276 : vector<8x8xf32>
    %278 = math.exp %277 : vector<8x8xf32>
    %cst_114 = arith.constant dense<0.000000e+00> : vector<8xf32>
    %279 = vector.multi_reduction <add>, %278, %cst_114 [1] : vector<8x8xf32> to vector<8xf32>
    %280 = vector.shape_cast %279 : vector<8xf32> to vector<8x1xf32>
    %281 = tpu.reciprocal %280 {approx = true} : vector<8x1xf32> -> vector<8x1xf32>
    %282 = vector.broadcast %281 : vector<8x1xf32> to vector<8x8xf32>
    %283 = arith.mulf %278, %282 : vector<8x8xf32>
    %284 = vector.extract_strided_slice %218 {offsets = [0, 16], sizes = [8, 8], strides = [1, 1]} : vector<8x32xf32> to vector<8x8xf32>
    %285 = arith.truncf %283 : vector<8x8xf32> to vector<8x8xbf16>
    %286 = arith.truncf %284 : vector<8x8xf32> to vector<8x8xbf16>
    %cst_115 = arith.constant dense<0.000000e+00> : vector<8x8xf32>
    %287 = tpu.matmul %285, %286, %cst_115 {dimension_numbers = #tpu.dot_dimension_numbers<[1], [0], [0], [1], [0, 0, 1, 1], [], []>} : vector<8x8xbf16>, vector<8x8xbf16>, vector<8x8xf32> -> vector<8x8xf32>
    %288 = vector.extract_strided_slice %216 {offsets = [0, 24], sizes = [8, 8], strides = [1, 1]} : vector<8x32xf32> to vector<8x8xf32>
    %289 = vector.extract_strided_slice %217 {offsets = [0, 24], sizes = [8, 8], strides = [1, 1]} : vector<8x32xf32> to vector<8x8xf32>
    %290 = arith.truncf %288 : vector<8x8xf32> to vector<8x8xbf16>
    %291 = arith.truncf %289 : vector<8x8xf32> to vector<8x8xbf16>
    %cst_116 = arith.constant dense<0.000000e+00> : vector<8x8xf32>
    %292 = tpu.matmul %290, %291, %cst_116 {dimension_numbers = #tpu.dot_dimension_numbers<[1], [1], [0], [0], [0, 0, 1, 0], [], []>} : vector<8x8xbf16>, vector<8x8xbf16>, vector<8x8xf32> -> vector<8x8xf32>
    %cst_117 = arith.constant 0.353553385 : f32
    %293 = vector.broadcast %cst_117 : f32 to vector<8x8xf32>
    %294 = arith.mulf %292, %293 : vector<8x8xf32>
    %cst_118 = arith.constant -1.000000e+09 : f32
    %295 = vector.broadcast %cst_118 : f32 to vector<8x8xf32>
    %296 = arith.select %15, %294, %295 : vector<8x8xi1>, vector<8x8xf32>
    %cst_119 = arith.constant dense<0xFF800000> : vector<8xf32>
    %297 = vector.multi_reduction <maximumf>, %296, %cst_119 [1] : vector<8x8xf32> to vector<8xf32>
    %298 = vector.shape_cast %297 : vector<8xf32> to vector<8x1xf32>
    %299 = vector.broadcast %298 : vector<8x1xf32> to vector<8x8xf32>
    %300 = arith.subf %296, %299 : vector<8x8xf32>
    %301 = math.exp %300 : vector<8x8xf32>
    %cst_120 = arith.constant dense<0.000000e+00> : vector<8xf32>
    %302 = vector.multi_reduction <add>, %301, %cst_120 [1] : vector<8x8xf32> to vector<8xf32>
    %303 = vector.shape_cast %302 : vector<8xf32> to vector<8x1xf32>
    %304 = tpu.reciprocal %303 {approx = true} : vector<8x1xf32> -> vector<8x1xf32>
    %305 = vector.broadcast %304 : vector<8x1xf32> to vector<8x8xf32>
    %306 = arith.mulf %301, %305 : vector<8x8xf32>
    %307 = vector.extract_strided_slice %218 {offsets = [0, 24], sizes = [8, 8], strides = [1, 1]} : vector<8x32xf32> to vector<8x8xf32>
    %308 = arith.truncf %306 : vector<8x8xf32> to vector<8x8xbf16>
    %309 = arith.truncf %307 : vector<8x8xf32> to vector<8x8xbf16>
    %cst_121 = arith.constant dense<0.000000e+00> : vector<8x8xf32>
    %310 = tpu.matmul %308, %309, %cst_121 {dimension_numbers = #tpu.dot_dimension_numbers<[1], [0], [0], [1], [0, 0, 1, 1], [], []>} : vector<8x8xbf16>, vector<8x8xbf16>, vector<8x8xf32> -> vector<8x8xf32>
    %311 = tpu.concatenate %241, %264, %287, %310 in 1 : vector<8x8xf32>, vector<8x8xf32>, vector<8x8xf32>, vector<8x8xf32> -> vector<8x32xf32>
    %312 = arith.truncf %311 : vector<8x32xf32> to vector<8x32xbf16>
    %cst_122 = arith.constant dense<0.000000e+00> : vector<8x32xf32>
    %313 = tpu.matmul %312, %205, %cst_122 {dimension_numbers = #tpu.dot_dimension_numbers<[1], [0], [0], [1], [0, 0, 1, 1], [], []>} : vector<8x32xbf16>, vector<32x32xbf16>, vector<8x32xf32> -> vector<8x32xf32>
    %314 = vector.broadcast %207 : vector<1x32xf32> to vector<8x32xf32>
    %315 = arith.addf %313, %314 : vector<8x32xf32>
    %316 = arith.addf %315, %199 : vector<8x32xf32>
    %cst_123 = arith.constant dense<0.000000e+00> : vector<8xf32>
    %317 = vector.multi_reduction <add>, %316, %cst_123 [1] : vector<8x32xf32> to vector<8xf32>
    %318 = vector.shape_cast %317 : vector<8xf32> to vector<8x1xf32>
    %cst_124 = arith.constant 3.200000e+01 : f32
    %319 = vector.broadcast %cst_124 : f32 to vector<8x1xf32>
    %320 = arith.divf %318, %319 : vector<8x1xf32>
    %321 = vector.broadcast %320 : vector<8x1xf32> to vector<8x32xf32>
    %322 = arith.subf %316, %321 : vector<8x32xf32>
    %323 = arith.mulf %322, %322 : vector<8x32xf32>
    %cst_125 = arith.constant dense<0.000000e+00> : vector<8xf32>
    %324 = vector.multi_reduction <add>, %323, %cst_125 [1] : vector<8x32xf32> to vector<8xf32>
    %325 = vector.shape_cast %324 : vector<8xf32> to vector<8x1xf32>
    %cst_126 = arith.constant 3.200000e+01 : f32
    %326 = vector.broadcast %cst_126 : f32 to vector<8x1xf32>
    %327 = arith.divf %325, %326 : vector<8x1xf32>
    %328 = vector.broadcast %320 : vector<8x1xf32> to vector<8x32xf32>
    %329 = arith.subf %316, %328 : vector<8x32xf32>
    %cst_127 = arith.constant 9.99999974E-6 : f32
    %330 = vector.broadcast %cst_127 : f32 to vector<8x1xf32>
    %331 = arith.addf %327, %330 : vector<8x1xf32>
    %332 = math.rsqrt %331 : vector<8x1xf32>
    %333 = vector.broadcast %332 : vector<8x1xf32> to vector<8x32xf32>
    %334 = arith.mulf %329, %333 : vector<8x32xf32>
    %335 = vector.broadcast %209 : vector<1x32xf32> to vector<8x32xf32>
    %336 = arith.mulf %334, %335 : vector<8x32xf32>
    %337 = vector.broadcast %211 : vector<1x32xf32> to vector<8x32xf32>
    %338 = arith.addf %336, %337 : vector<8x32xf32>
    %c1_128 = arith.constant 1 : index
    %c0_129 = arith.constant 0 : index
    %c0_130 = arith.constant 0 : index
    %339 = vector.load %arg10[%c1_128, %c0_129, %c0_130] : memref<2x32x64xbf16, #tpu.memory_space<vmem>>, vector<1x32x64xbf16>
    %340 = vector.shape_cast %339 : vector<1x32x64xbf16> to vector<32x64xbf16>
    %c1_131 = arith.constant 1 : index
    %c0_132 = arith.constant 0 : index
    %c0_133 = arith.constant 0 : index
    %341 = vector.load %arg11[%c1_131, %c0_132, %c0_133] : memref<2x1x64xf32, #tpu.memory_space<vmem>>, vector<1x1x64xf32>
    %342 = vector.shape_cast %341 : vector<1x1x64xf32> to vector<1x64xf32>
    %c1_134 = arith.constant 1 : index
    %c0_135 = arith.constant 0 : index
    %c0_136 = arith.constant 0 : index
    %343 = vector.load %arg12[%c1_134, %c0_135, %c0_136] : memref<2x64x32xbf16, #tpu.memory_space<vmem>>, vector<1x64x32xbf16>
    %344 = vector.shape_cast %343 : vector<1x64x32xbf16> to vector<64x32xbf16>
    %c1_137 = arith.constant 1 : index
    %c0_138 = arith.constant 0 : index
    %c0_139 = arith.constant 0 : index
    %345 = vector.load %arg13[%c1_137, %c0_138, %c0_139] : memref<2x1x32xf32, #tpu.memory_space<vmem>>, vector<1x1x32xf32>
    %346 = vector.shape_cast %345 : vector<1x1x32xf32> to vector<1x32xf32>
    %c1_140 = arith.constant 1 : index
    %c0_141 = arith.constant 0 : index
    %c0_142 = arith.constant 0 : index
    %347 = vector.load %arg14[%c1_140, %c0_141, %c0_142] : memref<2x1x32xf32, #tpu.memory_space<vmem>>, vector<1x1x32xf32>
    %348 = vector.shape_cast %347 : vector<1x1x32xf32> to vector<1x32xf32>
    %c1_143 = arith.constant 1 : index
    %c0_144 = arith.constant 0 : index
    %c0_145 = arith.constant 0 : index
    %349 = vector.load %arg15[%c1_143, %c0_144, %c0_145] : memref<2x1x32xf32, #tpu.memory_space<vmem>>, vector<1x1x32xf32>
    %350 = vector.shape_cast %349 : vector<1x1x32xf32> to vector<1x32xf32>
    %351 = arith.truncf %338 : vector<8x32xf32> to vector<8x32xbf16>
    %cst_146 = arith.constant dense<0.000000e+00> : vector<8x64xf32>
    %352 = tpu.matmul %351, %340, %cst_146 {dimension_numbers = #tpu.dot_dimension_numbers<[1], [0], [0], [1], [0, 0, 1, 1], [], []>} : vector<8x32xbf16>, vector<32x64xbf16>, vector<8x64xf32> -> vector<8x64xf32>
    %353 = vector.broadcast %342 : vector<1x64xf32> to vector<8x64xf32>
    %354 = arith.addf %352, %353 : vector<8x64xf32>
    %cst_147 = arith.constant 0.000000e+00 : f32
    %355 = vector.broadcast %cst_147 : f32 to vector<8x64xf32>
    %356 = arith.maximumf %354, %355 : vector<8x64xf32>
    %357 = arith.truncf %356 : vector<8x64xf32> to vector<8x64xbf16>
    %cst_148 = arith.constant dense<0.000000e+00> : vector<8x32xf32>
    %358 = tpu.matmul %357, %344, %cst_148 {dimension_numbers = #tpu.dot_dimension_numbers<[1], [0], [0], [1], [0, 0, 1, 1], [], []>} : vector<8x64xbf16>, vector<64x32xbf16>, vector<8x32xf32> -> vector<8x32xf32>
    %359 = vector.broadcast %346 : vector<1x32xf32> to vector<8x32xf32>
    %360 = arith.addf %358, %359 : vector<8x32xf32>
    %361 = arith.addf %360, %338 : vector<8x32xf32>
    %cst_149 = arith.constant dense<0.000000e+00> : vector<8xf32>
    %362 = vector.multi_reduction <add>, %361, %cst_149 [1] : vector<8x32xf32> to vector<8xf32>
    %363 = vector.shape_cast %362 : vector<8xf32> to vector<8x1xf32>
    %cst_150 = arith.constant 3.200000e+01 : f32
    %364 = vector.broadcast %cst_150 : f32 to vector<8x1xf32>
    %365 = arith.divf %363, %364 : vector<8x1xf32>
    %366 = vector.broadcast %365 : vector<8x1xf32> to vector<8x32xf32>
    %367 = arith.subf %361, %366 : vector<8x32xf32>
    %368 = arith.mulf %367, %367 : vector<8x32xf32>
    %cst_151 = arith.constant dense<0.000000e+00> : vector<8xf32>
    %369 = vector.multi_reduction <add>, %368, %cst_151 [1] : vector<8x32xf32> to vector<8xf32>
    %370 = vector.shape_cast %369 : vector<8xf32> to vector<8x1xf32>
    %cst_152 = arith.constant 3.200000e+01 : f32
    %371 = vector.broadcast %cst_152 : f32 to vector<8x1xf32>
    %372 = arith.divf %370, %371 : vector<8x1xf32>
    %373 = vector.broadcast %365 : vector<8x1xf32> to vector<8x32xf32>
    %374 = arith.subf %361, %373 : vector<8x32xf32>
    %cst_153 = arith.constant 9.99999974E-6 : f32
    %375 = vector.broadcast %cst_153 : f32 to vector<8x1xf32>
    %376 = arith.addf %372, %375 : vector<8x1xf32>
    %377 = math.rsqrt %376 : vector<8x1xf32>
    %378 = vector.broadcast %377 : vector<8x1xf32> to vector<8x32xf32>
    %379 = arith.mulf %374, %378 : vector<8x32xf32>
    %380 = vector.broadcast %348 : vector<1x32xf32> to vector<8x32xf32>
    %381 = arith.mulf %379, %380 : vector<8x32xf32>
    %382 = vector.broadcast %350 : vector<1x32xf32> to vector<8x32xf32>
    %383 = arith.addf %381, %382 : vector<8x32xf32>
    %c0_154 = arith.constant 0 : index
    %c0_155 = arith.constant 0 : index
    %c0_156 = arith.constant 0 : index
    %384 = vector.load %arg16[%c0_154, %c0_155, %c0_156] : memref<1x8x32xf32, #tpu.memory_space<vmem>>, vector<1x8x32xf32>
    %385 = vector.shape_cast %384 : vector<1x8x32xf32> to vector<8x32xf32>
    %386 = vector.shape_cast %383 : vector<8x32xf32> to vector<1x8x32xf32>
    tpu.vector_store %arg16[%c0_154, %c0_155, %c0_156], %386 {strides = array<i32>} : memref<1x8x32xf32, #tpu.memory_space<vmem>>, vector<1x8x32xf32>,
    return
  }
  func.func @transform_0(%arg0: i32) -> i32 {
    %c0_i32 = arith.constant 0 : i32
    %c0_i32_0 = arith.constant 0 : i32
    return %c0_i32 : i32
  }
  func.func @transform_1(%arg0: i32) -> (i32, i32, i32) {
    %c0_i32 = arith.constant 0 : i32
    %c0_i32_0 = arith.constant 0 : i32
    %c0_i32_1 = arith.constant 0 : i32
    return %arg0, %c0_i32, %c0_i32_0 : i32, i32, i32
  }
  func.func @transform_2(%arg0: i32) -> (i32, i32, i32) {
    %c0_i32 = arith.constant 0 : i32
    %c0_i32_0 = arith.constant 0 : i32
    %c0_i32_1 = arith.constant 0 : i32
    return %arg0, %c0_i32, %c0_i32_0 : i32, i32, i32
  }
  func.func @transform_3(%arg0: i32) -> (i32, i32, i32) {
    %c0_i32 = arith.constant 0 : i32
    %c0_i32_0 = arith.constant 0 : i32
    %c0_i32_1 = arith.constant 0 : i32
    %c0_i32_2 = arith.constant 0 : i32
    return %c0_i32, %c0_i32_0, %c0_i32_1 : i32, i32, i32
  }
  func.func @transform_4(%arg0: i32) -> (i32, i32, i32) {
    %c0_i32 = arith.constant 0 : i32
    %c0_i32_0 = arith.constant 0 : i32
    %c0_i32_1 = arith.constant 0 : i32
    %c0_i32_2 = arith.constant 0 : i32
    return %c0_i32, %c0_i32_0, %c0_i32_1 : i32, i32, i32
  }
  func.func @transform_5(%arg0: i32) -> (i32, i32, i32) {
    %c0_i32 = arith.constant 0 : i32
    %c0_i32_0 = arith.constant 0 : i32
    %c0_i32_1 = arith.constant 0 : i32
    %c0_i32_2 = arith.constant 0 : i32
    return %c0_i32, %c0_i32_0, %c0_i32_1 : i32, i32, i32
  }
  func.func @transform_6(%arg0: i32) -> (i32, i32, i32) {
    %c0_i32 = arith.constant 0 : i32
    %c0_i32_0 = arith.constant 0 : i32
    %c0_i32_1 = arith.constant 0 : i32
    %c0_i32_2 = arith.constant 0 : i32
    return %c0_i32, %c0_i32_0, %c0_i32_1 : i32, i32, i32
  }
  func.func @transform_7(%arg0: i32) -> (i32, i32, i32) {
    %c0_i32 = arith.constant 0 : i32
    %c0_i32_0 = arith.constant 0 : i32
    %c0_i32_1 = arith.constant 0 : i32
    %c0_i32_2 = arith.constant 0 : i32
    return %c0_i32, %c0_i32_0, %c0_i32_1 : i32, i32, i32
  }
  func.func @transform_8(%arg0: i32) -> (i32, i32, i32) {
    %c0_i32 = arith.constant 0 : i32
    %c0_i32_0 = arith.constant 0 : i32
    %c0_i32_1 = arith.constant 0 : i32
    %c0_i32_2 = arith.constant 0 : i32
    return %c0_i32, %c0_i32_0, %c0_i32_1 : i32, i32, i32
  }
  func.func @transform_9(%arg0: i32) -> (i32, i32, i32) {
    %c0_i32 = arith.constant 0 : i32
    %c0_i32_0 = arith.constant 0 : i32
    %c0_i32_1 = arith.constant 0 : i32
    %c0_i32_2 = arith.constant 0 : i32
    return %c0_i32, %c0_i32_0, %c0_i32_1 : i32, i32, i32
  }
  func.func @transform_10(%arg0: i32) -> (i32, i32, i32) {
    %c0_i32 = arith.constant 0 : i32
    %c0_i32_0 = arith.constant 0 : i32
    %c0_i32_1 = arith.constant 0 : i32
    %c0_i32_2 = arith.constant 0 : i32
    return %c0_i32, %c0_i32_0, %c0_i32_1 : i32, i32, i32
  }
  func.func @transform_11(%arg0: i32) -> (i32, i32, i32) {
    %c0_i32 = arith.constant 0 : i32
    %c0_i32_0 = arith.constant 0 : i32
    %c0_i32_1 = arith.constant 0 : i32
    %c0_i32_2 = arith.constant 0 : i32
    return %c0_i32, %c0_i32_0, %c0_i32_1 : i32, i32, i32
  }
  func.func @transform_12(%arg0: i32) -> (i32, i32, i32) {
    %c0_i32 = arith.constant 0 : i32
    %c0_i32_0 = arith.constant 0 : i32
    %c0_i32_1 = arith.constant 0 : i32
    %c0_i32_2 = arith.constant 0 : i32
    return %c0_i32, %c0_i32_0, %c0_i32_1 : i32, i32, i32
  }
  func.func @transform_13(%arg0: i32) -> (i32, i32, i32) {
    %c0_i32 = arith.constant 0 : i32
    %c0_i32_0 = arith.constant 0 : i32
    %c0_i32_1 = arith.constant 0 : i32
    %c0_i32_2 = arith.constant 0 : i32
    return %c0_i32, %c0_i32_0, %c0_i32_1 : i32, i32, i32
  }
  func.func @transform_14(%arg0: i32) -> (i32, i32, i32) {
    %c0_i32 = arith.constant 0 : i32
    %c0_i32_0 = arith.constant 0 : i32
    %c0_i32_1 = arith.constant 0 : i32
    %c0_i32_2 = arith.constant 0 : i32
    return %c0_i32, %c0_i32_0, %c0_i32_1 : i32, i32, i32
  }
  func.func @transform_15(%arg0: i32) -> (i32, i32, i32) {
    %c0_i32 = arith.constant 0 : i32
    %c0_i32_0 = arith.constant 0 : i32
    %c0_i32_1 = arith.constant 0 : i32
    return %arg0, %c0_i32, %c0_i32_0 : i32, i32, i32
  }
}

module attributes {stable_mosaic.version = 11 : i64} {
  func.func @_output_heads_kernel(%arg0: i32, %arg1: memref<1x8x32xf32, #tpu.memory_space<vmem>>, %arg2: memref<1x8x32xf32, #tpu.memory_space<vmem>>, %arg3: memref<32x256xbf16, #tpu.memory_space<vmem>>, %arg4: memref<1x256xf32, #tpu.memory_space<vmem>>, %arg5: memref<32x128xbf16, #tpu.memory_space<vmem>>, %arg6: memref<1x128xf32, #tpu.memory_space<vmem>>, %arg7: memref<1x8x256xf32, #tpu.memory_space<vmem>>, %arg8: memref<1x8x128xf32, #tpu.memory_space<vmem>>) attributes {dimension_semantics = [#tpu.dimension_semantics<parallel>], iteration_bounds = array<i64: 2>, scalar_prefetch = 0 : i64, scratch_operands = 0 : i64, tpu.core_type = #tpu.core_type<tc>, window_params = [{transform_indices = @transform_0, window_bounds = array<i64: 1, 8, 32>}, {transform_indices = @transform_1, window_bounds = array<i64: 1, 8, 32>}, {pipeline_mode = #tpu.pipeline_mode<synchronous>, transform_indices = @transform_2, window_bounds = array<i64: 32, 256>}, {pipeline_mode = #tpu.pipeline_mode<synchronous>, transform_indices = @transform_3, window_bounds = array<i64: 1, 256>}, {pipeline_mode = #tpu.pipeline_mode<synchronous>, transform_indices = @transform_4, window_bounds = array<i64: 32, 128>}, {pipeline_mode = #tpu.pipeline_mode<synchronous>, transform_indices = @transform_5, window_bounds = array<i64: 1, 128>}, {transform_indices = @transform_6, window_bounds = array<i64: 1, 8, 256>}, {transform_indices = @transform_7, window_bounds = array<i64: 1, 8, 128>}]} {
    %c0 = arith.constant 0 : index
    %c0_0 = arith.constant 0 : index
    %c0_1 = arith.constant 0 : index
    %0 = vector.load %arg1[%c0, %c0_0, %c0_1] : memref<1x8x32xf32, #tpu.memory_space<vmem>>, vector<1x8x32xf32>
    %1 = vector.shape_cast %0 : vector<1x8x32xf32> to vector<8x32xf32>
    %c0_2 = arith.constant 0 : index
    %c0_3 = arith.constant 0 : index
    %c0_4 = arith.constant 0 : index
    %2 = vector.load %arg2[%c0_2, %c0_3, %c0_4] : memref<1x8x32xf32, #tpu.memory_space<vmem>>, vector<1x8x32xf32>
    %3 = vector.shape_cast %2 : vector<1x8x32xf32> to vector<8x32xf32>
    %c0_5 = arith.constant 0 : index
    %c0_6 = arith.constant 0 : index
    %4 = vector.load %arg3[%c0_5, %c0_6] : memref<32x256xbf16, #tpu.memory_space<vmem>>, vector<32x256xbf16>
    %5 = arith.truncf %1 : vector<8x32xf32> to vector<8x32xbf16>
    %cst = arith.constant dense<0.000000e+00> : vector<8x256xf32>
    %6 = tpu.matmul %5, %4, %cst {dimension_numbers = #tpu.dot_dimension_numbers<[1], [0], [0], [1], [0, 0, 1, 1], [], []>} : vector<8x32xbf16>, vector<32x256xbf16>, vector<8x256xf32> -> vector<8x256xf32>
    %c0_7 = arith.constant 0 : index
    %c0_8 = arith.constant 0 : index
    %7 = vector.load %arg4[%c0_7, %c0_8] : memref<1x256xf32, #tpu.memory_space<vmem>>, vector<1x256xf32>
    %8 = vector.broadcast %7 : vector<1x256xf32> to vector<8x256xf32>
    %9 = arith.addf %6, %8 : vector<8x256xf32>
    %cst_9 = arith.constant dense<0xFF800000> : vector<8xf32>
    %10 = vector.multi_reduction <maximumf>, %9, %cst_9 [1] : vector<8x256xf32> to vector<8xf32>
    %11 = vector.shape_cast %10 : vector<8xf32> to vector<8x1xf32>
    %12 = vector.broadcast %11 : vector<8x1xf32> to vector<8x256xf32>
    %13 = arith.subf %9, %12 : vector<8x256xf32>
    %14 = math.exp %13 : vector<8x256xf32>
    %cst_10 = arith.constant dense<0.000000e+00> : vector<8xf32>
    %15 = vector.multi_reduction <add>, %14, %cst_10 [1] : vector<8x256xf32> to vector<8xf32>
    %16 = vector.shape_cast %15 : vector<8xf32> to vector<8x1xf32>
    %17 = vector.broadcast %16 : vector<8x1xf32> to vector<8x256xf32>
    %18 = arith.divf %14, %17 : vector<8x256xf32>
    %c0_11 = arith.constant 0 : index
    %c0_12 = arith.constant 0 : index
    %c0_13 = arith.constant 0 : index
    %19 = vector.load %arg7[%c0_11, %c0_12, %c0_13] : memref<1x8x256xf32, #tpu.memory_space<vmem>>, vector<1x8x256xf32>
    %20 = vector.shape_cast %19 : vector<1x8x256xf32> to vector<8x256xf32>
    %21 = vector.shape_cast %18 : vector<8x256xf32> to vector<1x8x256xf32>
    tpu.vector_store %arg7[%c0_11, %c0_12, %c0_13], %21 {strides = array<i32>} : memref<1x8x256xf32, #tpu.memory_space<vmem>>, vector<1x8x256xf32>,
    %c0_14 = arith.constant 0 : index
    %c0_15 = arith.constant 0 : index
    %22 = vector.load %arg5[%c0_14, %c0_15] : memref<32x128xbf16, #tpu.memory_space<vmem>>, vector<32x128xbf16>
    %23 = arith.truncf %3 : vector<8x32xf32> to vector<8x32xbf16>
    %cst_16 = arith.constant dense<0.000000e+00> : vector<8x128xf32>
    %24 = tpu.matmul %23, %22, %cst_16 {dimension_numbers = #tpu.dot_dimension_numbers<[1], [0], [0], [1], [0, 0, 1, 1], [], []>} : vector<8x32xbf16>, vector<32x128xbf16>, vector<8x128xf32> -> vector<8x128xf32>
    %c0_17 = arith.constant 0 : index
    %c0_18 = arith.constant 0 : index
    %25 = vector.load %arg6[%c0_17, %c0_18] : memref<1x128xf32, #tpu.memory_space<vmem>>, vector<1x128xf32>
    %26 = vector.broadcast %25 : vector<1x128xf32> to vector<8x128xf32>
    %27 = arith.addf %24, %26 : vector<8x128xf32>
    %cst_19 = arith.constant dense<0xFF800000> : vector<8xf32>
    %28 = vector.multi_reduction <maximumf>, %27, %cst_19 [1] : vector<8x128xf32> to vector<8xf32>
    %29 = vector.shape_cast %28 : vector<8xf32> to vector<8x1xf32>
    %30 = vector.broadcast %29 : vector<8x1xf32> to vector<8x128xf32>
    %31 = arith.subf %27, %30 : vector<8x128xf32>
    %32 = math.exp %31 : vector<8x128xf32>
    %cst_20 = arith.constant dense<0.000000e+00> : vector<8xf32>
    %33 = vector.multi_reduction <add>, %32, %cst_20 [1] : vector<8x128xf32> to vector<8xf32>
    %34 = vector.shape_cast %33 : vector<8xf32> to vector<8x1xf32>
    %35 = vector.broadcast %34 : vector<8x1xf32> to vector<8x128xf32>
    %36 = arith.divf %32, %35 : vector<8x128xf32>
    %c0_21 = arith.constant 0 : index
    %c0_22 = arith.constant 0 : index
    %c0_23 = arith.constant 0 : index
    %37 = vector.load %arg8[%c0_21, %c0_22, %c0_23] : memref<1x8x128xf32, #tpu.memory_space<vmem>>, vector<1x8x128xf32>
    %38 = vector.shape_cast %37 : vector<1x8x128xf32> to vector<8x128xf32>
    %39 = vector.shape_cast %36 : vector<8x128xf32> to vector<1x8x128xf32>
    tpu.vector_store %arg8[%c0_21, %c0_22, %c0_23], %39 {strides = array<i32>} : memref<1x8x128xf32, #tpu.memory_space<vmem>>, vector<1x8x128xf32>,
    return
  }
  func.func @transform_0(%arg0: i32) -> (i32, i32, i32) {
    %c0_i32 = arith.constant 0 : i32
    %c0_i32_0 = arith.constant 0 : i32
    %c0_i32_1 = arith.constant 0 : i32
    return %arg0, %c0_i32, %c0_i32_0 : i32, i32, i32
  }
  func.func @transform_1(%arg0: i32) -> (i32, i32, i32) {
    %c2_i32 = arith.constant 2 : i32
    %0 = arith.addi %arg0, %c2_i32 : i32
    %c0_i32 = arith.constant 0 : i32
    %c0_i32_0 = arith.constant 0 : i32
    %c0_i32_1 = arith.constant 0 : i32
    return %0, %c0_i32, %c0_i32_0 : i32, i32, i32
  }
  func.func @transform_2(%arg0: i32) -> (i32, i32) {
    %c0_i32 = arith.constant 0 : i32
    %c0_i32_0 = arith.constant 0 : i32
    %c0_i32_1 = arith.constant 0 : i32
    return %c0_i32, %c0_i32_0 : i32, i32
  }
  func.func @transform_3(%arg0: i32) -> (i32, i32) {
    %c0_i32 = arith.constant 0 : i32
    %c0_i32_0 = arith.constant 0 : i32
    %c0_i32_1 = arith.constant 0 : i32
    return %c0_i32, %c0_i32_0 : i32, i32
  }
  func.func @transform_4(%arg0: i32) -> (i32, i32) {
    %c0_i32 = arith.constant 0 : i32
    %c0_i32_0 = arith.constant 0 : i32
    %c0_i32_1 = arith.constant 0 : i32
    return %c0_i32, %c0_i32_0 : i32, i32
  }
  func.func @transform_5(%arg0: i32) -> (i32, i32) {
    %c0_i32 = arith.constant 0 : i32
    %c0_i32_0 = arith.constant 0 : i32
    %c0_i32_1 = arith.constant 0 : i32
    return %c0_i32, %c0_i32_0 : i32, i32
  }
  func.func @transform_6(%arg0: i32) -> (i32, i32, i32) {
    %c0_i32 = arith.constant 0 : i32
    %c0_i32_0 = arith.constant 0 : i32
    %c0_i32_1 = arith.constant 0 : i32
    return %arg0, %c0_i32, %c0_i32_0 : i32, i32, i32
  }
  func.func @transform_7(%arg0: i32) -> (i32, i32, i32) {
    %c0_i32 = arith.constant 0 : i32
    %c0_i32_0 = arith.constant 0 : i32
    %c0_i32_1 = arith.constant 0 : i32
    return %arg0, %c0_i32, %c0_i32_0 : i32, i32, i32
  }
}

module attributes {stable_mosaic.version = 11 : i64} {
  func.func @_decoder_stack_kernel(%arg0: i32, %arg1: memref<1x8x32xf32, #tpu.memory_space<vmem>>, %arg2: memref<1x8x32xf32, #tpu.memory_space<vmem>>, %arg3: memref<1x1x8xf32, #tpu.memory_space<vmem>>, %arg4: memref<2x32x96xbf16, #tpu.memory_space<vmem>>, %arg5: memref<2x1x96xf32, #tpu.memory_space<vmem>>, %arg6: memref<2x32x32xbf16, #tpu.memory_space<vmem>>, %arg7: memref<2x1x32xf32, #tpu.memory_space<vmem>>, %arg8: memref<2x1x32xf32, #tpu.memory_space<vmem>>, %arg9: memref<2x1x32xf32, #tpu.memory_space<vmem>>, %arg10: memref<2x32x96xbf16, #tpu.memory_space<vmem>>, %arg11: memref<2x1x96xf32, #tpu.memory_space<vmem>>, %arg12: memref<2x32x32xbf16, #tpu.memory_space<vmem>>, %arg13: memref<2x1x32xf32, #tpu.memory_space<vmem>>, %arg14: memref<2x1x32xf32, #tpu.memory_space<vmem>>, %arg15: memref<2x1x32xf32, #tpu.memory_space<vmem>>, %arg16: memref<2x32x64xbf16, #tpu.memory_space<vmem>>, %arg17: memref<2x1x64xf32, #tpu.memory_space<vmem>>, %arg18: memref<2x64x32xbf16, #tpu.memory_space<vmem>>, %arg19: memref<2x1x32xf32, #tpu.memory_space<vmem>>, %arg20: memref<2x1x32xf32, #tpu.memory_space<vmem>>, %arg21: memref<2x1x32xf32, #tpu.memory_space<vmem>>, %arg22: memref<1x8x32xf32, #tpu.memory_space<vmem>>) attributes {dimension_semantics = [#tpu.dimension_semantics<parallel>], iteration_bounds = array<i64: 4>, scalar_prefetch = 0 : i64, scratch_operands = 0 : i64, tpu.core_type = #tpu.core_type<tc>, window_params = [{transform_indices = @transform_0, window_bounds = array<i64: 1, 8, 32>}, {transform_indices = @transform_1, window_bounds = array<i64: 1, 8, 32>}, {transform_indices = @transform_2, window_bounds = array<i64: 1, 1, 8>}, {pipeline_mode = #tpu.pipeline_mode<synchronous>, transform_indices = @transform_3, window_bounds = array<i64: 2, 32, 96>}, {pipeline_mode = #tpu.pipeline_mode<synchronous>, transform_indices = @transform_4, window_bounds = array<i64: 2, 1, 96>}, {pipeline_mode = #tpu.pipeline_mode<synchronous>, transform_indices = @transform_5, window_bounds = array<i64: 2, 32, 32>}, {pipeline_mode = #tpu.pipeline_mode<synchronous>, transform_indices = @transform_6, window_bounds = array<i64: 2, 1, 32>}, {pipeline_mode = #tpu.pipeline_mode<synchronous>, transform_indices = @transform_7, window_bounds = array<i64: 2, 1, 32>}, {pipeline_mode = #tpu.pipeline_mode<synchronous>, transform_indices = @transform_8, window_bounds = array<i64: 2, 1, 32>}, {pipeline_mode = #tpu.pipeline_mode<synchronous>, transform_indices = @transform_9, window_bounds = array<i64: 2, 32, 96>}, {pipeline_mode = #tpu.pipeline_mode<synchronous>, transform_indices = @transform_10, window_bounds = array<i64: 2, 1, 96>}, {pipeline_mode = #tpu.pipeline_mode<synchronous>, transform_indices = @transform_11, window_bounds = array<i64: 2, 32, 32>}, {pipeline_mode = #tpu.pipeline_mode<synchronous>, transform_indices = @transform_12, window_bounds = array<i64: 2, 1, 32>}, {pipeline_mode = #tpu.pipeline_mode<synchronous>, transform_indices = @transform_13, window_bounds = array<i64: 2, 1, 32>}, {pipeline_mode = #tpu.pipeline_mode<synchronous>, transform_indices = @transform_14, window_bounds = array<i64: 2, 1, 32>}, {pipeline_mode = #tpu.pipeline_mode<synchronous>, transform_indices = @transform_15, window_bounds = array<i64: 2, 32, 64>}, {pipeline_mode = #tpu.pipeline_mode<synchronous>, transform_indices = @transform_16, window_bounds = array<i64: 2, 1, 64>}, {pipeline_mode = #tpu.pipeline_mode<synchronous>, transform_indices = @transform_17, window_bounds = array<i64: 2, 64, 32>}, {pipeline_mode = #tpu.pipeline_mode<synchronous>, transform_indices = @transform_18, window_bounds = array<i64: 2, 1, 32>}, {pipeline_mode = #tpu.pipeline_mode<synchronous>, transform_indices = @transform_19, window_bounds = array<i64: 2, 1, 32>}, {pipeline_mode = #tpu.pipeline_mode<synchronous>, transform_indices = @transform_20, window_bounds = array<i64: 2, 1, 32>}, {transform_indices = @transform_21, window_bounds = array<i64: 1, 8, 32>}]} {
    %c0 = arith.constant 0 : index
    %c0_0 = arith.constant 0 : index
    %c0_1 = arith.constant 0 : index
    %0 = vector.load %arg1[%c0, %c0_0, %c0_1] : memref<1x8x32xf32, #tpu.memory_space<vmem>>, vector<1x8x32xf32>
    %1 = vector.shape_cast %0 : vector<1x8x32xf32> to vector<8x32xf32>
    %c0_2 = arith.constant 0 : index
    %c0_3 = arith.constant 0 : index
    %c0_4 = arith.constant 0 : index
    %2 = vector.load %arg2[%c0_2, %c0_3, %c0_4] : memref<1x8x32xf32, #tpu.memory_space<vmem>>, vector<1x8x32xf32>
    %3 = vector.shape_cast %2 : vector<1x8x32xf32> to vector<8x32xf32>
    %c0_5 = arith.constant 0 : index
    %c0_6 = arith.constant 0 : index
    %c0_7 = arith.constant 0 : index
    %4 = vector.load %arg3[%c0_5, %c0_6, %c0_7] : memref<1x1x8xf32, #tpu.memory_space<vmem>>, vector<1x1x8xf32>
    %5 = vector.shape_cast %4 : vector<1x1x8xf32> to vector<1x8xf32>
    %6 = tpu.iota {dimensions = array<i32: 0>} : vector<8x8xi32>
    %7 = tpu.iota {dimensions = array<i32: 1>} : vector<8x8xi32>
    %8 = arith.subi %7, %6 : vector<8x8xi32>
    %c0_i32 = arith.constant 0 : i32
    %9 = vector.broadcast %c0_i32 : i32 to vector<8x8xi32>
    %10 = arith.cmpi sle, %8, %9 : vector<8x8xi32>
    %cst = arith.constant 5.000000e-01 : f32
    %11 = vector.broadcast %cst : f32 to vector<1x8xf32>
    %12 = arith.cmpf ogt, %5, %11 : vector<1x8xf32>
    %13 = vector.broadcast %12 : vector<1x8xi1> to vector<8x8xi1>
    %14 = arith.andi %10, %13 : vector<8x8xi1>
    %c0_8 = arith.constant 0 : index
    %c0_9 = arith.constant 0 : index
    %c0_10 = arith.constant 0 : index
    %15 = vector.load %arg4[%c0_8, %c0_9, %c0_10] : memref<2x32x96xbf16, #tpu.memory_space<vmem>>, vector<1x32x96xbf16>
    %16 = vector.shape_cast %15 : vector<1x32x96xbf16> to vector<32x96xbf16>
    %c0_11 = arith.constant 0 : index
    %c0_12 = arith.constant 0 : index
    %c0_13 = arith.constant 0 : index
    %17 = vector.load %arg5[%c0_11, %c0_12, %c0_13] : memref<2x1x96xf32, #tpu.memory_space<vmem>>, vector<1x1x96xf32>
    %18 = vector.shape_cast %17 : vector<1x1x96xf32> to vector<1x96xf32>
    %c0_14 = arith.constant 0 : index
    %c0_15 = arith.constant 0 : index
    %c0_16 = arith.constant 0 : index
    %19 = vector.load %arg6[%c0_14, %c0_15, %c0_16] : memref<2x32x32xbf16, #tpu.memory_space<vmem>>, vector<1x32x32xbf16>
    %20 = vector.shape_cast %19 : vector<1x32x32xbf16> to vector<32x32xbf16>
    %c0_17 = arith.constant 0 : index
    %c0_18 = arith.constant 0 : index
    %c0_19 = arith.constant 0 : index
    %21 = vector.load %arg7[%c0_17, %c0_18, %c0_19] : memref<2x1x32xf32, #tpu.memory_space<vmem>>, vector<1x1x32xf32>
    %22 = vector.shape_cast %21 : vector<1x1x32xf32> to vector<1x32xf32>
    %c0_20 = arith.constant 0 : index
    %c0_21 = arith.constant 0 : index
    %c0_22 = arith.constant 0 : index
    %23 = vector.load %arg8[%c0_20, %c0_21, %c0_22] : memref<2x1x32xf32, #tpu.memory_space<vmem>>, vector<1x1x32xf32>
    %24 = vector.shape_cast %23 : vector<1x1x32xf32> to vector<1x32xf32>
    %c0_23 = arith.constant 0 : index
    %c0_24 = arith.constant 0 : index
    %c0_25 = arith.constant 0 : index
    %25 = vector.load %arg9[%c0_23, %c0_24, %c0_25] : memref<2x1x32xf32, #tpu.memory_space<vmem>>, vector<1x1x32xf32>
    %26 = vector.shape_cast %25 : vector<1x1x32xf32> to vector<1x32xf32>
    %27 = arith.truncf %1 : vector<8x32xf32> to vector<8x32xbf16>
    %cst_26 = arith.constant dense<0.000000e+00> : vector<8x96xf32>
    %28 = tpu.matmul %27, %16, %cst_26 {dimension_numbers = #tpu.dot_dimension_numbers<[1], [0], [0], [1], [0, 0, 1, 1], [], []>} : vector<8x32xbf16>, vector<32x96xbf16>, vector<8x96xf32> -> vector<8x96xf32>
    %29 = vector.broadcast %18 : vector<1x96xf32> to vector<8x96xf32>
    %30 = arith.addf %28, %29 : vector<8x96xf32>
    %31 = vector.extract_strided_slice %30 {offsets = [0, 0], sizes = [8, 32], strides = [1, 1]} : vector<8x96xf32> to vector<8x32xf32>
    %32 = vector.extract_strided_slice %30 {offsets = [0, 32], sizes = [8, 32], strides = [1, 1]} : vector<8x96xf32> to vector<8x32xf32>
    %33 = vector.extract_strided_slice %30 {offsets = [0, 64], sizes = [8, 32], strides = [1, 1]} : vector<8x96xf32> to vector<8x32xf32>
    %34 = vector.extract_strided_slice %31 {offsets = [0, 0], sizes = [8, 8], strides = [1, 1]} : vector<8x32xf32> to vector<8x8xf32>
    %35 = vector.extract_strided_slice %32 {offsets = [0, 0], sizes = [8, 8], strides = [1, 1]} : vector<8x32xf32> to vector<8x8xf32>
    %36 = arith.truncf %34 : vector<8x8xf32> to vector<8x8xbf16>
    %37 = arith.truncf %35 : vector<8x8xf32> to vector<8x8xbf16>
    %cst_27 = arith.constant dense<0.000000e+00> : vector<8x8xf32>
    %38 = tpu.matmul %36, %37, %cst_27 {dimension_numbers = #tpu.dot_dimension_numbers<[1], [1], [0], [0], [0, 0, 1, 0], [], []>} : vector<8x8xbf16>, vector<8x8xbf16>, vector<8x8xf32> -> vector<8x8xf32>
    %cst_28 = arith.constant 0.353553385 : f32
    %39 = vector.broadcast %cst_28 : f32 to vector<8x8xf32>
    %40 = arith.mulf %38, %39 : vector<8x8xf32>
    %cst_29 = arith.constant -1.000000e+09 : f32
    %41 = vector.broadcast %cst_29 : f32 to vector<8x8xf32>
    %42 = arith.select %14, %40, %41 : vector<8x8xi1>, vector<8x8xf32>
    %cst_30 = arith.constant dense<0xFF800000> : vector<8xf32>
    %43 = vector.multi_reduction <maximumf>, %42, %cst_30 [1] : vector<8x8xf32> to vector<8xf32>
    %44 = vector.shape_cast %43 : vector<8xf32> to vector<8x1xf32>
    %45 = vector.broadcast %44 : vector<8x1xf32> to vector<8x8xf32>
    %46 = arith.subf %42, %45 : vector<8x8xf32>
    %47 = math.exp %46 : vector<8x8xf32>
    %cst_31 = arith.constant dense<0.000000e+00> : vector<8xf32>
    %48 = vector.multi_reduction <add>, %47, %cst_31 [1] : vector<8x8xf32> to vector<8xf32>
    %49 = vector.shape_cast %48 : vector<8xf32> to vector<8x1xf32>
    %50 = tpu.reciprocal %49 {approx = true} : vector<8x1xf32> -> vector<8x1xf32>
    %51 = vector.broadcast %50 : vector<8x1xf32> to vector<8x8xf32>
    %52 = arith.mulf %47, %51 : vector<8x8xf32>
    %53 = vector.extract_strided_slice %33 {offsets = [0, 0], sizes = [8, 8], strides = [1, 1]} : vector<8x32xf32> to vector<8x8xf32>
    %54 = arith.truncf %52 : vector<8x8xf32> to vector<8x8xbf16>
    %55 = arith.truncf %53 : vector<8x8xf32> to vector<8x8xbf16>
    %cst_32 = arith.constant dense<0.000000e+00> : vector<8x8xf32>
    %56 = tpu.matmul %54, %55, %cst_32 {dimension_numbers = #tpu.dot_dimension_numbers<[1], [0], [0], [1], [0, 0, 1, 1], [], []>} : vector<8x8xbf16>, vector<8x8xbf16>, vector<8x8xf32> -> vector<8x8xf32>
    %57 = vector.extract_strided_slice %31 {offsets = [0, 8], sizes = [8, 8], strides = [1, 1]} : vector<8x32xf32> to vector<8x8xf32>
    %58 = vector.extract_strided_slice %32 {offsets = [0, 8], sizes = [8, 8], strides = [1, 1]} : vector<8x32xf32> to vector<8x8xf32>
    %59 = arith.truncf %57 : vector<8x8xf32> to vector<8x8xbf16>
    %60 = arith.truncf %58 : vector<8x8xf32> to vector<8x8xbf16>
    %cst_33 = arith.constant dense<0.000000e+00> : vector<8x8xf32>
    %61 = tpu.matmul %59, %60, %cst_33 {dimension_numbers = #tpu.dot_dimension_numbers<[1], [1], [0], [0], [0, 0, 1, 0], [], []>} : vector<8x8xbf16>, vector<8x8xbf16>, vector<8x8xf32> -> vector<8x8xf32>
    %cst_34 = arith.constant 0.353553385 : f32
    %62 = vector.broadcast %cst_34 : f32 to vector<8x8xf32>
    %63 = arith.mulf %61, %62 : vector<8x8xf32>
    %cst_35 = arith.constant -1.000000e+09 : f32
    %64 = vector.broadcast %cst_35 : f32 to vector<8x8xf32>
    %65 = arith.select %14, %63, %64 : vector<8x8xi1>, vector<8x8xf32>
    %cst_36 = arith.constant dense<0xFF800000> : vector<8xf32>
    %66 = vector.multi_reduction <maximumf>, %65, %cst_36 [1] : vector<8x8xf32> to vector<8xf32>
    %67 = vector.shape_cast %66 : vector<8xf32> to vector<8x1xf32>
    %68 = vector.broadcast %67 : vector<8x1xf32> to vector<8x8xf32>
    %69 = arith.subf %65, %68 : vector<8x8xf32>
    %70 = math.exp %69 : vector<8x8xf32>
    %cst_37 = arith.constant dense<0.000000e+00> : vector<8xf32>
    %71 = vector.multi_reduction <add>, %70, %cst_37 [1] : vector<8x8xf32> to vector<8xf32>
    %72 = vector.shape_cast %71 : vector<8xf32> to vector<8x1xf32>
    %73 = tpu.reciprocal %72 {approx = true} : vector<8x1xf32> -> vector<8x1xf32>
    %74 = vector.broadcast %73 : vector<8x1xf32> to vector<8x8xf32>
    %75 = arith.mulf %70, %74 : vector<8x8xf32>
    %76 = vector.extract_strided_slice %33 {offsets = [0, 8], sizes = [8, 8], strides = [1, 1]} : vector<8x32xf32> to vector<8x8xf32>
    %77 = arith.truncf %75 : vector<8x8xf32> to vector<8x8xbf16>
    %78 = arith.truncf %76 : vector<8x8xf32> to vector<8x8xbf16>
    %cst_38 = arith.constant dense<0.000000e+00> : vector<8x8xf32>
    %79 = tpu.matmul %77, %78, %cst_38 {dimension_numbers = #tpu.dot_dimension_numbers<[1], [0], [0], [1], [0, 0, 1, 1], [], []>} : vector<8x8xbf16>, vector<8x8xbf16>, vector<8x8xf32> -> vector<8x8xf32>
    %80 = vector.extract_strided_slice %31 {offsets = [0, 16], sizes = [8, 8], strides = [1, 1]} : vector<8x32xf32> to vector<8x8xf32>
    %81 = vector.extract_strided_slice %32 {offsets = [0, 16], sizes = [8, 8], strides = [1, 1]} : vector<8x32xf32> to vector<8x8xf32>
    %82 = arith.truncf %80 : vector<8x8xf32> to vector<8x8xbf16>
    %83 = arith.truncf %81 : vector<8x8xf32> to vector<8x8xbf16>
    %cst_39 = arith.constant dense<0.000000e+00> : vector<8x8xf32>
    %84 = tpu.matmul %82, %83, %cst_39 {dimension_numbers = #tpu.dot_dimension_numbers<[1], [1], [0], [0], [0, 0, 1, 0], [], []>} : vector<8x8xbf16>, vector<8x8xbf16>, vector<8x8xf32> -> vector<8x8xf32>
    %cst_40 = arith.constant 0.353553385 : f32
    %85 = vector.broadcast %cst_40 : f32 to vector<8x8xf32>
    %86 = arith.mulf %84, %85 : vector<8x8xf32>
    %cst_41 = arith.constant -1.000000e+09 : f32
    %87 = vector.broadcast %cst_41 : f32 to vector<8x8xf32>
    %88 = arith.select %14, %86, %87 : vector<8x8xi1>, vector<8x8xf32>
    %cst_42 = arith.constant dense<0xFF800000> : vector<8xf32>
    %89 = vector.multi_reduction <maximumf>, %88, %cst_42 [1] : vector<8x8xf32> to vector<8xf32>
    %90 = vector.shape_cast %89 : vector<8xf32> to vector<8x1xf32>
    %91 = vector.broadcast %90 : vector<8x1xf32> to vector<8x8xf32>
    %92 = arith.subf %88, %91 : vector<8x8xf32>
    %93 = math.exp %92 : vector<8x8xf32>
    %cst_43 = arith.constant dense<0.000000e+00> : vector<8xf32>
    %94 = vector.multi_reduction <add>, %93, %cst_43 [1] : vector<8x8xf32> to vector<8xf32>
    %95 = vector.shape_cast %94 : vector<8xf32> to vector<8x1xf32>
    %96 = tpu.reciprocal %95 {approx = true} : vector<8x1xf32> -> vector<8x1xf32>
    %97 = vector.broadcast %96 : vector<8x1xf32> to vector<8x8xf32>
    %98 = arith.mulf %93, %97 : vector<8x8xf32>
    %99 = vector.extract_strided_slice %33 {offsets = [0, 16], sizes = [8, 8], strides = [1, 1]} : vector<8x32xf32> to vector<8x8xf32>
    %100 = arith.truncf %98 : vector<8x8xf32> to vector<8x8xbf16>
    %101 = arith.truncf %99 : vector<8x8xf32> to vector<8x8xbf16>
    %cst_44 = arith.constant dense<0.000000e+00> : vector<8x8xf32>
    %102 = tpu.matmul %100, %101, %cst_44 {dimension_numbers = #tpu.dot_dimension_numbers<[1], [0], [0], [1], [0, 0, 1, 1], [], []>} : vector<8x8xbf16>, vector<8x8xbf16>, vector<8x8xf32> -> vector<8x8xf32>
    %103 = vector.extract_strided_slice %31 {offsets = [0, 24], sizes = [8, 8], strides = [1, 1]} : vector<8x32xf32> to vector<8x8xf32>
    %104 = vector.extract_strided_slice %32 {offsets = [0, 24], sizes = [8, 8], strides = [1, 1]} : vector<8x32xf32> to vector<8x8xf32>
    %105 = arith.truncf %103 : vector<8x8xf32> to vector<8x8xbf16>
    %106 = arith.truncf %104 : vector<8x8xf32> to vector<8x8xbf16>
    %cst_45 = arith.constant dense<0.000000e+00> : vector<8x8xf32>
    %107 = tpu.matmul %105, %106, %cst_45 {dimension_numbers = #tpu.dot_dimension_numbers<[1], [1], [0], [0], [0, 0, 1, 0], [], []>} : vector<8x8xbf16>, vector<8x8xbf16>, vector<8x8xf32> -> vector<8x8xf32>
    %cst_46 = arith.constant 0.353553385 : f32
    %108 = vector.broadcast %cst_46 : f32 to vector<8x8xf32>
    %109 = arith.mulf %107, %108 : vector<8x8xf32>
    %cst_47 = arith.constant -1.000000e+09 : f32
    %110 = vector.broadcast %cst_47 : f32 to vector<8x8xf32>
    %111 = arith.select %14, %109, %110 : vector<8x8xi1>, vector<8x8xf32>
    %cst_48 = arith.constant dense<0xFF800000> : vector<8xf32>
    %112 = vector.multi_reduction <maximumf>, %111, %cst_48 [1] : vector<8x8xf32> to vector<8xf32>
    %113 = vector.shape_cast %112 : vector<8xf32> to vector<8x1xf32>
    %114 = vector.broadcast %113 : vector<8x1xf32> to vector<8x8xf32>
    %115 = arith.subf %111, %114 : vector<8x8xf32>
    %116 = math.exp %115 : vector<8x8xf32>
    %cst_49 = arith.constant dense<0.000000e+00> : vector<8xf32>
    %117 = vector.multi_reduction <add>, %116, %cst_49 [1] : vector<8x8xf32> to vector<8xf32>
    %118 = vector.shape_cast %117 : vector<8xf32> to vector<8x1xf32>
    %119 = tpu.reciprocal %118 {approx = true} : vector<8x1xf32> -> vector<8x1xf32>
    %120 = vector.broadcast %119 : vector<8x1xf32> to vector<8x8xf32>
    %121 = arith.mulf %116, %120 : vector<8x8xf32>
    %122 = vector.extract_strided_slice %33 {offsets = [0, 24], sizes = [8, 8], strides = [1, 1]} : vector<8x32xf32> to vector<8x8xf32>
    %123 = arith.truncf %121 : vector<8x8xf32> to vector<8x8xbf16>
    %124 = arith.truncf %122 : vector<8x8xf32> to vector<8x8xbf16>
    %cst_50 = arith.constant dense<0.000000e+00> : vector<8x8xf32>
    %125 = tpu.matmul %123, %124, %cst_50 {dimension_numbers = #tpu.dot_dimension_numbers<[1], [0], [0], [1], [0, 0, 1, 1], [], []>} : vector<8x8xbf16>, vector<8x8xbf16>, vector<8x8xf32> -> vector<8x8xf32>
    %126 = tpu.concatenate %56, %79, %102, %125 in 1 : vector<8x8xf32>, vector<8x8xf32>, vector<8x8xf32>, vector<8x8xf32> -> vector<8x32xf32>
    %127 = arith.truncf %126 : vector<8x32xf32> to vector<8x32xbf16>
    %cst_51 = arith.constant dense<0.000000e+00> : vector<8x32xf32>
    %128 = tpu.matmul %127, %20, %cst_51 {dimension_numbers = #tpu.dot_dimension_numbers<[1], [0], [0], [1], [0, 0, 1, 1], [], []>} : vector<8x32xbf16>, vector<32x32xbf16>, vector<8x32xf32> -> vector<8x32xf32>
    %129 = vector.broadcast %22 : vector<1x32xf32> to vector<8x32xf32>
    %130 = arith.addf %128, %129 : vector<8x32xf32>
    %131 = arith.addf %130, %1 : vector<8x32xf32>
    %cst_52 = arith.constant dense<0.000000e+00> : vector<8xf32>
    %132 = vector.multi_reduction <add>, %131, %cst_52 [1] : vector<8x32xf32> to vector<8xf32>
    %133 = vector.shape_cast %132 : vector<8xf32> to vector<8x1xf32>
    %cst_53 = arith.constant 3.200000e+01 : f32
    %134 = vector.broadcast %cst_53 : f32 to vector<8x1xf32>
    %135 = arith.divf %133, %134 : vector<8x1xf32>
    %136 = vector.broadcast %135 : vector<8x1xf32> to vector<8x32xf32>
    %137 = arith.subf %131, %136 : vector<8x32xf32>
    %138 = arith.mulf %137, %137 : vector<8x32xf32>
    %cst_54 = arith.constant dense<0.000000e+00> : vector<8xf32>
    %139 = vector.multi_reduction <add>, %138, %cst_54 [1] : vector<8x32xf32> to vector<8xf32>
    %140 = vector.shape_cast %139 : vector<8xf32> to vector<8x1xf32>
    %cst_55 = arith.constant 3.200000e+01 : f32
    %141 = vector.broadcast %cst_55 : f32 to vector<8x1xf32>
    %142 = arith.divf %140, %141 : vector<8x1xf32>
    %143 = vector.broadcast %135 : vector<8x1xf32> to vector<8x32xf32>
    %144 = arith.subf %131, %143 : vector<8x32xf32>
    %cst_56 = arith.constant 9.99999974E-6 : f32
    %145 = vector.broadcast %cst_56 : f32 to vector<8x1xf32>
    %146 = arith.addf %142, %145 : vector<8x1xf32>
    %147 = math.rsqrt %146 : vector<8x1xf32>
    %148 = vector.broadcast %147 : vector<8x1xf32> to vector<8x32xf32>
    %149 = arith.mulf %144, %148 : vector<8x32xf32>
    %150 = vector.broadcast %24 : vector<1x32xf32> to vector<8x32xf32>
    %151 = arith.mulf %149, %150 : vector<8x32xf32>
    %152 = vector.broadcast %26 : vector<1x32xf32> to vector<8x32xf32>
    %153 = arith.addf %151, %152 : vector<8x32xf32>
    %c0_57 = arith.constant 0 : index
    %c0_58 = arith.constant 0 : index
    %c0_59 = arith.constant 0 : index
    %154 = vector.load %arg10[%c0_57, %c0_58, %c0_59] : memref<2x32x96xbf16, #tpu.memory_space<vmem>>, vector<1x32x96xbf16>
    %155 = vector.shape_cast %154 : vector<1x32x96xbf16> to vector<32x96xbf16>
    %c0_60 = arith.constant 0 : index
    %c0_61 = arith.constant 0 : index
    %c0_62 = arith.constant 0 : index
    %156 = vector.load %arg11[%c0_60, %c0_61, %c0_62] : memref<2x1x96xf32, #tpu.memory_space<vmem>>, vector<1x1x96xf32>
    %157 = vector.shape_cast %156 : vector<1x1x96xf32> to vector<1x96xf32>
    %c0_63 = arith.constant 0 : index
    %c0_64 = arith.constant 0 : index
    %c0_65 = arith.constant 0 : index
    %158 = vector.load %arg12[%c0_63, %c0_64, %c0_65] : memref<2x32x32xbf16, #tpu.memory_space<vmem>>, vector<1x32x32xbf16>
    %159 = vector.shape_cast %158 : vector<1x32x32xbf16> to vector<32x32xbf16>
    %c0_66 = arith.constant 0 : index
    %c0_67 = arith.constant 0 : index
    %c0_68 = arith.constant 0 : index
    %160 = vector.load %arg13[%c0_66, %c0_67, %c0_68] : memref<2x1x32xf32, #tpu.memory_space<vmem>>, vector<1x1x32xf32>
    %161 = vector.shape_cast %160 : vector<1x1x32xf32> to vector<1x32xf32>
    %c0_69 = arith.constant 0 : index
    %c0_70 = arith.constant 0 : index
    %c0_71 = arith.constant 0 : index
    %162 = vector.load %arg14[%c0_69, %c0_70, %c0_71] : memref<2x1x32xf32, #tpu.memory_space<vmem>>, vector<1x1x32xf32>
    %163 = vector.shape_cast %162 : vector<1x1x32xf32> to vector<1x32xf32>
    %c0_72 = arith.constant 0 : index
    %c0_73 = arith.constant 0 : index
    %c0_74 = arith.constant 0 : index
    %164 = vector.load %arg15[%c0_72, %c0_73, %c0_74] : memref<2x1x32xf32, #tpu.memory_space<vmem>>, vector<1x1x32xf32>
    %165 = vector.shape_cast %164 : vector<1x1x32xf32> to vector<1x32xf32>
    %166 = vector.extract_strided_slice %155 {offsets = [0, 0], sizes = [32, 32], strides = [1, 1]} : vector<32x96xbf16> to vector<32x32xbf16>
    %167 = arith.truncf %153 : vector<8x32xf32> to vector<8x32xbf16>
    %cst_75 = arith.constant dense<0.000000e+00> : vector<8x32xf32>
    %168 = tpu.matmul %167, %166, %cst_75 {dimension_numbers = #tpu.dot_dimension_numbers<[1], [0], [0], [1], [0, 0, 1, 1], [], []>} : vector<8x32xbf16>, vector<32x32xbf16>, vector<8x32xf32> -> vector<8x32xf32>
    %169 = vector.extract_strided_slice %157 {offsets = [0, 0], sizes = [1, 32], strides = [1, 1]} : vector<1x96xf32> to vector<1x32xf32>
    %170 = vector.broadcast %169 : vector<1x32xf32> to vector<8x32xf32>
    %171 = arith.addf %168, %170 : vector<8x32xf32>
    %172 = vector.extract_strided_slice %155 {offsets = [0, 32], sizes = [32, 64], strides = [1, 1]} : vector<32x96xbf16> to vector<32x64xbf16>
    %173 = arith.truncf %3 : vector<8x32xf32> to vector<8x32xbf16>
    %cst_76 = arith.constant dense<0.000000e+00> : vector<8x64xf32>
    %174 = tpu.matmul %173, %172, %cst_76 {dimension_numbers = #tpu.dot_dimension_numbers<[1], [0], [0], [1], [0, 0, 1, 1], [], []>} : vector<8x32xbf16>, vector<32x64xbf16>, vector<8x64xf32> -> vector<8x64xf32>
    %175 = vector.extract_strided_slice %157 {offsets = [0, 32], sizes = [1, 64], strides = [1, 1]} : vector<1x96xf32> to vector<1x64xf32>
    %176 = vector.broadcast %175 : vector<1x64xf32> to vector<8x64xf32>
    %177 = arith.addf %174, %176 : vector<8x64xf32>
    %178 = vector.extract_strided_slice %177 {offsets = [0, 0], sizes = [8, 32], strides = [1, 1]} : vector<8x64xf32> to vector<8x32xf32>
    %179 = vector.extract_strided_slice %177 {offsets = [0, 32], sizes = [8, 32], strides = [1, 1]} : vector<8x64xf32> to vector<8x32xf32>
    %180 = vector.extract_strided_slice %171 {offsets = [0, 0], sizes = [8, 8], strides = [1, 1]} : vector<8x32xf32> to vector<8x8xf32>
    %181 = vector.extract_strided_slice %178 {offsets = [0, 0], sizes = [8, 8], strides = [1, 1]} : vector<8x32xf32> to vector<8x8xf32>
    %182 = arith.truncf %180 : vector<8x8xf32> to vector<8x8xbf16>
    %183 = arith.truncf %181 : vector<8x8xf32> to vector<8x8xbf16>
    %cst_77 = arith.constant dense<0.000000e+00> : vector<8x8xf32>
    %184 = tpu.matmul %182, %183, %cst_77 {dimension_numbers = #tpu.dot_dimension_numbers<[1], [1], [0], [0], [0, 0, 1, 0], [], []>} : vector<8x8xbf16>, vector<8x8xbf16>, vector<8x8xf32> -> vector<8x8xf32>
    %cst_78 = arith.constant 0.353553385 : f32
    %185 = vector.broadcast %cst_78 : f32 to vector<8x8xf32>
    %186 = arith.mulf %184, %185 : vector<8x8xf32>
    %cst_79 = arith.constant dense<0xFF800000> : vector<8xf32>
    %187 = vector.multi_reduction <maximumf>, %186, %cst_79 [1] : vector<8x8xf32> to vector<8xf32>
    %188 = vector.shape_cast %187 : vector<8xf32> to vector<8x1xf32>
    %189 = vector.broadcast %188 : vector<8x1xf32> to vector<8x8xf32>
    %190 = arith.subf %186, %189 : vector<8x8xf32>
    %191 = math.exp %190 : vector<8x8xf32>
    %cst_80 = arith.constant dense<0.000000e+00> : vector<8xf32>
    %192 = vector.multi_reduction <add>, %191, %cst_80 [1] : vector<8x8xf32> to vector<8xf32>
    %193 = vector.shape_cast %192 : vector<8xf32> to vector<8x1xf32>
    %194 = tpu.reciprocal %193 {approx = true} : vector<8x1xf32> -> vector<8x1xf32>
    %195 = vector.broadcast %194 : vector<8x1xf32> to vector<8x8xf32>
    %196 = arith.mulf %191, %195 : vector<8x8xf32>
    %197 = vector.extract_strided_slice %179 {offsets = [0, 0], sizes = [8, 8], strides = [1, 1]} : vector<8x32xf32> to vector<8x8xf32>
    %198 = arith.truncf %196 : vector<8x8xf32> to vector<8x8xbf16>
    %199 = arith.truncf %197 : vector<8x8xf32> to vector<8x8xbf16>
    %cst_81 = arith.constant dense<0.000000e+00> : vector<8x8xf32>
    %200 = tpu.matmul %198, %199, %cst_81 {dimension_numbers = #tpu.dot_dimension_numbers<[1], [0], [0], [1], [0, 0, 1, 1], [], []>} : vector<8x8xbf16>, vector<8x8xbf16>, vector<8x8xf32> -> vector<8x8xf32>
    %201 = vector.extract_strided_slice %171 {offsets = [0, 8], sizes = [8, 8], strides = [1, 1]} : vector<8x32xf32> to vector<8x8xf32>
    %202 = vector.extract_strided_slice %178 {offsets = [0, 8], sizes = [8, 8], strides = [1, 1]} : vector<8x32xf32> to vector<8x8xf32>
    %203 = arith.truncf %201 : vector<8x8xf32> to vector<8x8xbf16>
    %204 = arith.truncf %202 : vector<8x8xf32> to vector<8x8xbf16>
    %cst_82 = arith.constant dense<0.000000e+00> : vector<8x8xf32>
    %205 = tpu.matmul %203, %204, %cst_82 {dimension_numbers = #tpu.dot_dimension_numbers<[1], [1], [0], [0], [0, 0, 1, 0], [], []>} : vector<8x8xbf16>, vector<8x8xbf16>, vector<8x8xf32> -> vector<8x8xf32>
    %cst_83 = arith.constant 0.353553385 : f32
    %206 = vector.broadcast %cst_83 : f32 to vector<8x8xf32>
    %207 = arith.mulf %205, %206 : vector<8x8xf32>
    %cst_84 = arith.constant dense<0xFF800000> : vector<8xf32>
    %208 = vector.multi_reduction <maximumf>, %207, %cst_84 [1] : vector<8x8xf32> to vector<8xf32>
    %209 = vector.shape_cast %208 : vector<8xf32> to vector<8x1xf32>
    %210 = vector.broadcast %209 : vector<8x1xf32> to vector<8x8xf32>
    %211 = arith.subf %207, %210 : vector<8x8xf32>
    %212 = math.exp %211 : vector<8x8xf32>
    %cst_85 = arith.constant dense<0.000000e+00> : vector<8xf32>
    %213 = vector.multi_reduction <add>, %212, %cst_85 [1] : vector<8x8xf32> to vector<8xf32>
    %214 = vector.shape_cast %213 : vector<8xf32> to vector<8x1xf32>
    %215 = tpu.reciprocal %214 {approx = true} : vector<8x1xf32> -> vector<8x1xf32>
    %216 = vector.broadcast %215 : vector<8x1xf32> to vector<8x8xf32>
    %217 = arith.mulf %212, %216 : vector<8x8xf32>
    %218 = vector.extract_strided_slice %179 {offsets = [0, 8], sizes = [8, 8], strides = [1, 1]} : vector<8x32xf32> to vector<8x8xf32>
    %219 = arith.truncf %217 : vector<8x8xf32> to vector<8x8xbf16>
    %220 = arith.truncf %218 : vector<8x8xf32> to vector<8x8xbf16>
    %cst_86 = arith.constant dense<0.000000e+00> : vector<8x8xf32>
    %221 = tpu.matmul %219, %220, %cst_86 {dimension_numbers = #tpu.dot_dimension_numbers<[1], [0], [0], [1], [0, 0, 1, 1], [], []>} : vector<8x8xbf16>, vector<8x8xbf16>, vector<8x8xf32> -> vector<8x8xf32>
    %222 = vector.extract_strided_slice %171 {offsets = [0, 16], sizes = [8, 8], strides = [1, 1]} : vector<8x32xf32> to vector<8x8xf32>
    %223 = vector.extract_strided_slice %178 {offsets = [0, 16], sizes = [8, 8], strides = [1, 1]} : vector<8x32xf32> to vector<8x8xf32>
    %224 = arith.truncf %222 : vector<8x8xf32> to vector<8x8xbf16>
    %225 = arith.truncf %223 : vector<8x8xf32> to vector<8x8xbf16>
    %cst_87 = arith.constant dense<0.000000e+00> : vector<8x8xf32>
    %226 = tpu.matmul %224, %225, %cst_87 {dimension_numbers = #tpu.dot_dimension_numbers<[1], [1], [0], [0], [0, 0, 1, 0], [], []>} : vector<8x8xbf16>, vector<8x8xbf16>, vector<8x8xf32> -> vector<8x8xf32>
    %cst_88 = arith.constant 0.353553385 : f32
    %227 = vector.broadcast %cst_88 : f32 to vector<8x8xf32>
    %228 = arith.mulf %226, %227 : vector<8x8xf32>
    %cst_89 = arith.constant dense<0xFF800000> : vector<8xf32>
    %229 = vector.multi_reduction <maximumf>, %228, %cst_89 [1] : vector<8x8xf32> to vector<8xf32>
    %230 = vector.shape_cast %229 : vector<8xf32> to vector<8x1xf32>
    %231 = vector.broadcast %230 : vector<8x1xf32> to vector<8x8xf32>
    %232 = arith.subf %228, %231 : vector<8x8xf32>
    %233 = math.exp %232 : vector<8x8xf32>
    %cst_90 = arith.constant dense<0.000000e+00> : vector<8xf32>
    %234 = vector.multi_reduction <add>, %233, %cst_90 [1] : vector<8x8xf32> to vector<8xf32>
    %235 = vector.shape_cast %234 : vector<8xf32> to vector<8x1xf32>
    %236 = tpu.reciprocal %235 {approx = true} : vector<8x1xf32> -> vector<8x1xf32>
    %237 = vector.broadcast %236 : vector<8x1xf32> to vector<8x8xf32>
    %238 = arith.mulf %233, %237 : vector<8x8xf32>
    %239 = vector.extract_strided_slice %179 {offsets = [0, 16], sizes = [8, 8], strides = [1, 1]} : vector<8x32xf32> to vector<8x8xf32>
    %240 = arith.truncf %238 : vector<8x8xf32> to vector<8x8xbf16>
    %241 = arith.truncf %239 : vector<8x8xf32> to vector<8x8xbf16>
    %cst_91 = arith.constant dense<0.000000e+00> : vector<8x8xf32>
    %242 = tpu.matmul %240, %241, %cst_91 {dimension_numbers = #tpu.dot_dimension_numbers<[1], [0], [0], [1], [0, 0, 1, 1], [], []>} : vector<8x8xbf16>, vector<8x8xbf16>, vector<8x8xf32> -> vector<8x8xf32>
    %243 = vector.extract_strided_slice %171 {offsets = [0, 24], sizes = [8, 8], strides = [1, 1]} : vector<8x32xf32> to vector<8x8xf32>
    %244 = vector.extract_strided_slice %178 {offsets = [0, 24], sizes = [8, 8], strides = [1, 1]} : vector<8x32xf32> to vector<8x8xf32>
    %245 = arith.truncf %243 : vector<8x8xf32> to vector<8x8xbf16>
    %246 = arith.truncf %244 : vector<8x8xf32> to vector<8x8xbf16>
    %cst_92 = arith.constant dense<0.000000e+00> : vector<8x8xf32>
    %247 = tpu.matmul %245, %246, %cst_92 {dimension_numbers = #tpu.dot_dimension_numbers<[1], [1], [0], [0], [0, 0, 1, 0], [], []>} : vector<8x8xbf16>, vector<8x8xbf16>, vector<8x8xf32> -> vector<8x8xf32>
    %cst_93 = arith.constant 0.353553385 : f32
    %248 = vector.broadcast %cst_93 : f32 to vector<8x8xf32>
    %249 = arith.mulf %247, %248 : vector<8x8xf32>
    %cst_94 = arith.constant dense<0xFF800000> : vector<8xf32>
    %250 = vector.multi_reduction <maximumf>, %249, %cst_94 [1] : vector<8x8xf32> to vector<8xf32>
    %251 = vector.shape_cast %250 : vector<8xf32> to vector<8x1xf32>
    %252 = vector.broadcast %251 : vector<8x1xf32> to vector<8x8xf32>
    %253 = arith.subf %249, %252 : vector<8x8xf32>
    %254 = math.exp %253 : vector<8x8xf32>
    %cst_95 = arith.constant dense<0.000000e+00> : vector<8xf32>
    %255 = vector.multi_reduction <add>, %254, %cst_95 [1] : vector<8x8xf32> to vector<8xf32>
    %256 = vector.shape_cast %255 : vector<8xf32> to vector<8x1xf32>
    %257 = tpu.reciprocal %256 {approx = true} : vector<8x1xf32> -> vector<8x1xf32>
    %258 = vector.broadcast %257 : vector<8x1xf32> to vector<8x8xf32>
    %259 = arith.mulf %254, %258 : vector<8x8xf32>
    %260 = vector.extract_strided_slice %179 {offsets = [0, 24], sizes = [8, 8], strides = [1, 1]} : vector<8x32xf32> to vector<8x8xf32>
    %261 = arith.truncf %259 : vector<8x8xf32> to vector<8x8xbf16>
    %262 = arith.truncf %260 : vector<8x8xf32> to vector<8x8xbf16>
    %cst_96 = arith.constant dense<0.000000e+00> : vector<8x8xf32>
    %263 = tpu.matmul %261, %262, %cst_96 {dimension_numbers = #tpu.dot_dimension_numbers<[1], [0], [0], [1], [0, 0, 1, 1], [], []>} : vector<8x8xbf16>, vector<8x8xbf16>, vector<8x8xf32> -> vector<8x8xf32>
    %264 = tpu.concatenate %200, %221, %242, %263 in 1 : vector<8x8xf32>, vector<8x8xf32>, vector<8x8xf32>, vector<8x8xf32> -> vector<8x32xf32>
    %265 = arith.truncf %264 : vector<8x32xf32> to vector<8x32xbf16>
    %cst_97 = arith.constant dense<0.000000e+00> : vector<8x32xf32>
    %266 = tpu.matmul %265, %159, %cst_97 {dimension_numbers = #tpu.dot_dimension_numbers<[1], [0], [0], [1], [0, 0, 1, 1], [], []>} : vector<8x32xbf16>, vector<32x32xbf16>, vector<8x32xf32> -> vector<8x32xf32>
    %267 = vector.broadcast %161 : vector<1x32xf32> to vector<8x32xf32>
    %268 = arith.addf %266, %267 : vector<8x32xf32>
    %269 = arith.addf %268, %153 : vector<8x32xf32>
    %cst_98 = arith.constant dense<0.000000e+00> : vector<8xf32>
    %270 = vector.multi_reduction <add>, %269, %cst_98 [1] : vector<8x32xf32> to vector<8xf32>
    %271 = vector.shape_cast %270 : vector<8xf32> to vector<8x1xf32>
    %cst_99 = arith.constant 3.200000e+01 : f32
    %272 = vector.broadcast %cst_99 : f32 to vector<8x1xf32>
    %273 = arith.divf %271, %272 : vector<8x1xf32>
    %274 = vector.broadcast %273 : vector<8x1xf32> to vector<8x32xf32>
    %275 = arith.subf %269, %274 : vector<8x32xf32>
    %276 = arith.mulf %275, %275 : vector<8x32xf32>
    %cst_100 = arith.constant dense<0.000000e+00> : vector<8xf32>
    %277 = vector.multi_reduction <add>, %276, %cst_100 [1] : vector<8x32xf32> to vector<8xf32>
    %278 = vector.shape_cast %277 : vector<8xf32> to vector<8x1xf32>
    %cst_101 = arith.constant 3.200000e+01 : f32
    %279 = vector.broadcast %cst_101 : f32 to vector<8x1xf32>
    %280 = arith.divf %278, %279 : vector<8x1xf32>
    %281 = vector.broadcast %273 : vector<8x1xf32> to vector<8x32xf32>
    %282 = arith.subf %269, %281 : vector<8x32xf32>
    %cst_102 = arith.constant 9.99999974E-6 : f32
    %283 = vector.broadcast %cst_102 : f32 to vector<8x1xf32>
    %284 = arith.addf %280, %283 : vector<8x1xf32>
    %285 = math.rsqrt %284 : vector<8x1xf32>
    %286 = vector.broadcast %285 : vector<8x1xf32> to vector<8x32xf32>
    %287 = arith.mulf %282, %286 : vector<8x32xf32>
    %288 = vector.broadcast %163 : vector<1x32xf32> to vector<8x32xf32>
    %289 = arith.mulf %287, %288 : vector<8x32xf32>
    %290 = vector.broadcast %165 : vector<1x32xf32> to vector<8x32xf32>
    %291 = arith.addf %289, %290 : vector<8x32xf32>
    %c0_103 = arith.constant 0 : index
    %c0_104 = arith.constant 0 : index
    %c0_105 = arith.constant 0 : index
    %292 = vector.load %arg16[%c0_103, %c0_104, %c0_105] : memref<2x32x64xbf16, #tpu.memory_space<vmem>>, vector<1x32x64xbf16>
    %293 = vector.shape_cast %292 : vector<1x32x64xbf16> to vector<32x64xbf16>
    %c0_106 = arith.constant 0 : index
    %c0_107 = arith.constant 0 : index
    %c0_108 = arith.constant 0 : index
    %294 = vector.load %arg17[%c0_106, %c0_107, %c0_108] : memref<2x1x64xf32, #tpu.memory_space<vmem>>, vector<1x1x64xf32>
    %295 = vector.shape_cast %294 : vector<1x1x64xf32> to vector<1x64xf32>
    %c0_109 = arith.constant 0 : index
    %c0_110 = arith.constant 0 : index
    %c0_111 = arith.constant 0 : index
    %296 = vector.load %arg18[%c0_109, %c0_110, %c0_111] : memref<2x64x32xbf16, #tpu.memory_space<vmem>>, vector<1x64x32xbf16>
    %297 = vector.shape_cast %296 : vector<1x64x32xbf16> to vector<64x32xbf16>
    %c0_112 = arith.constant 0 : index
    %c0_113 = arith.constant 0 : index
    %c0_114 = arith.constant 0 : index
    %298 = vector.load %arg19[%c0_112, %c0_113, %c0_114] : memref<2x1x32xf32, #tpu.memory_space<vmem>>, vector<1x1x32xf32>
    %299 = vector.shape_cast %298 : vector<1x1x32xf32> to vector<1x32xf32>
    %c0_115 = arith.constant 0 : index
    %c0_116 = arith.constant 0 : index
    %c0_117 = arith.constant 0 : index
    %300 = vector.load %arg20[%c0_115, %c0_116, %c0_117] : memref<2x1x32xf32, #tpu.memory_space<vmem>>, vector<1x1x32xf32>
    %301 = vector.shape_cast %300 : vector<1x1x32xf32> to vector<1x32xf32>
    %c0_118 = arith.constant 0 : index
    %c0_119 = arith.constant 0 : index
    %c0_120 = arith.constant 0 : index
    %302 = vector.load %arg21[%c0_118, %c0_119, %c0_120] : memref<2x1x32xf32, #tpu.memory_space<vmem>>, vector<1x1x32xf32>
    %303 = vector.shape_cast %302 : vector<1x1x32xf32> to vector<1x32xf32>
    %304 = arith.truncf %291 : vector<8x32xf32> to vector<8x32xbf16>
    %cst_121 = arith.constant dense<0.000000e+00> : vector<8x64xf32>
    %305 = tpu.matmul %304, %293, %cst_121 {dimension_numbers = #tpu.dot_dimension_numbers<[1], [0], [0], [1], [0, 0, 1, 1], [], []>} : vector<8x32xbf16>, vector<32x64xbf16>, vector<8x64xf32> -> vector<8x64xf32>
    %306 = vector.broadcast %295 : vector<1x64xf32> to vector<8x64xf32>
    %307 = arith.addf %305, %306 : vector<8x64xf32>
    %cst_122 = arith.constant 0.000000e+00 : f32
    %308 = vector.broadcast %cst_122 : f32 to vector<8x64xf32>
    %309 = arith.maximumf %307, %308 : vector<8x64xf32>
    %310 = arith.truncf %309 : vector<8x64xf32> to vector<8x64xbf16>
    %cst_123 = arith.constant dense<0.000000e+00> : vector<8x32xf32>
    %311 = tpu.matmul %310, %297, %cst_123 {dimension_numbers = #tpu.dot_dimension_numbers<[1], [0], [0], [1], [0, 0, 1, 1], [], []>} : vector<8x64xbf16>, vector<64x32xbf16>, vector<8x32xf32> -> vector<8x32xf32>
    %312 = vector.broadcast %299 : vector<1x32xf32> to vector<8x32xf32>
    %313 = arith.addf %311, %312 : vector<8x32xf32>
    %314 = arith.addf %313, %291 : vector<8x32xf32>
    %cst_124 = arith.constant dense<0.000000e+00> : vector<8xf32>
    %315 = vector.multi_reduction <add>, %314, %cst_124 [1] : vector<8x32xf32> to vector<8xf32>
    %316 = vector.shape_cast %315 : vector<8xf32> to vector<8x1xf32>
    %cst_125 = arith.constant 3.200000e+01 : f32
    %317 = vector.broadcast %cst_125 : f32 to vector<8x1xf32>
    %318 = arith.divf %316, %317 : vector<8x1xf32>
    %319 = vector.broadcast %318 : vector<8x1xf32> to vector<8x32xf32>
    %320 = arith.subf %314, %319 : vector<8x32xf32>
    %321 = arith.mulf %320, %320 : vector<8x32xf32>
    %cst_126 = arith.constant dense<0.000000e+00> : vector<8xf32>
    %322 = vector.multi_reduction <add>, %321, %cst_126 [1] : vector<8x32xf32> to vector<8xf32>
    %323 = vector.shape_cast %322 : vector<8xf32> to vector<8x1xf32>
    %cst_127 = arith.constant 3.200000e+01 : f32
    %324 = vector.broadcast %cst_127 : f32 to vector<8x1xf32>
    %325 = arith.divf %323, %324 : vector<8x1xf32>
    %326 = vector.broadcast %318 : vector<8x1xf32> to vector<8x32xf32>
    %327 = arith.subf %314, %326 : vector<8x32xf32>
    %cst_128 = arith.constant 9.99999974E-6 : f32
    %328 = vector.broadcast %cst_128 : f32 to vector<8x1xf32>
    %329 = arith.addf %325, %328 : vector<8x1xf32>
    %330 = math.rsqrt %329 : vector<8x1xf32>
    %331 = vector.broadcast %330 : vector<8x1xf32> to vector<8x32xf32>
    %332 = arith.mulf %327, %331 : vector<8x32xf32>
    %333 = vector.broadcast %301 : vector<1x32xf32> to vector<8x32xf32>
    %334 = arith.mulf %332, %333 : vector<8x32xf32>
    %335 = vector.broadcast %303 : vector<1x32xf32> to vector<8x32xf32>
    %336 = arith.addf %334, %335 : vector<8x32xf32>
    %c1 = arith.constant 1 : index
    %c0_129 = arith.constant 0 : index
    %c0_130 = arith.constant 0 : index
    %337 = vector.load %arg4[%c1, %c0_129, %c0_130] : memref<2x32x96xbf16, #tpu.memory_space<vmem>>, vector<1x32x96xbf16>
    %338 = vector.shape_cast %337 : vector<1x32x96xbf16> to vector<32x96xbf16>
    %c1_131 = arith.constant 1 : index
    %c0_132 = arith.constant 0 : index
    %c0_133 = arith.constant 0 : index
    %339 = vector.load %arg5[%c1_131, %c0_132, %c0_133] : memref<2x1x96xf32, #tpu.memory_space<vmem>>, vector<1x1x96xf32>
    %340 = vector.shape_cast %339 : vector<1x1x96xf32> to vector<1x96xf32>
    %c1_134 = arith.constant 1 : index
    %c0_135 = arith.constant 0 : index
    %c0_136 = arith.constant 0 : index
    %341 = vector.load %arg6[%c1_134, %c0_135, %c0_136] : memref<2x32x32xbf16, #tpu.memory_space<vmem>>, vector<1x32x32xbf16>
    %342 = vector.shape_cast %341 : vector<1x32x32xbf16> to vector<32x32xbf16>
    %c1_137 = arith.constant 1 : index
    %c0_138 = arith.constant 0 : index
    %c0_139 = arith.constant 0 : index
    %343 = vector.load %arg7[%c1_137, %c0_138, %c0_139] : memref<2x1x32xf32, #tpu.memory_space<vmem>>, vector<1x1x32xf32>
    %344 = vector.shape_cast %343 : vector<1x1x32xf32> to vector<1x32xf32>
    %c1_140 = arith.constant 1 : index
    %c0_141 = arith.constant 0 : index
    %c0_142 = arith.constant 0 : index
    %345 = vector.load %arg8[%c1_140, %c0_141, %c0_142] : memref<2x1x32xf32, #tpu.memory_space<vmem>>, vector<1x1x32xf32>
    %346 = vector.shape_cast %345 : vector<1x1x32xf32> to vector<1x32xf32>
    %c1_143 = arith.constant 1 : index
    %c0_144 = arith.constant 0 : index
    %c0_145 = arith.constant 0 : index
    %347 = vector.load %arg9[%c1_143, %c0_144, %c0_145] : memref<2x1x32xf32, #tpu.memory_space<vmem>>, vector<1x1x32xf32>
    %348 = vector.shape_cast %347 : vector<1x1x32xf32> to vector<1x32xf32>
    %349 = arith.truncf %336 : vector<8x32xf32> to vector<8x32xbf16>
    %cst_146 = arith.constant dense<0.000000e+00> : vector<8x96xf32>
    %350 = tpu.matmul %349, %338, %cst_146 {dimension_numbers = #tpu.dot_dimension_numbers<[1], [0], [0], [1], [0, 0, 1, 1], [], []>} : vector<8x32xbf16>, vector<32x96xbf16>, vector<8x96xf32> -> vector<8x96xf32>
    %351 = vector.broadcast %340 : vector<1x96xf32> to vector<8x96xf32>
    %352 = arith.addf %350, %351 : vector<8x96xf32>
    %353 = vector.extract_strided_slice %352 {offsets = [0, 0], sizes = [8, 32], strides = [1, 1]} : vector<8x96xf32> to vector<8x32xf32>
    %354 = vector.extract_strided_slice %352 {offsets = [0, 32], sizes = [8, 32], strides = [1, 1]} : vector<8x96xf32> to vector<8x32xf32>
    %355 = vector.extract_strided_slice %352 {offsets = [0, 64], sizes = [8, 32], strides = [1, 1]} : vector<8x96xf32> to vector<8x32xf32>
    %356 = vector.extract_strided_slice %353 {offsets = [0, 0], sizes = [8, 8], strides = [1, 1]} : vector<8x32xf32> to vector<8x8xf32>
    %357 = vector.extract_strided_slice %354 {offsets = [0, 0], sizes = [8, 8], strides = [1, 1]} : vector<8x32xf32> to vector<8x8xf32>
    %358 = arith.truncf %356 : vector<8x8xf32> to vector<8x8xbf16>
    %359 = arith.truncf %357 : vector<8x8xf32> to vector<8x8xbf16>
    %cst_147 = arith.constant dense<0.000000e+00> : vector<8x8xf32>
    %360 = tpu.matmul %358, %359, %cst_147 {dimension_numbers = #tpu.dot_dimension_numbers<[1], [1], [0], [0], [0, 0, 1, 0], [], []>} : vector<8x8xbf16>, vector<8x8xbf16>, vector<8x8xf32> -> vector<8x8xf32>
    %cst_148 = arith.constant 0.353553385 : f32
    %361 = vector.broadcast %cst_148 : f32 to vector<8x8xf32>
    %362 = arith.mulf %360, %361 : vector<8x8xf32>
    %cst_149 = arith.constant -1.000000e+09 : f32
    %363 = vector.broadcast %cst_149 : f32 to vector<8x8xf32>
    %364 = arith.select %14, %362, %363 : vector<8x8xi1>, vector<8x8xf32>
    %cst_150 = arith.constant dense<0xFF800000> : vector<8xf32>
    %365 = vector.multi_reduction <maximumf>, %364, %cst_150 [1] : vector<8x8xf32> to vector<8xf32>
    %366 = vector.shape_cast %365 : vector<8xf32> to vector<8x1xf32>
    %367 = vector.broadcast %366 : vector<8x1xf32> to vector<8x8xf32>
    %368 = arith.subf %364, %367 : vector<8x8xf32>
    %369 = math.exp %368 : vector<8x8xf32>
    %cst_151 = arith.constant dense<0.000000e+00> : vector<8xf32>
    %370 = vector.multi_reduction <add>, %369, %cst_151 [1] : vector<8x8xf32> to vector<8xf32>
    %371 = vector.shape_cast %370 : vector<8xf32> to vector<8x1xf32>
    %372 = tpu.reciprocal %371 {approx = true} : vector<8x1xf32> -> vector<8x1xf32>
    %373 = vector.broadcast %372 : vector<8x1xf32> to vector<8x8xf32>
    %374 = arith.mulf %369, %373 : vector<8x8xf32>
    %375 = vector.extract_strided_slice %355 {offsets = [0, 0], sizes = [8, 8], strides = [1, 1]} : vector<8x32xf32> to vector<8x8xf32>
    %376 = arith.truncf %374 : vector<8x8xf32> to vector<8x8xbf16>
    %377 = arith.truncf %375 : vector<8x8xf32> to vector<8x8xbf16>
    %cst_152 = arith.constant dense<0.000000e+00> : vector<8x8xf32>
    %378 = tpu.matmul %376, %377, %cst_152 {dimension_numbers = #tpu.dot_dimension_numbers<[1], [0], [0], [1], [0, 0, 1, 1], [], []>} : vector<8x8xbf16>, vector<8x8xbf16>, vector<8x8xf32> -> vector<8x8xf32>
    %379 = vector.extract_strided_slice %353 {offsets = [0, 8], sizes = [8, 8], strides = [1, 1]} : vector<8x32xf32> to vector<8x8xf32>
    %380 = vector.extract_strided_slice %354 {offsets = [0, 8], sizes = [8, 8], strides = [1, 1]} : vector<8x32xf32> to vector<8x8xf32>
    %381 = arith.truncf %379 : vector<8x8xf32> to vector<8x8xbf16>
    %382 = arith.truncf %380 : vector<8x8xf32> to vector<8x8xbf16>
    %cst_153 = arith.constant dense<0.000000e+00> : vector<8x8xf32>
    %383 = tpu.matmul %381, %382, %cst_153 {dimension_numbers = #tpu.dot_dimension_numbers<[1], [1], [0], [0], [0, 0, 1, 0], [], []>} : vector<8x8xbf16>, vector<8x8xbf16>, vector<8x8xf32> -> vector<8x8xf32>
    %cst_154 = arith.constant 0.353553385 : f32
    %384 = vector.broadcast %cst_154 : f32 to vector<8x8xf32>
    %385 = arith.mulf %383, %384 : vector<8x8xf32>
    %cst_155 = arith.constant -1.000000e+09 : f32
    %386 = vector.broadcast %cst_155 : f32 to vector<8x8xf32>
    %387 = arith.select %14, %385, %386 : vector<8x8xi1>, vector<8x8xf32>
    %cst_156 = arith.constant dense<0xFF800000> : vector<8xf32>
    %388 = vector.multi_reduction <maximumf>, %387, %cst_156 [1] : vector<8x8xf32> to vector<8xf32>
    %389 = vector.shape_cast %388 : vector<8xf32> to vector<8x1xf32>
    %390 = vector.broadcast %389 : vector<8x1xf32> to vector<8x8xf32>
    %391 = arith.subf %387, %390 : vector<8x8xf32>
    %392 = math.exp %391 : vector<8x8xf32>
    %cst_157 = arith.constant dense<0.000000e+00> : vector<8xf32>
    %393 = vector.multi_reduction <add>, %392, %cst_157 [1] : vector<8x8xf32> to vector<8xf32>
    %394 = vector.shape_cast %393 : vector<8xf32> to vector<8x1xf32>
    %395 = tpu.reciprocal %394 {approx = true} : vector<8x1xf32> -> vector<8x1xf32>
    %396 = vector.broadcast %395 : vector<8x1xf32> to vector<8x8xf32>
    %397 = arith.mulf %392, %396 : vector<8x8xf32>
    %398 = vector.extract_strided_slice %355 {offsets = [0, 8], sizes = [8, 8], strides = [1, 1]} : vector<8x32xf32> to vector<8x8xf32>
    %399 = arith.truncf %397 : vector<8x8xf32> to vector<8x8xbf16>
    %400 = arith.truncf %398 : vector<8x8xf32> to vector<8x8xbf16>
    %cst_158 = arith.constant dense<0.000000e+00> : vector<8x8xf32>
    %401 = tpu.matmul %399, %400, %cst_158 {dimension_numbers = #tpu.dot_dimension_numbers<[1], [0], [0], [1], [0, 0, 1, 1], [], []>} : vector<8x8xbf16>, vector<8x8xbf16>, vector<8x8xf32> -> vector<8x8xf32>
    %402 = vector.extract_strided_slice %353 {offsets = [0, 16], sizes = [8, 8], strides = [1, 1]} : vector<8x32xf32> to vector<8x8xf32>
    %403 = vector.extract_strided_slice %354 {offsets = [0, 16], sizes = [8, 8], strides = [1, 1]} : vector<8x32xf32> to vector<8x8xf32>
    %404 = arith.truncf %402 : vector<8x8xf32> to vector<8x8xbf16>
    %405 = arith.truncf %403 : vector<8x8xf32> to vector<8x8xbf16>
    %cst_159 = arith.constant dense<0.000000e+00> : vector<8x8xf32>
    %406 = tpu.matmul %404, %405, %cst_159 {dimension_numbers = #tpu.dot_dimension_numbers<[1], [1], [0], [0], [0, 0, 1, 0], [], []>} : vector<8x8xbf16>, vector<8x8xbf16>, vector<8x8xf32> -> vector<8x8xf32>
    %cst_160 = arith.constant 0.353553385 : f32
    %407 = vector.broadcast %cst_160 : f32 to vector<8x8xf32>
    %408 = arith.mulf %406, %407 : vector<8x8xf32>
    %cst_161 = arith.constant -1.000000e+09 : f32
    %409 = vector.broadcast %cst_161 : f32 to vector<8x8xf32>
    %410 = arith.select %14, %408, %409 : vector<8x8xi1>, vector<8x8xf32>
    %cst_162 = arith.constant dense<0xFF800000> : vector<8xf32>
    %411 = vector.multi_reduction <maximumf>, %410, %cst_162 [1] : vector<8x8xf32> to vector<8xf32>
    %412 = vector.shape_cast %411 : vector<8xf32> to vector<8x1xf32>
    %413 = vector.broadcast %412 : vector<8x1xf32> to vector<8x8xf32>
    %414 = arith.subf %410, %413 : vector<8x8xf32>
    %415 = math.exp %414 : vector<8x8xf32>
    %cst_163 = arith.constant dense<0.000000e+00> : vector<8xf32>
    %416 = vector.multi_reduction <add>, %415, %cst_163 [1] : vector<8x8xf32> to vector<8xf32>
    %417 = vector.shape_cast %416 : vector<8xf32> to vector<8x1xf32>
    %418 = tpu.reciprocal %417 {approx = true} : vector<8x1xf32> -> vector<8x1xf32>
    %419 = vector.broadcast %418 : vector<8x1xf32> to vector<8x8xf32>
    %420 = arith.mulf %415, %419 : vector<8x8xf32>
    %421 = vector.extract_strided_slice %355 {offsets = [0, 16], sizes = [8, 8], strides = [1, 1]} : vector<8x32xf32> to vector<8x8xf32>
    %422 = arith.truncf %420 : vector<8x8xf32> to vector<8x8xbf16>
    %423 = arith.truncf %421 : vector<8x8xf32> to vector<8x8xbf16>
    %cst_164 = arith.constant dense<0.000000e+00> : vector<8x8xf32>
    %424 = tpu.matmul %422, %423, %cst_164 {dimension_numbers = #tpu.dot_dimension_numbers<[1], [0], [0], [1], [0, 0, 1, 1], [], []>} : vector<8x8xbf16>, vector<8x8xbf16>, vector<8x8xf32> -> vector<8x8xf32>
    %425 = vector.extract_strided_slice %353 {offsets = [0, 24], sizes = [8, 8], strides = [1, 1]} : vector<8x32xf32> to vector<8x8xf32>
    %426 = vector.extract_strided_slice %354 {offsets = [0, 24], sizes = [8, 8], strides = [1, 1]} : vector<8x32xf32> to vector<8x8xf32>
    %427 = arith.truncf %425 : vector<8x8xf32> to vector<8x8xbf16>
    %428 = arith.truncf %426 : vector<8x8xf32> to vector<8x8xbf16>
    %cst_165 = arith.constant dense<0.000000e+00> : vector<8x8xf32>
    %429 = tpu.matmul %427, %428, %cst_165 {dimension_numbers = #tpu.dot_dimension_numbers<[1], [1], [0], [0], [0, 0, 1, 0], [], []>} : vector<8x8xbf16>, vector<8x8xbf16>, vector<8x8xf32> -> vector<8x8xf32>
    %cst_166 = arith.constant 0.353553385 : f32
    %430 = vector.broadcast %cst_166 : f32 to vector<8x8xf32>
    %431 = arith.mulf %429, %430 : vector<8x8xf32>
    %cst_167 = arith.constant -1.000000e+09 : f32
    %432 = vector.broadcast %cst_167 : f32 to vector<8x8xf32>
    %433 = arith.select %14, %431, %432 : vector<8x8xi1>, vector<8x8xf32>
    %cst_168 = arith.constant dense<0xFF800000> : vector<8xf32>
    %434 = vector.multi_reduction <maximumf>, %433, %cst_168 [1] : vector<8x8xf32> to vector<8xf32>
    %435 = vector.shape_cast %434 : vector<8xf32> to vector<8x1xf32>
    %436 = vector.broadcast %435 : vector<8x1xf32> to vector<8x8xf32>
    %437 = arith.subf %433, %436 : vector<8x8xf32>
    %438 = math.exp %437 : vector<8x8xf32>
    %cst_169 = arith.constant dense<0.000000e+00> : vector<8xf32>
    %439 = vector.multi_reduction <add>, %438, %cst_169 [1] : vector<8x8xf32> to vector<8xf32>
    %440 = vector.shape_cast %439 : vector<8xf32> to vector<8x1xf32>
    %441 = tpu.reciprocal %440 {approx = true} : vector<8x1xf32> -> vector<8x1xf32>
    %442 = vector.broadcast %441 : vector<8x1xf32> to vector<8x8xf32>
    %443 = arith.mulf %438, %442 : vector<8x8xf32>
    %444 = vector.extract_strided_slice %355 {offsets = [0, 24], sizes = [8, 8], strides = [1, 1]} : vector<8x32xf32> to vector<8x8xf32>
    %445 = arith.truncf %443 : vector<8x8xf32> to vector<8x8xbf16>
    %446 = arith.truncf %444 : vector<8x8xf32> to vector<8x8xbf16>
    %cst_170 = arith.constant dense<0.000000e+00> : vector<8x8xf32>
    %447 = tpu.matmul %445, %446, %cst_170 {dimension_numbers = #tpu.dot_dimension_numbers<[1], [0], [0], [1], [0, 0, 1, 1], [], []>} : vector<8x8xbf16>, vector<8x8xbf16>, vector<8x8xf32> -> vector<8x8xf32>
    %448 = tpu.concatenate %378, %401, %424, %447 in 1 : vector<8x8xf32>, vector<8x8xf32>, vector<8x8xf32>, vector<8x8xf32> -> vector<8x32xf32>
    %449 = arith.truncf %448 : vector<8x32xf32> to vector<8x32xbf16>
    %cst_171 = arith.constant dense<0.000000e+00> : vector<8x32xf32>
    %450 = tpu.matmul %449, %342, %cst_171 {dimension_numbers = #tpu.dot_dimension_numbers<[1], [0], [0], [1], [0, 0, 1, 1], [], []>} : vector<8x32xbf16>, vector<32x32xbf16>, vector<8x32xf32> -> vector<8x32xf32>
    %451 = vector.broadcast %344 : vector<1x32xf32> to vector<8x32xf32>
    %452 = arith.addf %450, %451 : vector<8x32xf32>
    %453 = arith.addf %452, %336 : vector<8x32xf32>
    %cst_172 = arith.constant dense<0.000000e+00> : vector<8xf32>
    %454 = vector.multi_reduction <add>, %453, %cst_172 [1] : vector<8x32xf32> to vector<8xf32>
    %455 = vector.shape_cast %454 : vector<8xf32> to vector<8x1xf32>
    %cst_173 = arith.constant 3.200000e+01 : f32
    %456 = vector.broadcast %cst_173 : f32 to vector<8x1xf32>
    %457 = arith.divf %455, %456 : vector<8x1xf32>
    %458 = vector.broadcast %457 : vector<8x1xf32> to vector<8x32xf32>
    %459 = arith.subf %453, %458 : vector<8x32xf32>
    %460 = arith.mulf %459, %459 : vector<8x32xf32>
    %cst_174 = arith.constant dense<0.000000e+00> : vector<8xf32>
    %461 = vector.multi_reduction <add>, %460, %cst_174 [1] : vector<8x32xf32> to vector<8xf32>
    %462 = vector.shape_cast %461 : vector<8xf32> to vector<8x1xf32>
    %cst_175 = arith.constant 3.200000e+01 : f32
    %463 = vector.broadcast %cst_175 : f32 to vector<8x1xf32>
    %464 = arith.divf %462, %463 : vector<8x1xf32>
    %465 = vector.broadcast %457 : vector<8x1xf32> to vector<8x32xf32>
    %466 = arith.subf %453, %465 : vector<8x32xf32>
    %cst_176 = arith.constant 9.99999974E-6 : f32
    %467 = vector.broadcast %cst_176 : f32 to vector<8x1xf32>
    %468 = arith.addf %464, %467 : vector<8x1xf32>
    %469 = math.rsqrt %468 : vector<8x1xf32>
    %470 = vector.broadcast %469 : vector<8x1xf32> to vector<8x32xf32>
    %471 = arith.mulf %466, %470 : vector<8x32xf32>
    %472 = vector.broadcast %346 : vector<1x32xf32> to vector<8x32xf32>
    %473 = arith.mulf %471, %472 : vector<8x32xf32>
    %474 = vector.broadcast %348 : vector<1x32xf32> to vector<8x32xf32>
    %475 = arith.addf %473, %474 : vector<8x32xf32>
    %c1_177 = arith.constant 1 : index
    %c0_178 = arith.constant 0 : index
    %c0_179 = arith.constant 0 : index
    %476 = vector.load %arg10[%c1_177, %c0_178, %c0_179] : memref<2x32x96xbf16, #tpu.memory_space<vmem>>, vector<1x32x96xbf16>
    %477 = vector.shape_cast %476 : vector<1x32x96xbf16> to vector<32x96xbf16>
    %c1_180 = arith.constant 1 : index
    %c0_181 = arith.constant 0 : index
    %c0_182 = arith.constant 0 : index
    %478 = vector.load %arg11[%c1_180, %c0_181, %c0_182] : memref<2x1x96xf32, #tpu.memory_space<vmem>>, vector<1x1x96xf32>
    %479 = vector.shape_cast %478 : vector<1x1x96xf32> to vector<1x96xf32>
    %c1_183 = arith.constant 1 : index
    %c0_184 = arith.constant 0 : index
    %c0_185 = arith.constant 0 : index
    %480 = vector.load %arg12[%c1_183, %c0_184, %c0_185] : memref<2x32x32xbf16, #tpu.memory_space<vmem>>, vector<1x32x32xbf16>
    %481 = vector.shape_cast %480 : vector<1x32x32xbf16> to vector<32x32xbf16>
    %c1_186 = arith.constant 1 : index
    %c0_187 = arith.constant 0 : index
    %c0_188 = arith.constant 0 : index
    %482 = vector.load %arg13[%c1_186, %c0_187, %c0_188] : memref<2x1x32xf32, #tpu.memory_space<vmem>>, vector<1x1x32xf32>
    %483 = vector.shape_cast %482 : vector<1x1x32xf32> to vector<1x32xf32>
    %c1_189 = arith.constant 1 : index
    %c0_190 = arith.constant 0 : index
    %c0_191 = arith.constant 0 : index
    %484 = vector.load %arg14[%c1_189, %c0_190, %c0_191] : memref<2x1x32xf32, #tpu.memory_space<vmem>>, vector<1x1x32xf32>
    %485 = vector.shape_cast %484 : vector<1x1x32xf32> to vector<1x32xf32>
    %c1_192 = arith.constant 1 : index
    %c0_193 = arith.constant 0 : index
    %c0_194 = arith.constant 0 : index
    %486 = vector.load %arg15[%c1_192, %c0_193, %c0_194] : memref<2x1x32xf32, #tpu.memory_space<vmem>>, vector<1x1x32xf32>
    %487 = vector.shape_cast %486 : vector<1x1x32xf32> to vector<1x32xf32>
    %488 = vector.extract_strided_slice %477 {offsets = [0, 0], sizes = [32, 32], strides = [1, 1]} : vector<32x96xbf16> to vector<32x32xbf16>
    %489 = arith.truncf %475 : vector<8x32xf32> to vector<8x32xbf16>
    %cst_195 = arith.constant dense<0.000000e+00> : vector<8x32xf32>
    %490 = tpu.matmul %489, %488, %cst_195 {dimension_numbers = #tpu.dot_dimension_numbers<[1], [0], [0], [1], [0, 0, 1, 1], [], []>} : vector<8x32xbf16>, vector<32x32xbf16>, vector<8x32xf32> -> vector<8x32xf32>
    %491 = vector.extract_strided_slice %479 {offsets = [0, 0], sizes = [1, 32], strides = [1, 1]} : vector<1x96xf32> to vector<1x32xf32>
    %492 = vector.broadcast %491 : vector<1x32xf32> to vector<8x32xf32>
    %493 = arith.addf %490, %492 : vector<8x32xf32>
    %494 = vector.extract_strided_slice %477 {offsets = [0, 32], sizes = [32, 64], strides = [1, 1]} : vector<32x96xbf16> to vector<32x64xbf16>
    %495 = arith.truncf %3 : vector<8x32xf32> to vector<8x32xbf16>
    %cst_196 = arith.constant dense<0.000000e+00> : vector<8x64xf32>
    %496 = tpu.matmul %495, %494, %cst_196 {dimension_numbers = #tpu.dot_dimension_numbers<[1], [0], [0], [1], [0, 0, 1, 1], [], []>} : vector<8x32xbf16>, vector<32x64xbf16>, vector<8x64xf32> -> vector<8x64xf32>
    %497 = vector.extract_strided_slice %479 {offsets = [0, 32], sizes = [1, 64], strides = [1, 1]} : vector<1x96xf32> to vector<1x64xf32>
    %498 = vector.broadcast %497 : vector<1x64xf32> to vector<8x64xf32>
    %499 = arith.addf %496, %498 : vector<8x64xf32>
    %500 = vector.extract_strided_slice %499 {offsets = [0, 0], sizes = [8, 32], strides = [1, 1]} : vector<8x64xf32> to vector<8x32xf32>
    %501 = vector.extract_strided_slice %499 {offsets = [0, 32], sizes = [8, 32], strides = [1, 1]} : vector<8x64xf32> to vector<8x32xf32>
    %502 = vector.extract_strided_slice %493 {offsets = [0, 0], sizes = [8, 8], strides = [1, 1]} : vector<8x32xf32> to vector<8x8xf32>
    %503 = vector.extract_strided_slice %500 {offsets = [0, 0], sizes = [8, 8], strides = [1, 1]} : vector<8x32xf32> to vector<8x8xf32>
    %504 = arith.truncf %502 : vector<8x8xf32> to vector<8x8xbf16>
    %505 = arith.truncf %503 : vector<8x8xf32> to vector<8x8xbf16>
    %cst_197 = arith.constant dense<0.000000e+00> : vector<8x8xf32>
    %506 = tpu.matmul %504, %505, %cst_197 {dimension_numbers = #tpu.dot_dimension_numbers<[1], [1], [0], [0], [0, 0, 1, 0], [], []>} : vector<8x8xbf16>, vector<8x8xbf16>, vector<8x8xf32> -> vector<8x8xf32>
    %cst_198 = arith.constant 0.353553385 : f32
    %507 = vector.broadcast %cst_198 : f32 to vector<8x8xf32>
    %508 = arith.mulf %506, %507 : vector<8x8xf32>
    %cst_199 = arith.constant dense<0xFF800000> : vector<8xf32>
    %509 = vector.multi_reduction <maximumf>, %508, %cst_199 [1] : vector<8x8xf32> to vector<8xf32>
    %510 = vector.shape_cast %509 : vector<8xf32> to vector<8x1xf32>
    %511 = vector.broadcast %510 : vector<8x1xf32> to vector<8x8xf32>
    %512 = arith.subf %508, %511 : vector<8x8xf32>
    %513 = math.exp %512 : vector<8x8xf32>
    %cst_200 = arith.constant dense<0.000000e+00> : vector<8xf32>
    %514 = vector.multi_reduction <add>, %513, %cst_200 [1] : vector<8x8xf32> to vector<8xf32>
    %515 = vector.shape_cast %514 : vector<8xf32> to vector<8x1xf32>
    %516 = tpu.reciprocal %515 {approx = true} : vector<8x1xf32> -> vector<8x1xf32>
    %517 = vector.broadcast %516 : vector<8x1xf32> to vector<8x8xf32>
    %518 = arith.mulf %513, %517 : vector<8x8xf32>
    %519 = vector.extract_strided_slice %501 {offsets = [0, 0], sizes = [8, 8], strides = [1, 1]} : vector<8x32xf32> to vector<8x8xf32>
    %520 = arith.truncf %518 : vector<8x8xf32> to vector<8x8xbf16>
    %521 = arith.truncf %519 : vector<8x8xf32> to vector<8x8xbf16>
    %cst_201 = arith.constant dense<0.000000e+00> : vector<8x8xf32>
    %522 = tpu.matmul %520, %521, %cst_201 {dimension_numbers = #tpu.dot_dimension_numbers<[1], [0], [0], [1], [0, 0, 1, 1], [], []>} : vector<8x8xbf16>, vector<8x8xbf16>, vector<8x8xf32> -> vector<8x8xf32>
    %523 = vector.extract_strided_slice %493 {offsets = [0, 8], sizes = [8, 8], strides = [1, 1]} : vector<8x32xf32> to vector<8x8xf32>
    %524 = vector.extract_strided_slice %500 {offsets = [0, 8], sizes = [8, 8], strides = [1, 1]} : vector<8x32xf32> to vector<8x8xf32>
    %525 = arith.truncf %523 : vector<8x8xf32> to vector<8x8xbf16>
    %526 = arith.truncf %524 : vector<8x8xf32> to vector<8x8xbf16>
    %cst_202 = arith.constant dense<0.000000e+00> : vector<8x8xf32>
    %527 = tpu.matmul %525, %526, %cst_202 {dimension_numbers = #tpu.dot_dimension_numbers<[1], [1], [0], [0], [0, 0, 1, 0], [], []>} : vector<8x8xbf16>, vector<8x8xbf16>, vector<8x8xf32> -> vector<8x8xf32>
    %cst_203 = arith.constant 0.353553385 : f32
    %528 = vector.broadcast %cst_203 : f32 to vector<8x8xf32>
    %529 = arith.mulf %527, %528 : vector<8x8xf32>
    %cst_204 = arith.constant dense<0xFF800000> : vector<8xf32>
    %530 = vector.multi_reduction <maximumf>, %529, %cst_204 [1] : vector<8x8xf32> to vector<8xf32>
    %531 = vector.shape_cast %530 : vector<8xf32> to vector<8x1xf32>
    %532 = vector.broadcast %531 : vector<8x1xf32> to vector<8x8xf32>
    %533 = arith.subf %529, %532 : vector<8x8xf32>
    %534 = math.exp %533 : vector<8x8xf32>
    %cst_205 = arith.constant dense<0.000000e+00> : vector<8xf32>
    %535 = vector.multi_reduction <add>, %534, %cst_205 [1] : vector<8x8xf32> to vector<8xf32>
    %536 = vector.shape_cast %535 : vector<8xf32> to vector<8x1xf32>
    %537 = tpu.reciprocal %536 {approx = true} : vector<8x1xf32> -> vector<8x1xf32>
    %538 = vector.broadcast %537 : vector<8x1xf32> to vector<8x8xf32>
    %539 = arith.mulf %534, %538 : vector<8x8xf32>
    %540 = vector.extract_strided_slice %501 {offsets = [0, 8], sizes = [8, 8], strides = [1, 1]} : vector<8x32xf32> to vector<8x8xf32>
    %541 = arith.truncf %539 : vector<8x8xf32> to vector<8x8xbf16>
    %542 = arith.truncf %540 : vector<8x8xf32> to vector<8x8xbf16>
    %cst_206 = arith.constant dense<0.000000e+00> : vector<8x8xf32>
    %543 = tpu.matmul %541, %542, %cst_206 {dimension_numbers = #tpu.dot_dimension_numbers<[1], [0], [0], [1], [0, 0, 1, 1], [], []>} : vector<8x8xbf16>, vector<8x8xbf16>, vector<8x8xf32> -> vector<8x8xf32>
    %544 = vector.extract_strided_slice %493 {offsets = [0, 16], sizes = [8, 8], strides = [1, 1]} : vector<8x32xf32> to vector<8x8xf32>
    %545 = vector.extract_strided_slice %500 {offsets = [0, 16], sizes = [8, 8], strides = [1, 1]} : vector<8x32xf32> to vector<8x8xf32>
    %546 = arith.truncf %544 : vector<8x8xf32> to vector<8x8xbf16>
    %547 = arith.truncf %545 : vector<8x8xf32> to vector<8x8xbf16>
    %cst_207 = arith.constant dense<0.000000e+00> : vector<8x8xf32>
    %548 = tpu.matmul %546, %547, %cst_207 {dimension_numbers = #tpu.dot_dimension_numbers<[1], [1], [0], [0], [0, 0, 1, 0], [], []>} : vector<8x8xbf16>, vector<8x8xbf16>, vector<8x8xf32> -> vector<8x8xf32>
    %cst_208 = arith.constant 0.353553385 : f32
    %549 = vector.broadcast %cst_208 : f32 to vector<8x8xf32>
    %550 = arith.mulf %548, %549 : vector<8x8xf32>
    %cst_209 = arith.constant dense<0xFF800000> : vector<8xf32>
    %551 = vector.multi_reduction <maximumf>, %550, %cst_209 [1] : vector<8x8xf32> to vector<8xf32>
    %552 = vector.shape_cast %551 : vector<8xf32> to vector<8x1xf32>
    %553 = vector.broadcast %552 : vector<8x1xf32> to vector<8x8xf32>
    %554 = arith.subf %550, %553 : vector<8x8xf32>
    %555 = math.exp %554 : vector<8x8xf32>
    %cst_210 = arith.constant dense<0.000000e+00> : vector<8xf32>
    %556 = vector.multi_reduction <add>, %555, %cst_210 [1] : vector<8x8xf32> to vector<8xf32>
    %557 = vector.shape_cast %556 : vector<8xf32> to vector<8x1xf32>
    %558 = tpu.reciprocal %557 {approx = true} : vector<8x1xf32> -> vector<8x1xf32>
    %559 = vector.broadcast %558 : vector<8x1xf32> to vector<8x8xf32>
    %560 = arith.mulf %555, %559 : vector<8x8xf32>
    %561 = vector.extract_strided_slice %501 {offsets = [0, 16], sizes = [8, 8], strides = [1, 1]} : vector<8x32xf32> to vector<8x8xf32>
    %562 = arith.truncf %560 : vector<8x8xf32> to vector<8x8xbf16>
    %563 = arith.truncf %561 : vector<8x8xf32> to vector<8x8xbf16>
    %cst_211 = arith.constant dense<0.000000e+00> : vector<8x8xf32>
    %564 = tpu.matmul %562, %563, %cst_211 {dimension_numbers = #tpu.dot_dimension_numbers<[1], [0], [0], [1], [0, 0, 1, 1], [], []>} : vector<8x8xbf16>, vector<8x8xbf16>, vector<8x8xf32> -> vector<8x8xf32>
    %565 = vector.extract_strided_slice %493 {offsets = [0, 24], sizes = [8, 8], strides = [1, 1]} : vector<8x32xf32> to vector<8x8xf32>
    %566 = vector.extract_strided_slice %500 {offsets = [0, 24], sizes = [8, 8], strides = [1, 1]} : vector<8x32xf32> to vector<8x8xf32>
    %567 = arith.truncf %565 : vector<8x8xf32> to vector<8x8xbf16>
    %568 = arith.truncf %566 : vector<8x8xf32> to vector<8x8xbf16>
    %cst_212 = arith.constant dense<0.000000e+00> : vector<8x8xf32>
    %569 = tpu.matmul %567, %568, %cst_212 {dimension_numbers = #tpu.dot_dimension_numbers<[1], [1], [0], [0], [0, 0, 1, 0], [], []>} : vector<8x8xbf16>, vector<8x8xbf16>, vector<8x8xf32> -> vector<8x8xf32>
    %cst_213 = arith.constant 0.353553385 : f32
    %570 = vector.broadcast %cst_213 : f32 to vector<8x8xf32>
    %571 = arith.mulf %569, %570 : vector<8x8xf32>
    %cst_214 = arith.constant dense<0xFF800000> : vector<8xf32>
    %572 = vector.multi_reduction <maximumf>, %571, %cst_214 [1] : vector<8x8xf32> to vector<8xf32>
    %573 = vector.shape_cast %572 : vector<8xf32> to vector<8x1xf32>
    %574 = vector.broadcast %573 : vector<8x1xf32> to vector<8x8xf32>
    %575 = arith.subf %571, %574 : vector<8x8xf32>
    %576 = math.exp %575 : vector<8x8xf32>
    %cst_215 = arith.constant dense<0.000000e+00> : vector<8xf32>
    %577 = vector.multi_reduction <add>, %576, %cst_215 [1] : vector<8x8xf32> to vector<8xf32>
    %578 = vector.shape_cast %577 : vector<8xf32> to vector<8x1xf32>
    %579 = tpu.reciprocal %578 {approx = true} : vector<8x1xf32> -> vector<8x1xf32>
    %580 = vector.broadcast %579 : vector<8x1xf32> to vector<8x8xf32>
    %581 = arith.mulf %576, %580 : vector<8x8xf32>
    %582 = vector.extract_strided_slice %501 {offsets = [0, 24], sizes = [8, 8], strides = [1, 1]} : vector<8x32xf32> to vector<8x8xf32>
    %583 = arith.truncf %581 : vector<8x8xf32> to vector<8x8xbf16>
    %584 = arith.truncf %582 : vector<8x8xf32> to vector<8x8xbf16>
    %cst_216 = arith.constant dense<0.000000e+00> : vector<8x8xf32>
    %585 = tpu.matmul %583, %584, %cst_216 {dimension_numbers = #tpu.dot_dimension_numbers<[1], [0], [0], [1], [0, 0, 1, 1], [], []>} : vector<8x8xbf16>, vector<8x8xbf16>, vector<8x8xf32> -> vector<8x8xf32>
    %586 = tpu.concatenate %522, %543, %564, %585 in 1 : vector<8x8xf32>, vector<8x8xf32>, vector<8x8xf32>, vector<8x8xf32> -> vector<8x32xf32>
    %587 = arith.truncf %586 : vector<8x32xf32> to vector<8x32xbf16>
    %cst_217 = arith.constant dense<0.000000e+00> : vector<8x32xf32>
    %588 = tpu.matmul %587, %481, %cst_217 {dimension_numbers = #tpu.dot_dimension_numbers<[1], [0], [0], [1], [0, 0, 1, 1], [], []>} : vector<8x32xbf16>, vector<32x32xbf16>, vector<8x32xf32> -> vector<8x32xf32>
    %589 = vector.broadcast %483 : vector<1x32xf32> to vector<8x32xf32>
    %590 = arith.addf %588, %589 : vector<8x32xf32>
    %591 = arith.addf %590, %475 : vector<8x32xf32>
    %cst_218 = arith.constant dense<0.000000e+00> : vector<8xf32>
    %592 = vector.multi_reduction <add>, %591, %cst_218 [1] : vector<8x32xf32> to vector<8xf32>
    %593 = vector.shape_cast %592 : vector<8xf32> to vector<8x1xf32>
    %cst_219 = arith.constant 3.200000e+01 : f32
    %594 = vector.broadcast %cst_219 : f32 to vector<8x1xf32>
    %595 = arith.divf %593, %594 : vector<8x1xf32>
    %596 = vector.broadcast %595 : vector<8x1xf32> to vector<8x32xf32>
    %597 = arith.subf %591, %596 : vector<8x32xf32>
    %598 = arith.mulf %597, %597 : vector<8x32xf32>
    %cst_220 = arith.constant dense<0.000000e+00> : vector<8xf32>
    %599 = vector.multi_reduction <add>, %598, %cst_220 [1] : vector<8x32xf32> to vector<8xf32>
    %600 = vector.shape_cast %599 : vector<8xf32> to vector<8x1xf32>
    %cst_221 = arith.constant 3.200000e+01 : f32
    %601 = vector.broadcast %cst_221 : f32 to vector<8x1xf32>
    %602 = arith.divf %600, %601 : vector<8x1xf32>
    %603 = vector.broadcast %595 : vector<8x1xf32> to vector<8x32xf32>
    %604 = arith.subf %591, %603 : vector<8x32xf32>
    %cst_222 = arith.constant 9.99999974E-6 : f32
    %605 = vector.broadcast %cst_222 : f32 to vector<8x1xf32>
    %606 = arith.addf %602, %605 : vector<8x1xf32>
    %607 = math.rsqrt %606 : vector<8x1xf32>
    %608 = vector.broadcast %607 : vector<8x1xf32> to vector<8x32xf32>
    %609 = arith.mulf %604, %608 : vector<8x32xf32>
    %610 = vector.broadcast %485 : vector<1x32xf32> to vector<8x32xf32>
    %611 = arith.mulf %609, %610 : vector<8x32xf32>
    %612 = vector.broadcast %487 : vector<1x32xf32> to vector<8x32xf32>
    %613 = arith.addf %611, %612 : vector<8x32xf32>
    %c1_223 = arith.constant 1 : index
    %c0_224 = arith.constant 0 : index
    %c0_225 = arith.constant 0 : index
    %614 = vector.load %arg16[%c1_223, %c0_224, %c0_225] : memref<2x32x64xbf16, #tpu.memory_space<vmem>>, vector<1x32x64xbf16>
    %615 = vector.shape_cast %614 : vector<1x32x64xbf16> to vector<32x64xbf16>
    %c1_226 = arith.constant 1 : index
    %c0_227 = arith.constant 0 : index
    %c0_228 = arith.constant 0 : index
    %616 = vector.load %arg17[%c1_226, %c0_227, %c0_228] : memref<2x1x64xf32, #tpu.memory_space<vmem>>, vector<1x1x64xf32>
    %617 = vector.shape_cast %616 : vector<1x1x64xf32> to vector<1x64xf32>
    %c1_229 = arith.constant 1 : index
    %c0_230 = arith.constant 0 : index
    %c0_231 = arith.constant 0 : index
    %618 = vector.load %arg18[%c1_229, %c0_230, %c0_231] : memref<2x64x32xbf16, #tpu.memory_space<vmem>>, vector<1x64x32xbf16>
    %619 = vector.shape_cast %618 : vector<1x64x32xbf16> to vector<64x32xbf16>
    %c1_232 = arith.constant 1 : index
    %c0_233 = arith.constant 0 : index
    %c0_234 = arith.constant 0 : index
    %620 = vector.load %arg19[%c1_232, %c0_233, %c0_234] : memref<2x1x32xf32, #tpu.memory_space<vmem>>, vector<1x1x32xf32>
    %621 = vector.shape_cast %620 : vector<1x1x32xf32> to vector<1x32xf32>
    %c1_235 = arith.constant 1 : index
    %c0_236 = arith.constant 0 : index
    %c0_237 = arith.constant 0 : index
    %622 = vector.load %arg20[%c1_235, %c0_236, %c0_237] : memref<2x1x32xf32, #tpu.memory_space<vmem>>, vector<1x1x32xf32>
    %623 = vector.shape_cast %622 : vector<1x1x32xf32> to vector<1x32xf32>
    %c1_238 = arith.constant 1 : index
    %c0_239 = arith.constant 0 : index
    %c0_240 = arith.constant 0 : index
    %624 = vector.load %arg21[%c1_238, %c0_239, %c0_240] : memref<2x1x32xf32, #tpu.memory_space<vmem>>, vector<1x1x32xf32>
    %625 = vector.shape_cast %624 : vector<1x1x32xf32> to vector<1x32xf32>
    %626 = arith.truncf %613 : vector<8x32xf32> to vector<8x32xbf16>
    %cst_241 = arith.constant dense<0.000000e+00> : vector<8x64xf32>
    %627 = tpu.matmul %626, %615, %cst_241 {dimension_numbers = #tpu.dot_dimension_numbers<[1], [0], [0], [1], [0, 0, 1, 1], [], []>} : vector<8x32xbf16>, vector<32x64xbf16>, vector<8x64xf32> -> vector<8x64xf32>
    %628 = vector.broadcast %617 : vector<1x64xf32> to vector<8x64xf32>
    %629 = arith.addf %627, %628 : vector<8x64xf32>
    %cst_242 = arith.constant 0.000000e+00 : f32
    %630 = vector.broadcast %cst_242 : f32 to vector<8x64xf32>
    %631 = arith.maximumf %629, %630 : vector<8x64xf32>
    %632 = arith.truncf %631 : vector<8x64xf32> to vector<8x64xbf16>
    %cst_243 = arith.constant dense<0.000000e+00> : vector<8x32xf32>
    %633 = tpu.matmul %632, %619, %cst_243 {dimension_numbers = #tpu.dot_dimension_numbers<[1], [0], [0], [1], [0, 0, 1, 1], [], []>} : vector<8x64xbf16>, vector<64x32xbf16>, vector<8x32xf32> -> vector<8x32xf32>
    %634 = vector.broadcast %621 : vector<1x32xf32> to vector<8x32xf32>
    %635 = arith.addf %633, %634 : vector<8x32xf32>
    %636 = arith.addf %635, %613 : vector<8x32xf32>
    %cst_244 = arith.constant dense<0.000000e+00> : vector<8xf32>
    %637 = vector.multi_reduction <add>, %636, %cst_244 [1] : vector<8x32xf32> to vector<8xf32>
    %638 = vector.shape_cast %637 : vector<8xf32> to vector<8x1xf32>
    %cst_245 = arith.constant 3.200000e+01 : f32
    %639 = vector.broadcast %cst_245 : f32 to vector<8x1xf32>
    %640 = arith.divf %638, %639 : vector<8x1xf32>
    %641 = vector.broadcast %640 : vector<8x1xf32> to vector<8x32xf32>
    %642 = arith.subf %636, %641 : vector<8x32xf32>
    %643 = arith.mulf %642, %642 : vector<8x32xf32>
    %cst_246 = arith.constant dense<0.000000e+00> : vector<8xf32>
    %644 = vector.multi_reduction <add>, %643, %cst_246 [1] : vector<8x32xf32> to vector<8xf32>
    %645 = vector.shape_cast %644 : vector<8xf32> to vector<8x1xf32>
    %cst_247 = arith.constant 3.200000e+01 : f32
    %646 = vector.broadcast %cst_247 : f32 to vector<8x1xf32>
    %647 = arith.divf %645, %646 : vector<8x1xf32>
    %648 = vector.broadcast %640 : vector<8x1xf32> to vector<8x32xf32>
    %649 = arith.subf %636, %648 : vector<8x32xf32>
    %cst_248 = arith.constant 9.99999974E-6 : f32
    %650 = vector.broadcast %cst_248 : f32 to vector<8x1xf32>
    %651 = arith.addf %647, %650 : vector<8x1xf32>
    %652 = math.rsqrt %651 : vector<8x1xf32>
    %653 = vector.broadcast %652 : vector<8x1xf32> to vector<8x32xf32>
    %654 = arith.mulf %649, %653 : vector<8x32xf32>
    %655 = vector.broadcast %623 : vector<1x32xf32> to vector<8x32xf32>
    %656 = arith.mulf %654, %655 : vector<8x32xf32>
    %657 = vector.broadcast %625 : vector<1x32xf32> to vector<8x32xf32>
    %658 = arith.addf %656, %657 : vector<8x32xf32>
    %c0_249 = arith.constant 0 : index
    %c0_250 = arith.constant 0 : index
    %c0_251 = arith.constant 0 : index
    %659 = vector.load %arg22[%c0_249, %c0_250, %c0_251] : memref<1x8x32xf32, #tpu.memory_space<vmem>>, vector<1x8x32xf32>
    %660 = vector.shape_cast %659 : vector<1x8x32xf32> to vector<8x32xf32>
    %661 = vector.shape_cast %658 : vector<8x32xf32> to vector<1x8x32xf32>
    tpu.vector_store %arg22[%c0_249, %c0_250, %c0_251], %661 {strides = array<i32>} : memref<1x8x32xf32, #tpu.memory_space<vmem>>, vector<1x8x32xf32>,
    return
  }
  func.func @transform_0(%arg0: i32) -> (i32, i32, i32) {
    %c0_i32 = arith.constant 0 : i32
    %c0_i32_0 = arith.constant 0 : i32
    %c0_i32_1 = arith.constant 0 : i32
    return %arg0, %c0_i32, %c0_i32_0 : i32, i32, i32
  }
  func.func @transform_1(%arg0: i32) -> (i32, i32, i32) {
    %c0_i32 = arith.constant 0 : i32
    %c0_i32_0 = arith.constant 0 : i32
    %c0_i32_1 = arith.constant 0 : i32
    return %arg0, %c0_i32, %c0_i32_0 : i32, i32, i32
  }
  func.func @transform_2(%arg0: i32) -> (i32, i32, i32) {
    %c0_i32 = arith.constant 0 : i32
    %c0_i32_0 = arith.constant 0 : i32
    %c0_i32_1 = arith.constant 0 : i32
    return %arg0, %c0_i32, %c0_i32_0 : i32, i32, i32
  }
  func.func @transform_3(%arg0: i32) -> (i32, i32, i32) {
    %c0_i32 = arith.constant 0 : i32
    %c0_i32_0 = arith.constant 0 : i32
    %c0_i32_1 = arith.constant 0 : i32
    %c0_i32_2 = arith.constant 0 : i32
    return %c0_i32, %c0_i32_0, %c0_i32_1 : i32, i32, i32
  }
  func.func @transform_4(%arg0: i32) -> (i32, i32, i32) {
    %c0_i32 = arith.constant 0 : i32
    %c0_i32_0 = arith.constant 0 : i32
    %c0_i32_1 = arith.constant 0 : i32
    %c0_i32_2 = arith.constant 0 : i32
    return %c0_i32, %c0_i32_0, %c0_i32_1 : i32, i32, i32
  }
  func.func @transform_5(%arg0: i32) -> (i32, i32, i32) {
    %c0_i32 = arith.constant 0 : i32
    %c0_i32_0 = arith.constant 0 : i32
    %c0_i32_1 = arith.constant 0 : i32
    %c0_i32_2 = arith.constant 0 : i32
    return %c0_i32, %c0_i32_0, %c0_i32_1 : i32, i32, i32
  }
  func.func @transform_6(%arg0: i32) -> (i32, i32, i32) {
    %c0_i32 = arith.constant 0 : i32
    %c0_i32_0 = arith.constant 0 : i32
    %c0_i32_1 = arith.constant 0 : i32
    %c0_i32_2 = arith.constant 0 : i32
    return %c0_i32, %c0_i32_0, %c0_i32_1 : i32, i32, i32
  }
  func.func @transform_7(%arg0: i32) -> (i32, i32, i32) {
    %c0_i32 = arith.constant 0 : i32
    %c0_i32_0 = arith.constant 0 : i32
    %c0_i32_1 = arith.constant 0 : i32
    %c0_i32_2 = arith.constant 0 : i32
    return %c0_i32, %c0_i32_0, %c0_i32_1 : i32, i32, i32
  }
  func.func @transform_8(%arg0: i32) -> (i32, i32, i32) {
    %c0_i32 = arith.constant 0 : i32
    %c0_i32_0 = arith.constant 0 : i32
    %c0_i32_1 = arith.constant 0 : i32
    %c0_i32_2 = arith.constant 0 : i32
    return %c0_i32, %c0_i32_0, %c0_i32_1 : i32, i32, i32
  }
  func.func @transform_9(%arg0: i32) -> (i32, i32, i32) {
    %c0_i32 = arith.constant 0 : i32
    %c0_i32_0 = arith.constant 0 : i32
    %c0_i32_1 = arith.constant 0 : i32
    %c0_i32_2 = arith.constant 0 : i32
    return %c0_i32, %c0_i32_0, %c0_i32_1 : i32, i32, i32
  }
  func.func @transform_10(%arg0: i32) -> (i32, i32, i32) {
    %c0_i32 = arith.constant 0 : i32
    %c0_i32_0 = arith.constant 0 : i32
    %c0_i32_1 = arith.constant 0 : i32
    %c0_i32_2 = arith.constant 0 : i32
    return %c0_i32, %c0_i32_0, %c0_i32_1 : i32, i32, i32
  }
  func.func @transform_11(%arg0: i32) -> (i32, i32, i32) {
    %c0_i32 = arith.constant 0 : i32
    %c0_i32_0 = arith.constant 0 : i32
    %c0_i32_1 = arith.constant 0 : i32
    %c0_i32_2 = arith.constant 0 : i32
    return %c0_i32, %c0_i32_0, %c0_i32_1 : i32, i32, i32
  }
  func.func @transform_12(%arg0: i32) -> (i32, i32, i32) {
    %c0_i32 = arith.constant 0 : i32
    %c0_i32_0 = arith.constant 0 : i32
    %c0_i32_1 = arith.constant 0 : i32
    %c0_i32_2 = arith.constant 0 : i32
    return %c0_i32, %c0_i32_0, %c0_i32_1 : i32, i32, i32
  }
  func.func @transform_13(%arg0: i32) -> (i32, i32, i32) {
    %c0_i32 = arith.constant 0 : i32
    %c0_i32_0 = arith.constant 0 : i32
    %c0_i32_1 = arith.constant 0 : i32
    %c0_i32_2 = arith.constant 0 : i32
    return %c0_i32, %c0_i32_0, %c0_i32_1 : i32, i32, i32
  }
  func.func @transform_14(%arg0: i32) -> (i32, i32, i32) {
    %c0_i32 = arith.constant 0 : i32
    %c0_i32_0 = arith.constant 0 : i32
    %c0_i32_1 = arith.constant 0 : i32
    %c0_i32_2 = arith.constant 0 : i32
    return %c0_i32, %c0_i32_0, %c0_i32_1 : i32, i32, i32
  }
  func.func @transform_15(%arg0: i32) -> (i32, i32, i32) {
    %c0_i32 = arith.constant 0 : i32
    %c0_i32_0 = arith.constant 0 : i32
    %c0_i32_1 = arith.constant 0 : i32
    %c0_i32_2 = arith.constant 0 : i32
    return %c0_i32, %c0_i32_0, %c0_i32_1 : i32, i32, i32
  }
  func.func @transform_16(%arg0: i32) -> (i32, i32, i32) {
    %c0_i32 = arith.constant 0 : i32
    %c0_i32_0 = arith.constant 0 : i32
    %c0_i32_1 = arith.constant 0 : i32
    %c0_i32_2 = arith.constant 0 : i32
    return %c0_i32, %c0_i32_0, %c0_i32_1 : i32, i32, i32
  }
  func.func @transform_17(%arg0: i32) -> (i32, i32, i32) {
    %c0_i32 = arith.constant 0 : i32
    %c0_i32_0 = arith.constant 0 : i32
    %c0_i32_1 = arith.constant 0 : i32
    %c0_i32_2 = arith.constant 0 : i32
    return %c0_i32, %c0_i32_0, %c0_i32_1 : i32, i32, i32
  }
  func.func @transform_18(%arg0: i32) -> (i32, i32, i32) {
    %c0_i32 = arith.constant 0 : i32
    %c0_i32_0 = arith.constant 0 : i32
    %c0_i32_1 = arith.constant 0 : i32
    %c0_i32_2 = arith.constant 0 : i32
    return %c0_i32, %c0_i32_0, %c0_i32_1 : i32, i32, i32
  }
  func.func @transform_19(%arg0: i32) -> (i32, i32, i32) {
    %c0_i32 = arith.constant 0 : i32
    %c0_i32_0 = arith.constant 0 : i32
    %c0_i32_1 = arith.constant 0 : i32
    %c0_i32_2 = arith.constant 0 : i32
    return %c0_i32, %c0_i32_0, %c0_i32_1 : i32, i32, i32
  }
  func.func @transform_20(%arg0: i32) -> (i32, i32, i32) {
    %c0_i32 = arith.constant 0 : i32
    %c0_i32_0 = arith.constant 0 : i32
    %c0_i32_1 = arith.constant 0 : i32
    %c0_i32_2 = arith.constant 0 : i32
    return %c0_i32, %c0_i32_0, %c0_i32_1 : i32, i32, i32
  }
  func.func @transform_21(%arg0: i32) -> (i32, i32, i32) {
    %c0_i32 = arith.constant 0 : i32
    %c0_i32_0 = arith.constant 0 : i32
    %c0_i32_1 = arith.constant 0 : i32
    return %arg0, %c0_i32, %c0_i32_0 : i32, i32, i32
  }
}

</mosaic_0001>

<bundles_post_ra>
// kernel: transformer_forward.4
= control target key start
LH: loop header
LB: loop body
LE: loop exit
PB: predicated region body
PF: predicated region fallthrough
CT: control target
= control target key end

     0   :  { %vm30_vm0 = vcmask 1040384   ;;  %vm31_vm1 = vcmask 1041408   ;;  %v98_v0 = vmov 0.0   ;;  %v99_v2 = vmov 65535   ;;  %s139_s1 = inlined_call_operand.vmem [shape: bf16[3,32], index: 1, kind: input, shape index: {}]   ;;  %s140_s0 = inlined_call_operand.vmem [shape: f32[16,3], index: 0, kind: input, shape index: {}]   ;;  %s141_s2 = inlined_call_operand.vmem [shape: f32[1,32], index: 2, kind: input, shape index: {}]   ;;  %s142_s3 = inlined_call_operand.vmem [shape: f32[16,32], index: 3, kind: output, shape index: {}]  }
   0x1   :  { %89 = vmatprep.subr.bf16.mxu0 %v98_v0  ;;  %v17_v1 = vld [vmem:[%s139_s1] sm:$0x3]  ;;  %v32_v3 = vsel %vm30_vm0, 4294967295, %v99_v2  ;;  %v16_v5 = vld [vmem:[%s140_s0 + $0x8] sm:$0xff]  ;;  %vm100_vm2 = vmmov 0   ;;  %vm26_vm3 = vcmask 23552  }
   0x2   :  { %v15_v4 = vld [vmem:[%s140_s0] sm:$0xff]  ;;  %v33_v6 = vsel %vm31_vm1, %v32_v3, 0  ;;  %91 = vmatprep.mubr.msk.bf16.mxu0 %vm100_vm2, %v98_v0  ;;  %vm78_vm4 = vcmask 261120  }
   0x3   :  { %v35_v7 = vand.u32 %v33_v6, %v17_v1  ;;  %v18_v8 = vpack.c.bf16 %v16_v5, %v15_v4  ;;  %v85_v9 = vld [vmem:[%s141_s2] ss:$0 sm:$0xff] }
   0x5   :  { %90 = vmatpush3.bf16.msra.mxu0 %v35_v7 }
   0x8   :  { %92 = vmatmul.mubr.msk.bf16.vlgmr.msra.gmra.mrb[0].mxu0 %vm26_vm3, %v18_v8 }
  0xdb   :  { %v71_v10 = vpop.f32.mrb[0].mxu0 }
  0xdc   :  { %v72_v11 = vadd.f32 %v85_v9, %v71_v10  ;;  %v93_v12 = vpop.f32.mrb[1].mxu0 }
  0xdd   :  { %v74_v13 = vpop.f32.mrb[2].mxu0 }
  0xde   :  { %79 = vst.msk [vmem:[%s142_s3] sm:$0xff] %vm78_vm4, %v72_v11  ;;  %v75_v14 = vadd.f32 %v85_v9, %v74_v13  ;;  %v94_v15 = vpop.f32.mrb[3].mxu0 }
  0xe0   :  { %80 = vst.msk [vmem:[%s142_s3 + $0x8] sm:$0xff] %vm78_vm4, %v75_v14 }

// kernel: transformer_forward.7
= control target key start
LH: loop header
LB: loop body
LE: loop exit
PB: predicated region body
PF: predicated region fallthrough
CT: control target
= control target key end

     0   :  { %13 = vsyncpa [#allocation3], 0  ;;  %s943_s0 = inlined_call_operand.vmem [shape: f32[4,8,32], index: 0, kind: input, shape index: {}, may-alias: {0,1}]   ;;  %s944_s1 = inlined_call_operand.vmem [shape: f32[4,8,32], index: 1, kind: input, shape index: {}, may-alias: {0,1}]   ;;  %s945_s2 = inlined_call_operand.vmem [shape: bf16[32,256], index: 2, kind: input, shape index: {}]   ;;  %s946_s3 = inlined_call_operand.vmem [shape: f32[1,256], index: 3, kind: input, shape index: {}]   ;;  %s947_s4 = inlined_call_operand.vmem [shape: bf16[32,128], index: 4, kind: input, shape index: {}]   ;;  %s948_s5 = inlined_call_operand.vmem [shape: f32[1,128], index: 5, kind: input, shape index: {}]   ;;  %s949_s6 = inlined_call_operand.hbm [shape: f32[2,8,256], index: 6, kind: output, shape index: {0}]   ;;  %s950_s7 = inlined_call_operand.vmem [shape: f32[2,8,128], index: 7, kind: output, shape index: {1}]  }
   0x1   :  { %15 = vsyncpa [#allocation3 + $0x1], 0  ;;  %s807_s24 = smov 0   ;;  %s809_s25 = smov 0  }
   0x2   :  { %s811_s26 = smov 0   ;;  %s813_s27 = smov 0  }
   0x3 LB: > { %s828_s28 = sadd.s32 4294967295, %s761_s27   ;;  %s605_s29 = sadd.s32 4294967294, %s761_s27   ;;  %s761_s27 = sphi %s813_s27, %s956_s27   ;;  %s757_s26 = sphi %s811_s26, %s955_s26   ;;  %s753_s25 = sphi %s809_s25, %s954_s25   ;;  %s749_s24 = sphi %s807_s24, %s953_s24  }
   0x4   : > { %s832_s30 = sadd.s32 1, %s761_s27   ;;  %s166_s8 = sadd.s32 1, %s757_s26 }
   0x5   : > { %s163_s9 = ssub.s32 %s761_s27, %s832_s30  ;;  %p176_p0 = scmp.ne.s32.totalorder %s757_s26, %s753_s25 }
   0x6   : > { %p164_p1 = scmp.eq.s32.totalorder %s163_s9, 0  ;;  %p177_p2 = scmp.eq.s32.totalorder %s828_s28, 1 }
   0x7   : > { %p182_p3 = scmp.ne.s32.totalorder %s753_s25, %s749_s24  ;;  %p183_p4 = scmp.eq.s32.totalorder %s605_s29, 1 }
   0x8   : > { %s843_s10 = scalar_select %p164_p1, %s757_s26, %s166_s8  }
   0x9   : > { %p845_p5 = por %p177_p2, %p176_p0  ;;  %p849_p6 = por %p183_p4, %p182_p3 }
   0xa   : > { %p608_p7 = scmp.ge.s32.totalorder %s761_s27, 1  ;;  %p255_p8 = scmp.lt.s32.totalorder %s761_s27, 3 }
   0xc   : > { %p256_p9 = pnand %p608_p7, %p255_p8 }
   0xd   : > { %v681_v0 = vld [vmem:[%s945_s2 + $0x4] ss:$8 sps:$4 sm:$0xff] (!%p256_p9)   ;;  %v683_v1 = vld [vmem:[%s945_s2] ss:$8 sps:$4 sm:$0xff] (!%p256_p9)   ;;  %v763_v2 = vmov (!%p256_p9), 0.0   ;;  %v764_v3 = vmov (!%p256_p9), 0   ;;  %v319_v12 = vlaneseq (!%p256_p9) }
   0xe   : > { %259 = sbr.rel (%p256_p9) target bundleno = 577 (0x241), region = 44  ;;  %631 = vmatprep.subr.bf16.mxu1 (!%p256_p9), %v763_v2  ;;  %385 = vmatprep.mubr.bf16.mxu0 (!%p256_p9), %v764_v3  ;;  %p295_p10 = scmp.lt.s32.totalorder (!%p256_p9), %s828_s28, 3  ;;  %v684_v4 = vld [vmem:[%s945_s2 + $0x14] ss:$8 sps:$4 sm:$0xff] (!%p256_p9)   ;;  %v686_v5 = vld [vmem:[%s945_s2 + $0x10] ss:$8 sps:$4 sm:$0xff] (!%p256_p9)  }
   0xf   : > { %353 = vmatprep.subr.bf16.mxu0 (!%p256_p9), %v681_v0  ;;  %v687_v6 = vld [vmem:[%s947_s4] sm:$0xff] (!%p256_p9)   ;;  %s299_s29 = sadd.s32 (!%p256_p9), 2, %s828_s28  ;;  %v688_v7 = vld [vmem:[%s947_s4 + $0x8] sm:$0xff] (!%p256_p9)   ;;  %vm765_vm0 = vmmov (!%p256_p9), 0   ;;  %vm349_vm1 = vcmask (!%p256_p9), 261120   ;;  %v320_v13 = vshrl.u32 (!%p256_p9), %v319_v12, 7 }
  0x10   : > { %354 = vmatpush1.bf16.msra.mxu0 (!%p256_p9), %v683_v1  ;;  %632 = vmatpush3.bf16.msra.mxu1 (!%p256_p9), %v687_v6  ;;  %p300_p11 = scmp.lt.s32.totalorder (!%p256_p9), %s299_s29, 3  ;;  %v317_v15 = vld [vmem:[%s946_s3] sm:$0x3] (!%p256_p9)  ;;  %p305_p12 = scmp.lt.s32.totalorder (!%p256_p9), %s828_s28, 1 }
  0x11   : > { %355 = vmatprep.subr.bf16.mxu0 (!%p256_p9), %v684_v4  ;;  %635 = vmatprep.mubr.msk.bf16.mxu1 (!%p256_p9), %vm765_vm0, %v763_v2  ;;  %v321_v14 = vsub.s32 (!%p256_p9), 0, %v320_v13  ;;  %v325_v16 = vsub.s32 (!%p256_p9), 1, %v320_v13  ;;  %v618_v25 = vld [vmem:[%s948_s5] ss:$0 sm:$0xff] (!%p256_p9)  ;;  %s627_s14 = sshll.u32 (!%p256_p9), %s828_s28, 8 }
  0x12   : > { %633 = vmatprep.subr.bf16.mxu1 (!%p256_p9), %v763_v2 }
  0x13   : > { %v322_v17 = vrot.slane (!%p256_p9), %v317_v15, %v321_v14  ;;  %v326_v18 = vrot.slane (!%p256_p9), %v317_v15, %v325_v16 }
  0x14   : > { %356 = vmatpush1.bf16.msra.mxu0 (!%p256_p9), %v686_v5  ;;  %634 = vmatpush3.bf16.msra.mxu1 (!%p256_p9), %v688_v7 }
  0x15   : > { %s296_s23 = scalar_select %p295_p10, %s828_s28, 3 }
  0x16   : > { %s958_s29 = smov (!%p300_p11, %s299_s29), 3 }
  0x17   : > { %s610_s8 = sshll.u32 %s296_s23, 3  ;;  %s611_s17 = sshll.u32 %s958_s29, 3 }
  0x18   : > { %s298_s16 = scalar_lea.vmem %s943_s0, %s610_s8  ;;  %s303_s20 = scalar_lea.vmem %s944_s1, %s611_s17 }
  0x19   : > { %v310_v8 = vld [vmem:[%s298_s16] sm:$0xff]  ;;  %s286_s8 = sand.u32 1, %s753_s25  }
  0x1a   : > { %v316_v9 = vpack.c.bf16 %v310_v8, %v310_v8  ;;  %v311_v10 = vld [vmem:[%s303_s20] sm:$0xff]  ;;  %s609_s9 = sshll.u32 %s286_s8, 4  ;;  %s895_s20 = scalar_lea.hbm %s949_s6, %s627_s14 }
  0x1b   : > { %v415_v11 = vpack.c.bf16 %v311_v10, %v311_v10  ;;  %s306_s13 = scalar_select %p305_p12, %s828_s28, 1 }
  0x1c   : > { %617 = vmatmul.mubr.msk.bf16.vlgmr.msra.gmra.mrb[0].mxu0 %vm349_vm1, %v316_v9  ;;  %s288_s15 = scalar_lea.vmem [#allocation2], %s609_s9  ;;  %s489_s23 = scalar_lea.sflag [#allocation3], %s286_s8 }
  0x1d   : > { %636 = vmatmul.mubr.msk.bf16.vlgmr.msra.gmra.mrb[0].mxu1 %vm349_vm1, %v415_v11  ;;  %s507_s16 = sshll.u32 %s288_s15, 4  ;;  %s612_s17 = sshll.u32 %s306_s13, 3  ;;  %s897_s16 = int_to_ptr.vmem [resolvable:$true] %s507_s16 }
  0x1e   : > { %s902_s28 = scalar_lea.vmem %s950_s7, %s612_s17  ;;  %s699_s29 = scalar_lea.vmem %s897_s16, 256 }
  0x1f   : > { %p700_p13 = scmp.ne.s32.totalorder %s897_s16, %s699_s29  ;;  %s766_s9 = smov [#allocation2]  }
  0x20   : > { %s703_s13 = sshll.u32 %s766_s9, 4  ;;  %s704_s13 = int_to_ptr.vmem [resolvable:$false] %s703_s13 }
  0x21   : > { %p701_p0 = pnand %p700_p13, %p845_p5  ;;  %s705_s14 = scalar_lea.vmem %s704_s13, 512 }
  0x22   : > { %p706_p2 = scmp.lt.s32.totalorder %s897_s16, %s704_s13  ;;  %p707_p3 = scmp.lt.s32.totalorder %s705_s14, %s699_s29 }
  0x23   : > { %p702_p1 = pneg %p701_p0 }
  0x24   : > { %p708_p4 = por %p707_p3, %p706_p2 }
  0x26   : > { %p709_p7 = pnand %p708_p4, %p702_p1 }
  0xef   : > { %v387_v19 = vpop.f32.mrb[0].mxu0 }
  0xf0   : > { %v388_v20 = vadd.f32 %v387_v19, %v322_v17  ;;  %v389_v21 = vpop.f32.mrb[1].mxu0  ;;  %v472_v26 = vpop.f32.mrb[0].mxu1 }
  0xf1   : > { %v390_v22 = vadd.f32 %v389_v21, %v326_v18  ;;  %v391_v23 = vpop.f32.mrb[2].mxu0  ;;  %v637_v28 = vpop.f32.mrb[1].mxu1  ;;  %v473_v29 = vadd.f32 %v618_v25, %v472_v26 }
  0xf2   : > { %v392_v24 = vpop.f32.mrb[3].mxu0  ;;  %v475_v30 = vpop.f32.mrb[2].mxu1 }
  0xf3   : > { %v394_v27 = vmax.f32 %v388_v20, %v390_v22  ;;  %v638_v31 = vpop.f32.mrb[3].mxu1 }
  0xf5   : > { %395 = vmax.xlane.f32.xlu0 %v394_v27 }
  0xf9   : > { %478 = vmax.xlane.f32.xlu0 %v473_v29 }
 0x182   : > { %v396_v32 = vpop.xlane.xlu0 %395 }
 0x183   : > { %v397_v33 = vsub.f32 %v388_v20, %v396_v32  ;;  %v398_v34 = vsub.f32 %v390_v22, %v396_v32 }
 0x185   : > { %v399_v35 = vmul.f32 1.442695, %v397_v33  ;;  %v401_v36 = vmul.f32 1.442695, %v398_v34 }
 0x186   : > { %v479_v37 = vpop.xlane.xlu0 %478 }
 0x187   : > { %689 = vpow2.f32 %v399_v35  ;;  %v480_v38 = vsub.f32 %v473_v29, %v479_v37 }
 0x188   : > { %691 = vpow2.f32 %v401_v36 }
 0x189   : > { %v481_v39 = vmul.f32 1.442695, %v480_v38 }
 0x18b   : > { %693 = vpow2.f32 %v481_v39 }
 0x191   : > { %v690_v40 = vpop.eup %689 }
 0x192   : > { %v692_v41 = vpop.eup %691 }
 0x193   : > { %v403_v42 = vadd.f32 %v692_v41, %v690_v40 }
 0x195   : > { %404 = vadd.xlane.f32.xlu1 %v403_v42  ;;  %v694_v43 = vpop.eup %693 }
 0x199   : > { %483 = vadd.xlane.f32.xlu1 %v694_v43 }
 0x222   : > { %v405_v44 = vpop.xlane.xlu1 %404 }
 0x223   : > { %695 = vrcp.f32 %v405_v44 }
 0x226   : > { %v484_v45 = vpop.xlane.xlu1 %483 }
 0x227   : > { %697 = vrcp.f32 %v484_v45 }
 0x22d   : > { %v696_v46 = vpop.eup %695 }
 0x22e   : > { %v407_v47 = vmul.f32 %v696_v46, %v690_v40  ;;  %v408_v48 = vmul.f32 %v696_v46, %v692_v41 }
 0x230   : > { %409 = vst [vmem:[%s288_s15] sm:$0xff] %v407_v47  ;;  %410 = vst [vmem:[%s288_s15 + $0x8] sm:$0xff] %v408_v48 }
 0x231   : > { %v698_v49 = vpop.eup %697 }
 0x232   : > { %712 = shalt.err (!%p709_p7)
}
 0x233   : > { %s713_s8 = scalar_lea.hbm %s895_s20, 256  ;;  %s717_s18 = scalar_lea.hbm %s949_s6, 512 }
 0x234   : > { %p714_p8 = scmp.ne.s32.totalorder %s895_s20, %s713_s8  ;;  %p718_p11 = scmp.lt.u32.totalorder %s895_s20, %s949_s6 }
 0x235   : > { %p719_p12 = scmp.lt.u32.totalorder %s717_s18, %s713_s8  ;;  %p721_p0 = scmp.lt.u32.totalorder %s713_s8, %s895_s20 }
 0x236   : > { %p715_p9 = pnand %p714_p8, %p845_p5 }
 0x237   : > { %p720_p13 = por %p719_p12, %p718_p11 }
 0x238   : > { %p716_p10 = pneg %p715_p9 }
 0x239   : > { %p722_p1 = por %p721_p0, %p720_p13 }
 0x23b   : > { %p723_p2 = pnand %p722_p1, %p716_p10 }
 0x23d   : > { %726 = shalt.err (!%p723_p2)
}
 0x23e   : > { %639 = dma.vmem_to_hbm [thread:$0]  (%p845_p5), %s897_s16, 256, %s895_s20, %s489_s23   ;;  %v486_v50 = vmul.f32 %v698_v49, %v694_v43 }
 0x240   : > { %487 = vst [vmem:[%s902_s28] sm:$0xff] %v486_v50 }
 0x241 PF: > { %p645_p3 = scmp.ge.s32.totalorder %s761_s27, 2  ;;  %s522_s22 = sand.u32 1, %s749_s24  }
 0x242   : > { %s523_s29 = scalar_lea.sflag [#allocation3], %s522_s22 }
 0x243   : > { %p642_p4 = pnand %p645_p3, %p849_p6 }
 0x245   : > { %744 = dma.done.wait (!%p642_p4), %s523_s29, 256  }
 0x246   : > { %746 = vsyncadd (!%p642_p4), %s523_s29, 4294967040  ;;  %p18_p7 = scmp.ge.s32.totalorder %s832_s30, 4   ;;  %s953_s24 = smov %s753_s25 }
 0x247   : > { %s954_s25 = smov %s757_s26  ;;  %s955_s26 = smov %s843_s10 }
 0x248   : > { %s956_s27 = smov %s832_s30  ;;  %20 = sbr.rel (!%p18_p7) target bundleno = 3 (0x3), region = 94 }
 0x24f   :  { %535 = vsyncpa [#allocation3], 1 }
 0x250   :  { %537 = vsyncpa [#allocation3 + $0x1], 1 }

// kernel: transformer_forward.5
= control target key start
LH: loop header
LB: loop body
LE: loop exit
PB: predicated region body
PF: predicated region fallthrough
CT: control target
= control target key end

     0   :  { %20 = vsyncpa [#allocation3], 0  ;;  %s2797_s18 = smov 0   ;;  %s3197_s0 = inlined_call_operand.vmem [shape: s32[4], index: 0, kind: input, shape index: {}]   ;;  %s3198_s1 = inlined_call_operand.vmem [shape: f32[4,8,32], index: 1, kind: input, shape index: {}]   ;;  %s3199_s2 = inlined_call_operand.vmem [shape: f32[4,1,8], index: 2, kind: input, shape index: {}]   ;;  %s3200_s3 = inlined_call_operand.vmem [shape: bf16[2,32,96], index: 3, kind: input, shape index: {}]   ;;  %s3201_s4 = inlined_call_operand.vmem [shape: f32[2,1,96], index: 4, kind: input, shape index: {}]   ;;  %s3202_s5 = inlined_call_operand.vmem [shape: bf16[2,32,32], index: 5, kind: input, shape index: {}]   ;;  %s3203_s6 = inlined_call_operand.vmem [shape: f32[2,1,32], index: 6, kind: input, shape index: {}]   ;;  %s3204_s7 = inlined_call_operand.vmem [shape: f32[2,1,32], index: 7, kind: input, shape index: {}]   ;;  %s3205_s8 = inlined_call_operand.vmem [shape: f32[2,1,32], index: 8, kind: input, shape index: {}]   ;;  %s3206_s9 = inlined_call_operand.vmem [shape: bf16[2,32,64], index: 9, kind: input, shape index: {}]   ;;  %s3207_s10 = inlined_call_operand.vmem [shape: f32[2,1,64], index: 10, kind: input, shape index: {}]   ;;  %s3208_s11 = inlined_call_operand.vmem [shape: bf16[2,64,32], index: 11, kind: input, shape index: {}]   ;;  %s3209_s12 = inlined_call_operand.vmem [shape: f32[2,1,32], index: 12, kind: input, shape index: {}]   ;;  %s3210_s13 = inlined_call_operand.vmem [shape: f32[2,1,32], index: 13, kind: input, shape index: {}]   ;;  %s3211_s14 = inlined_call_operand.vmem [shape: f32[2,1,32], index: 14, kind: input, shape index: {}]   ;;  %s3212_s15 = inlined_call_operand.vmem [shape: f32[4,8,32], index: 15, kind: output, shape index: {}]  }
   0x1 LB: > { %s2803_s19 = sadd.s32 4294967295, %s2697_s18   ;;  %p2250_p0 = scmp.ge.s32.totalorder %s2697_s18, 1  ;;  %s2697_s18 = sphi %s2797_s18, %s26_s18  }
   0x2   : > { %p382_p1 = scmp.lt.s32.totalorder %s2697_s18, 5  ;;  %s395_s22 = sshll.u32 %s3197_s0, 4  ;;  %s396_s22 = int_to_ptr.vmem [resolvable:$true] %s395_s22 }
   0x3   : > { %p2584_p3 = scmp.eq.s32.totalorder %s2803_s19, 0  ;;  %s2672_s24 = scalar_lea.vmem %s396_s22, 16 }
   0x4   : > { %p2810_p2 = pnand %p2250_p0, %p382_p1  ;;  %p2673_p6 = scmp.ne.s32.totalorder %s396_s22, %s2672_s24 }
   0x5   : > { %p2680_p10 = scmp.lt.s32.totalorder %s396_s22, %s396_s22  ;;  %p2681_p11 = scmp.lt.s32.totalorder %s2672_s24, %s2672_s24 }
   0x6   : > { %p2580_p4 = pneg %p2810_p2 }
   0x7   : > { %p2682_p12 = por %p2681_p11, %p2680_p10 }
   0x8   : > { %p2581_p5 = pnand %p2584_p3, %p2580_p4 }
   0xa   : > { %p2674_p7 = pneg %p2581_p5 }
   0xc   : > { %p2675_p8 = pnand %p2674_p7, %p2673_p6 }
   0xe   : > { %p2676_p9 = pneg %p2675_p8 }
  0x10   : > { %p2683_p13 = pnand %p2682_p12, %p2676_p9 }
  0x12   : > { %2686 = shalt.err (!%p2683_p13)
}
  0x13   : > { %s2699_s25 = smov [#allocation2]   ;;  %457 = sbr.rel (%p2810_p2) target bundleno = 5121 (0x1401), region = 80 }
  0x14   : > { %2583 = dma.vmem_to_smem (!%p2581_p5), %s396_s22, 16, %s2699_s25, [#allocation3]  }
  0x1a   : > { %2692 = dma.done.wait (%p2584_p3), [#allocation3], 16  }
  0x1b   : > { %2694 = vsyncadd (%p2584_p3), [#allocation3], 4294967280 }
  0x1c   : > { %463 = sfence }
  0x1d   : > { %v2612_v0 = vld [vmem:[%s3200_s3] sm:$0xff]   ;;  %v2700_v1 = vmov 0.0   ;;  %v2613_v2 = vld [vmem:[%s3200_s3 + $0x8] sm:$0xff]   ;;  %vm2701_vm0 = vmmov 0   ;;  %p507_p0 = scmp.lt.s32.totalorder %s2803_s19, 3  ;;  %vm569_vm1 = vcmask 261120   ;;  %v522_v23 = vlaneseq }
  0x1e   : > { %2408 = vmatprep.subr.bf16.mxu1 %v2700_v1  ;;  %2422 = vmatprep.subr.bf16.mxu0 %v2700_v1  ;;  %v2258_v5 = vld [vmem:[%s3201_s4] ss:$0 sm:$0xff]  ;;  %s2702_s24 = smov 120   ;;  %s2703_s25 = smov 96   ;;  %vm617_vm2 = vcmask 64512   ;;  %v2709_v28 = vmov 0  }
  0x1f   : > { %2409 = vmatpush3.bf16.msra.mxu1 %v2612_v0  ;;  %2412 = vmatprep.mubr.msk.bf16.mxu1 %vm2701_vm0, %v2700_v1  ;;  %s2840_s30 = scalar_select %p507_p0, %s2803_s19, 3  ;;  %v523_v25 = vshrl.u32 %v522_v23, 7  ;;  %v525_v27 = vand.u32 127, %v522_v23  ;;  %vm683_vm7 = vcmask 1043456   ;;  %vm1076_vm8 = vcmask 130048  }
  0x20   : > { %2410 = vmatprep.subr.bf16.mxu1 %v2700_v1  ;;  %2424 = vmatprep.mubr.msk.bf16.mxu0 %vm2701_vm0, %v2700_v1  ;;  %s3222_s26 = smov 80   ;;  %s2705_s27 = smov 88   ;;  %vm1078_vm9 = vcmask 195584   ;;  %vm1281_vm10 = vcmask 523264  }
  0x21   : > { %s3213_s16 = sshll.u32 %s2840_s30, 3  ;;  %s3221_s28 = smov 72   ;;  %v534_v26 = vsub.s32 0, %v523_v25  ;;  %v526_v31 = vsub.s32 %v525_v27, %v523_v25 }
  0x22   : > { %s510_s21 = scalar_lea.vmem %s3198_s1, %s3213_s16  ;;  %s2707_s29 = smov 112  }
  0x23   : > { %2411 = vmatpush3.bf16.msra.mxu1 %v2613_v2  ;;  %v2849_v3 = vld [vmem:[%s510_s21] sm:$0xff]  ;;  %s2708_s17 = smov 104   ;;  %s513_s22 = scalar_lea.vmem %s3199_s2, %s2840_s30 }
  0x24   : > { %2416 = vmatprep.subr.bf16.mxu1 %v2700_v1  ;;  %v550_v4 = vpack.c.bf16 %v2849_v3, %v2849_v3  ;;  %s521_s23 = sld [smem:[#allocation2 + %s2803_s19]]  ;;  %v520_v24 = vld [vmem:[%s513_s22] sm:$0x1]  ;;  %s3217_s19 = smov 56  }
  0x25   : > { %vm530_vm3 = vcmp.gt.f32.partialorder %v520_v24, 0.5  ;;  %s3215_s20 = smov 40   ;;  %s3214_s21 = smov 48  }
  0x26   : > { %2413 = vmatmul.mubr.msk.bf16.vlgmr.msra.gmra.mrb[0].mxu1 %vm569_vm1, %v550_v4  ;;  %v531_v29 = vsel %vm530_vm3, 1, %v2709_v28  ;;  %s3220_s22 = smov 8  }
  0x27   : > { %2418 = vmatprep.mubr.msk.bf16.mxu1 %vm2701_vm0, %v2700_v1  ;;  %v535_v30 = vrot.slane %v531_v29, %v534_v26 }
  0x29   : > { %vm536_vm4 = vcmp.eq.s32.totalorder %v535_v30, 1 }
  0x2a   : > { %s2257_s16 = sadd.s32 4294967295, %s521_s23 }
  0x2b   : > { %v528_v32 = vstv %s2257_s16  ;;  %s3216_s16 = smov 64  }
  0x2c   : > { %vm529_vm5 = vcmp.le.s32.totalorder %v526_v31, %v528_v32 }
  0x2d   : > { %vm2901_vm6 = vmand %vm529_vm5, %vm536_vm4 }
  0xf9   : > { %v607_v6 = vpop.f32.mrb[0].mxu1 }
  0xfa   : > { %v608_v7 = vadd.f32 %v2258_v5, %v607_v6  ;;  %v2414_v8 = vpop.f32.mrb[1].mxu1 }
  0xfb   : > { %v610_v9 = vpop.f32.mrb[2].mxu1 }
  0xfc   : > { %v2859_v10 = vpack.c.bf16 %v608_v7, %v608_v7  ;;  %v2415_v11 = vpop.f32.mrb[3].mxu1 }
  0xfe   : > { %727 = vrot.lane.b32.xlu1 %v2859_v10, %s2702_s24  ;;  %615 = vrot.lane.b32.xlu0 %v2859_v10, %s2703_s25 }
 0x102   : > { %841 = vrot.lane.b32.xlu1 %v2859_v10, %s3222_s26  ;;  %729 = vrot.lane.b32.xlu0 %v2859_v10, %s2705_s27  ;;  %s3233_s26 = smov 16  }
 0x106   : > { %953 = vrot.lane.b32.xlu1 %v2859_v10, %s3221_s28  ;;  %839 = vrot.lane.b32.xlu0 %v2859_v10, %s2707_s29  ;;  %s3234_s28 = smov 24  }
 0x10a   : > { %951 = vrot.lane.b32.xlu0 %v2859_v10, %s2708_s17 }
 0x170   : > { %v616_v12 = vpop.permute.xlu0 %615  ;;  %v728_v15 = vpop.permute.xlu1 %727 }
 0x171   : > { %v622_v13 = vsel %vm617_vm2, %v616_v12, 0 }
 0x172   : > { %2417 = vmatpush3.bf16.xpose.msra.mxu1 %v622_v13 }
 0x173   : > { %2428 = vmatprep.subr.bf16.mxu1 %v2700_v1 }
 0x174   : > { %v730_v14 = vpop.permute.xlu0 %729  ;;  %v842_v17 = vpop.permute.xlu1 %841 }
 0x175   : > { %v735_v16 = vsel %vm617_vm2, %v730_v14, 0  ;;  %v847_v18 = vsel %vm617_vm2, %v842_v17, 0 }
 0x178   : > { %v954_v19 = vpop.permute.xlu1 %953  ;;  %v840_v20 = vpop.permute.xlu0 %839 }
 0x179   : > { %2419 = vmatmul.mubr.msk.bf16.vlgmr.msra.gmra.mrb[4].mxu1 %vm617_vm2, %v2859_v10  ;;  %v959_v21 = vsel %vm617_vm2, %v954_v19, 0 }
 0x17a   : > { %2429 = vmatpush3.bf16.xpose.msra.mxu1 %v735_v16  ;;  %2430 = vmatprep.mubr.msk.bf16.mxu1 %vm2701_vm0, %v2700_v1 }
 0x17b   : > { %2440 = vmatprep.subr.bf16.mxu1 %v2700_v1 }
 0x17c   : > { %v952_v22 = vpop.permute.xlu0 %951 }
 0x181   : > { %2431 = vmatmul.mubr.msk.bf16.vlgmr.msra.gmra.mrb[8].mxu1 %vm617_vm2, %v728_v15 }
 0x182   : > { %2441 = vmatpush3.bf16.xpose.msra.mxu1 %v847_v18  ;;  %2442 = vmatprep.mubr.msk.bf16.mxu1 %vm2701_vm0, %v2700_v1 }
 0x183   : > { %2452 = vmatprep.subr.bf16.mxu1 %v2700_v1 }
 0x189   : > { %2443 = vmatmul.mubr.msk.bf16.vlgmr.msra.gmra.mrb[12].mxu1 %vm617_vm2, %v840_v20 }
 0x18a   : > { %2453 = vmatpush3.bf16.xpose.msra.mxu1 %v959_v21  ;;  %2454 = vmatprep.mubr.msk.bf16.mxu1 %vm2701_vm0, %v2700_v1 }
 0x18b   : > { %2464 = vmatprep.subr.bf16.mxu1 %v2700_v1 }
 0x191   : > { %2455 = vmatmul.mubr.msk.bf16.vlgmr.msra.gmra.mrb[16].mxu1 %vm617_vm2, %v952_v22 }
 0x192   : > { %2468 = vmatprep.mubr.msk.bf16.mxu1 %vm2701_vm0, %v2700_v1 }
 0x24c   : > { %v658_v33 = vpop.f32.mrb[4].mxu1 }
 0x24d   : > { %v664_v35 = vmul.f32 0.35355338, %v658_v33  ;;  %v2420_v36 = vpop.f32.mrb[5].mxu1 }
 0x24e   : > { %v661_v37 = vpop.f32.mrb[6].mxu1 }
 0x24f   : > { %v2421_v38 = vpop.f32.mrb[7].mxu1  ;;  %v665_v39 = vsel %vm2901_vm6, %v664_v35, -1e+09 }
 0x250   : > { %v666_v40 = vsel %vm617_vm2, %v665_v39, -inf }
 0x251   : > { %667 = vmax.xlane.f32.xlu1 %v666_v40 }
 0x254   : > { %v771_v41 = vpop.f32.mrb[8].mxu1 }
 0x255   : > { %v777_v42 = vmul.f32 0.35355338, %v771_v41  ;;  %v2432_v43 = vpop.f32.mrb[9].mxu1 }
 0x256   : > { %v774_v44 = vpop.f32.mrb[10].mxu1 }
 0x257   : > { %v2433_v45 = vpop.f32.mrb[11].mxu1  ;;  %v778_v46 = vsel %vm2901_vm6, %v777_v42, -1e+09 }
 0x258   : > { %v779_v47 = vsel %vm617_vm2, %v778_v46, -inf }
 0x259   : > { %780 = vmax.xlane.f32.xlu0 %v779_v47 }
 0x25c   : > { %v883_v48 = vpop.f32.mrb[12].mxu1 }
 0x25d   : > { %v889_v49 = vmul.f32 0.35355338, %v883_v48  ;;  %v2444_v50 = vpop.f32.mrb[13].mxu1 }
 0x25e   : > { %v886_v51 = vpop.f32.mrb[14].mxu1 }
 0x25f   : > { %v2445_v52 = vpop.f32.mrb[15].mxu1  ;;  %v890_v53 = vsel %vm2901_vm6, %v889_v49, -1e+09 }
 0x260   : > { %v891_v54 = vsel %vm617_vm2, %v890_v53, -inf }
 0x261   : > { %892 = vmax.xlane.f32.xlu0 %v891_v54  ;;  %v2615_v54 = vld [vmem:[%s3202_s5 + $0x8] sm:$0xff]  }
 0x264   : > { %v995_v55 = vpop.f32.mrb[16].mxu1 }
 0x265   : > { %v1001_v56 = vmul.f32 0.35355338, %v995_v55  ;;  %v2456_v57 = vpop.f32.mrb[17].mxu1 }
 0x266   : > { %v998_v58 = vpop.f32.mrb[18].mxu1 }
 0x267   : > { %v2457_v59 = vpop.f32.mrb[19].mxu1  ;;  %v1002_v60 = vsel %vm2901_vm6, %v1001_v56, -1e+09 }
 0x268   : > { %v1003_v61 = vsel %vm617_vm2, %v1002_v60, -inf }
 0x269   : > { %1004 = vmax.xlane.f32.xlu1 %v1003_v61 }
 0x2de   : > { %v668_v62 = vpop.xlane.xlu1 %667 }
 0x2df   : > { %v669_v63 = vsub.f32 %v665_v39, %v668_v62 }
 0x2e1   : > { %v670_v0 = vmul.f32 1.442695, %v669_v63 }
 0x2e3   : > { %2632 = vpow2.f32 %v670_v0 }
 0x2e6   : > { %v781_v2 = vpop.xlane.xlu0 %780 }
 0x2e7   : > { %v782_v4 = vsub.f32 %v778_v46, %v781_v2 }
 0x2e9   : > { %v783_v5 = vmul.f32 1.442695, %v782_v4 }
 0x2eb   : > { %2634 = vpow2.f32 %v783_v5 }
 0x2ed   : > { %v2633_v6 = vpop.eup %2632 }
 0x2ee   : > { %v893_v7 = vpop.xlane.xlu0 %892  ;;  %v672_v8 = vsel %vm617_vm2, %v2633_v6, 0.0 }
 0x2ef   : > { %v894_v9 = vsub.f32 %v890_v53, %v893_v7  ;;  %673 = vadd.xlane.f32.xlu0 %v672_v8  ;;  %v2614_v53 = vld [vmem:[%s3202_s5] sm:$0xff]  }
 0x2f0   : > { %2465 = vmatpush3.bf16.msra.mxu1 %v2614_v53  ;;  %v2270_v8 = vld [vmem:[%s3203_s6] ss:$0 sm:$0xff] }
 0x2f1   : > { %v895_v11 = vmul.f32 1.442695, %v894_v9  ;;  %2466 = vmatprep.subr.bf16.mxu1 %v2700_v1 }
 0x2f3   : > { %2636 = vpow2.f32 %v895_v11 }
 0x2f4   : > { %2467 = vmatpush3.bf16.msra.mxu1 %v2615_v54 }
 0x2f5   : > { %v2635_v12 = vpop.eup %2634  ;;  %2480 = vmatprep.subr.bf16.mxu1 %v2700_v1 }
 0x2f6   : > { %v785_v13 = vsel %vm617_vm2, %v2635_v12, 0.0  ;;  %v1005_v16 = vpop.xlane.xlu1 %1004 }
 0x2f7   : > { %786 = vadd.xlane.f32.xlu1 %v785_v13  ;;  %v1006_v17 = vsub.f32 %v1002_v60, %v1005_v16 }
 0x2f9   : > { %v1007_v18 = vmul.f32 1.442695, %v1006_v17 }
 0x2fb   : > { %2638 = vpow2.f32 %v1007_v18 }
 0x2fd   : > { %v2637_v14 = vpop.eup %2636 }
 0x2fe   : > { %v897_v15 = vsel %vm617_vm2, %v2637_v14, 0.0 }
 0x2ff   : > { %898 = vadd.xlane.f32.xlu0 %v897_v15 }
 0x305   : > { %v2639_v19 = vpop.eup %2638 }
 0x306   : > { %v1009_v20 = vsel %vm617_vm2, %v2639_v19, 0.0 }
 0x308   : > { %791 = vrot.lane.b32.xlu1 %v2859_v10, %s3217_s19  ;;  %s3219_s19 = smov 16  }
 0x315   : > { %678 = vrot.lane.b32.xlu0 %v2859_v10, %s3216_s16  ;;  %s3226_s16 = smov 80  }
 0x319   : > { %1015 = vrot.lane.b32.xlu0 %v2859_v10, %s3215_s20  ;;  %s3227_s20 = smov 72  }
 0x32c   : > { %1010 = vadd.xlane.f32.xlu1 %v1009_v20 }
 0x33d   : > { %903 = vrot.lane.b32.xlu1 %v2859_v10, %s3214_s21  ;;  %s3218_s21 = smov 24  }
 0x37c   : > { %v674_v21 = vpop.xlane.xlu0 %673 }
 0x37d   : > { %2640 = vrcp.f32 %v674_v21 }
 0x384   : > { %v787_v22 = vpop.xlane.xlu1 %786 }
 0x385   : > { %2642 = vrcp.f32 %v787_v22  ;;  %v2616_v22 = vld [vmem:[%s3206_s9] sm:$0xff]  }
 0x387   : > { %v2641_v23 = vpop.eup %2640 }
 0x388   : > { %v676_v25 = vmul.f32 %v2641_v23, %v2633_v6  ;;  %v792_v28 = vpop.permute.xlu1 %791  ;;  %v2618_v23 = vld [vmem:[%s3208_s11] sm:$0xff]  }
 0x389   : > { %v797_v31 = vsel %vm683_vm7, %v792_v28, 0 }
 0x38a   : > { %v677_v29 = vpack.c.bf16 %v676_v25, %v676_v25 }
 0x38c   : > { %v899_v24 = vpop.xlane.xlu0 %898 }
 0x38d   : > { %2644 = vrcp.f32 %v899_v24  ;;  %v2619_v24 = vld [vmem:[%s3208_s11 + $0x8] sm:$0xff]  }
 0x38f   : > { %v2643_v30 = vpop.eup %2642 }
 0x390   : > { %v679_v26 = vpop.permute.xlu0 %678  ;;  %v789_v10 = vmul.f32 %v2643_v30, %v2635_v12 }
 0x391   : > { %v685_v27 = vsel %vm683_vm7, %v679_v26, 0 }
 0x392   : > { %2423 = vmatpush3.bf16.msra.mxu0 %v685_v27  ;;  %v790_v32 = vpack.c.bf16 %v789_v10, %v789_v10 }
 0x393   : > { %2434 = vmatprep.subr.bf16.mxu0 %v2700_v1 }
 0x394   : > { %v1016_v39 = vpop.permute.xlu0 %1015 }
 0x395   : > { %2425 = vmatmul.mubr.msk.bf16.vlgmr.msra.gmra.mrb[0].mxu0 %vm617_vm2, %v677_v29  ;;  %v1021_v41 = vsel %vm683_vm7, %v1016_v39, 0  ;;  %v2274_v29 = vld [vmem:[%s3204_s7] ss:$0 sm:$0xff] }
 0x396   : > { %2435 = vmatpush3.bf16.msra.mxu0 %v797_v31  ;;  %2436 = vmatprep.mubr.msk.bf16.mxu0 %vm2701_vm0, %v2700_v1  ;;  %v2275_v31 = vld [vmem:[%s3205_s8] ss:$0 sm:$0xff] }
 0x397   : > { %2446 = vmatprep.subr.bf16.mxu0 %v2700_v1  ;;  %v2645_v33 = vpop.eup %2644 }
 0x398   : > { %v901_v36 = vmul.f32 %v2645_v33, %v2637_v14 }
 0x39a   : > { %v902_v40 = vpack.c.bf16 %v901_v36, %v901_v36  ;;  %v2621_v36 = vld [vmem:[%s3208_s11 + $0x18] sm:$0xff]  }
 0x39d   : > { %2437 = vmatmul.mubr.msk.bf16.vlgmr.msra.gmra.mrb[4].mxu0 %vm617_vm2, %v790_v32 }
 0x39e   : > { %2448 = vmatprep.mubr.msk.bf16.mxu0 %vm2701_vm0, %v2700_v1 }
 0x3b9   : > { %v1011_v35 = vpop.xlane.xlu1 %1010 }
 0x3ba   : > { %2646 = vrcp.f32 %v1011_v35  ;;  %v2620_v35 = vld [vmem:[%s3208_s11 + $0x10] sm:$0xff]  }
 0x3bd   : > { %v904_v37 = vpop.permute.xlu1 %903 }
 0x3be   : > { %v909_v38 = vsel %vm683_vm7, %v904_v37, 0  ;;  %v2276_v37 = vld [vmem:[%s3207_s10] ss:$0 sm:$0xff] }
 0x3bf   : > { %2447 = vmatpush3.bf16.msra.mxu0 %v909_v38 }
 0x3c0   : > { %2458 = vmatprep.subr.bf16.mxu0 %v2700_v1 }
 0x3c2   : > { %2449 = vmatmul.mubr.msk.bf16.vlgmr.msra.gmra.mrb[8].mxu0 %vm617_vm2, %v902_v40 }
 0x3c3   : > { %2459 = vmatpush3.bf16.msra.mxu0 %v1021_v41  ;;  %2460 = vmatprep.mubr.msk.bf16.mxu0 %vm2701_vm0, %v2700_v1 }
 0x3c4   : > { %v2647_v42 = vpop.eup %2646  ;;  %2472 = vmatprep.subr.bf16.mxu0 %v2700_v1 }
 0x3c5   : > { %v1013_v43 = vmul.f32 %v2647_v42, %v2639_v19 }
 0x3c7   : > { %v1014_v44 = vpack.c.bf16 %v1013_v43, %v1013_v43 }
 0x3ca   : > { %2461 = vmatmul.mubr.msk.bf16.vlgmr.msra.gmra.mrb[12].mxu0 %vm617_vm2, %v1014_v44 }
 0x3cb   : > { %2476 = vmatprep.mubr.msk.bf16.mxu0 %vm2701_vm0, %v2700_v1  ;;  %2473 = vmatpush3.bf16.msra.mxu0 %v2616_v22 }
 0x3cc   : > { %2474 = vmatprep.subr.bf16.mxu0 %v2700_v1 }
 0x468   : > { %v721_v45 = vpop.f32.mrb[0].mxu0 }
 0x469   : > { %v2426_v46 = vpop.f32.mrb[1].mxu0 }
 0x46a   : > { %v724_v47 = vpop.f32.mrb[2].mxu0 }
 0x46b   : > { %v2427_v48 = vpop.f32.mrb[3].mxu0 }
 0x470   : > { %v833_v49 = vpop.f32.mrb[4].mxu0 }
 0x471   : > { %1064 = vrot.lane.b32.xlu1 %v833_v49, %s3220_s22  ;;  %v2438_v50 = vpop.f32.mrb[5].mxu0 }
 0x472   : > { %v836_v51 = vpop.f32.mrb[6].mxu0 }
 0x473   : > { %v2439_v52 = vpop.f32.mrb[7].mxu0 }
 0x495   : > { %v945_v55 = vpop.f32.mrb[8].mxu0 }
 0x496   : > { %1068 = vrot.lane.b32.xlu0 %v945_v55, %s3219_s19  ;;  %v2450_v56 = vpop.f32.mrb[9].mxu0 }
 0x497   : > { %v948_v57 = vpop.f32.mrb[10].mxu0 }
 0x498   : > { %v2451_v58 = vpop.f32.mrb[11].mxu0 }
 0x499   : > { %v2622_v58 = vld [vmem:[%s3200_s3 + $0x10] sm:$0xff]  }
 0x49d   : > { %v1057_v59 = vpop.f32.mrb[12].mxu0 }
 0x49e   : > { %1072 = vrot.lane.b32.xlu1 %v1057_v59, %s3218_s21  ;;  %v2462_v60 = vpop.f32.mrb[13].mxu0  ;;  %v2623_v59 = vld [vmem:[%s3200_s3 + $0x18] sm:$0xff]  }
 0x49f   : > { %v1060_v61 = vpop.f32.mrb[14].mxu0 }
 0x4a0   : > { %v2463_v62 = vpop.f32.mrb[15].mxu0 }
 0x4e3   : > { %v1065_v63 = vpop.permute.xlu1 %1064 }
 0x4e4   : > { %v1075_v2 = vsel %vm617_vm2, %v721_v45, %v1065_v63  ;;  %v2280_v45 = vld [vmem:[%s3209_s12] ss:$0 sm:$0xff] }
 0x508   : > { %v1069_v0 = vpop.permute.xlu0 %1068 }
 0x509   : > { %v1077_v4 = vsel %vm1076_vm8, %v1075_v2, %v1069_v0  ;;  %v2286_v0 = vld [vmem:[%s3210_s13] ss:$0 sm:$0xff] }
 0x510   : > { %v1073_v5 = vpop.permute.xlu1 %1072 }
 0x511   : > { %v1079_v6 = vsel %vm1078_vm9, %v1077_v4, %v1073_v5  ;;  %v2287_v4 = vld [vmem:[%s3211_s14] ss:$0 sm:$0xff] }
 0x512   : > { %v1080_v7 = vpack.c.bf16 %v1079_v6, %v1079_v6 }
 0x514   : > { %2469 = vmatmul.mubr.msk.bf16.vlgmr.msra.gmra.mrb[20].mxu1 %vm569_vm1, %v1080_v7 }
 0x515   : > { %2488 = vmatprep.mubr.msk.bf16.mxu1 %vm2701_vm0, %v2700_v1  ;;  %2481 = vmatpush3.bf16.msra.mxu1 %v2618_v23 }
 0x516   : > { %2482 = vmatprep.subr.bf16.mxu1 %v2700_v1 }
 0x519   : > { %2483 = vmatpush3.bf16.msra.mxu1 %v2619_v24 }
 0x51a   : > { %2484 = vmatprep.subr.bf16.mxu1 %v2700_v1 }
 0x51d   : > { %2485 = vmatpush3.bf16.msra.mxu1 %v2620_v35 }
 0x51e   : > { %2486 = vmatprep.subr.bf16.mxu1 %v2700_v1 }
 0x521   : > { %2487 = vmatpush3.bf16.msra.mxu1 %v2621_v36 }
 0x522   : > { %2506 = vmatprep.subr.bf16.mxu1 %v2700_v1 }
 0x5e7   : > { %v1136_v9 = vpop.f32.mrb[20].mxu1 }
 0x5e8   : > { %v1137_v11 = vadd.f32 %v2270_v8, %v1136_v9  ;;  %v2470_v12 = vpop.f32.mrb[21].mxu1  ;;  %v2300_v8 = vld [vmem:[%s3201_s4 + $0x1] ss:$0 sm:$0xff] }
 0x5e9   : > { %v1139_v13 = vpop.f32.mrb[22].mxu1 }
 0x5ea   : > { %v2471_v14 = vpop.f32.mrb[23].mxu1  ;;  %v1142_v15 = vadd.f32 %v1137_v11, %v2849_v3  ;;  %v2617_v3 = vld [vmem:[%s3206_s9 + $0x8] sm:$0xff]  }
 0x5eb   : > { %2475 = vmatpush3.bf16.msra.mxu0 %v2617_v3 }
 0x5ec   : > { %v1143_v16 = vsel %vm569_vm1, %v1142_v15, 0.0  ;;  %2492 = vmatprep.subr.bf16.mxu0 %v2700_v1 }
 0x5ed   : > { %1144 = vadd.xlane.f32.xlu0 %v1143_v16 }
 0x67a   : > { %v1145_v17 = vpop.xlane.xlu0 %1144 }
 0x67b   : > { %v1147_v18 = vmul.f32 0.03125, %v1145_v17 }
 0x67d   : > { %v1148_v19 = vsub.f32 %v1142_v15, %v1147_v18 }
 0x67f   : > { %v1149_v20 = vmul.f32 %v1148_v19, %v1148_v19 }
 0x681   : > { %v1150_v21 = vsel %vm569_vm1, %v1149_v20, 0.0 }
 0x682   : > { %1151 = vadd.xlane.f32.xlu1 %v1150_v21 }
 0x70f   : > { %v1152_v25 = vpop.xlane.xlu1 %1151 }
 0x710   : > { %v1153_v26 = vmul.f32 0.03125, %v1152_v25 }
 0x712   : > { %v1154_v27 = vadd.f32 1e-05, %v1153_v26 }
 0x714   : > { %2648 = vrsqrt.f32 %v1154_v27 }
 0x71e   : > { %v2649_v28 = vpop.eup %2648 }
 0x71f   : > { %v1156_v30 = vmul.f32 %v2649_v28, %v1148_v19 }
 0x721   : > { %v1163_v10 = vmul.f32 %v2274_v29, %v1156_v30 }
 0x723   : > { %v1170_v32 = vadd.f32 %v2275_v31, %v1163_v10 }
 0x725   : > { %v1187_v33 = vpack.c.bf16 %v1170_v32, %v1170_v32 }
 0x727   : > { %2477 = vmatmul.mubr.msk.bf16.vlgmr.msra.gmra.mrb[16].mxu0 %vm569_vm1, %v1187_v33 }
 0x728   : > { %2496 = vmatprep.mubr.msk.bf16.mxu0 %vm2701_vm0, %v2700_v1  ;;  %2493 = vmatpush3.bf16.msra.mxu0 %v2622_v58 }
 0x729   : > { %2494 = vmatprep.subr.bf16.mxu0 %v2700_v1 }
 0x72c   : > { %2495 = vmatpush3.bf16.msra.mxu0 %v2623_v59 }
 0x72d   : > { %2500 = vmatprep.subr.bf16.mxu0 %v2700_v1 }
 0x7fa   : > { %v1243_v38 = vpop.f32.mrb[16].mxu0 }
 0x7fb   : > { %v1244_v39 = vadd.f32 %v2276_v37, %v1243_v38  ;;  %v2478_v40 = vpop.f32.mrb[17].mxu0 }
 0x7fc   : > { %v1246_v41 = vpop.f32.mrb[18].mxu0 }
 0x7fd   : > { %v1249_v42 = vmax.f32 %v1244_v39, 0.0  ;;  %v2479_v43 = vpop.f32.mrb[19].mxu0 }
 0x7ff   : > { %v1250_v44 = vpack.c.bf16 %v1249_v42, %v1249_v42 }
 0x801   : > { %2489 = vmatmul.mubr.msk.bf16.vlgmr.msra.gmra.mrb[24].mxu1 %vm1281_vm10, %v1250_v44 }
 0x802   : > { %2508 = vmatprep.mubr.msk.bf16.mxu1 %vm2701_vm0, %v2700_v1 }
 0x8d4   : > { %v1319_v46 = vpop.f32.mrb[24].mxu1 }
 0x8d5   : > { %v1320_v47 = vadd.f32 %v2280_v45, %v1319_v46  ;;  %v2490_v48 = vpop.f32.mrb[25].mxu1 }
 0x8d6   : > { %v1322_v49 = vpop.f32.mrb[26].mxu1 }
 0x8d7   : > { %v2491_v50 = vpop.f32.mrb[27].mxu1  ;;  %v1325_v51 = vadd.f32 %v1320_v47, %v1170_v32 }
 0x8d9   : > { %v1326_v52 = vsel %vm569_vm1, %v1325_v51, 0.0 }
 0x8da   : > { %1327 = vadd.xlane.f32.xlu0 %v1326_v52 }
 0x967   : > { %v1328_v53 = vpop.xlane.xlu0 %1327 }
 0x968   : > { %v1329_v54 = vmul.f32 0.03125, %v1328_v53 }
 0x96a   : > { %v1330_v55 = vsub.f32 %v1325_v51, %v1329_v54 }
 0x96c   : > { %v1331_v56 = vmul.f32 %v1330_v55, %v1330_v55 }
 0x96e   : > { %v1332_v57 = vsel %vm569_vm1, %v1331_v56, 0.0 }
 0x96f   : > { %1333 = vadd.xlane.f32.xlu0 %v1332_v57 }
 0x9fc   : > { %v1334_v60 = vpop.xlane.xlu0 %1333 }
 0x9fd   : > { %v1335_v61 = vmul.f32 0.03125, %v1334_v60 }
 0x9ff   : > { %v1336_v62 = vadd.f32 1e-05, %v1335_v61 }
 0xa01   : > { %2650 = vrsqrt.f32 %v1336_v62 }
 0xa0b   : > { %v2651_v63 = vpop.eup %2650 }
 0xa0c   : > { %v1338_v2 = vmul.f32 %v2651_v63, %v1330_v55 }
 0xa0e   : > { %v1345_v5 = vmul.f32 %v2286_v0, %v1338_v2 }
 0xa10   : > { %v3030_v6 = vadd.f32 %v2287_v4, %v1345_v5 }
 0xa12   : > { %v1371_v7 = vpack.c.bf16 %v3030_v6, %v3030_v6 }
 0xa14   : > { %2497 = vmatmul.mubr.msk.bf16.vlgmr.msra.gmra.mrb[20].mxu0 %vm569_vm1, %v1371_v7 }
 0xa15   : > { %2502 = vmatprep.mubr.msk.bf16.mxu0 %vm2701_vm0, %v2700_v1 }
 0xae7   : > { %v1427_v9 = vpop.f32.mrb[20].mxu0 }
 0xae8   : > { %v1428_v11 = vadd.f32 %v2300_v8, %v1427_v9  ;;  %v2498_v12 = vpop.f32.mrb[21].mxu0 }
 0xae9   : > { %v1430_v13 = vpop.f32.mrb[22].mxu0 }
 0xaea   : > { %v3040_v14 = vpack.c.bf16 %v1428_v11, %v1428_v11  ;;  %v2499_v15 = vpop.f32.mrb[23].mxu0 }
 0xaec   : > { %1547 = vrot.lane.b32.xlu0 %v3040_v14, %s2705_s27  ;;  %1435 = vrot.lane.b32.xlu1 %v3040_v14, %s2703_s25  ;;  %s3229_s25 = smov 64   ;;  %s3230_s27 = smov 40  }
 0xaf0   : > { %1657 = vrot.lane.b32.xlu0 %v3040_v14, %s2707_s29  ;;  %1545 = vrot.lane.b32.xlu1 %v3040_v14, %s2702_s24  ;;  %s3228_s24 = smov 56   ;;  %s3231_s29 = smov 48  }
 0xaf4   : > { %1769 = vrot.lane.b32.xlu0 %v3040_v14, %s2708_s17  ;;  %1659 = vrot.lane.b32.xlu1 %v3040_v14, %s3226_s16  ;;  %s3232_s17 = smov 8   ;;  %s3235_s16 = sshll.u32 %s2840_s30, 3 }
 0xaf8   : > { %1771 = vrot.lane.b32.xlu1 %v3040_v14, %s3227_s20 }
 0xb5e   : > { %v1436_v16 = vpop.permute.xlu1 %1435  ;;  %v1548_v18 = vpop.permute.xlu0 %1547 }
 0xb5f   : > { %v1441_v17 = vsel %vm617_vm2, %v1436_v16, 0  ;;  %v1553_v20 = vsel %vm617_vm2, %v1548_v18, 0 }
 0xb60   : > { %2501 = vmatpush3.bf16.xpose.msra.mxu0 %v1441_v17 }
 0xb61   : > { %2512 = vmatprep.subr.bf16.mxu0 %v2700_v1 }
 0xb62   : > { %v1546_v19 = vpop.permute.xlu1 %1545  ;;  %v1658_v23 = vpop.permute.xlu0 %1657 }
 0xb66   : > { %v1660_v21 = vpop.permute.xlu1 %1659  ;;  %v1770_v25 = vpop.permute.xlu0 %1769 }
 0xb67   : > { %2503 = vmatmul.mubr.msk.bf16.vlgmr.msra.gmra.mrb[24].mxu0 %vm617_vm2, %v3040_v14  ;;  %v1665_v22 = vsel %vm617_vm2, %v1660_v21, 0 }
 0xb68   : > { %2513 = vmatpush3.bf16.xpose.msra.mxu0 %v1553_v20  ;;  %2514 = vmatprep.mubr.msk.bf16.mxu0 %vm2701_vm0, %v2700_v1 }
 0xb69   : > { %2524 = vmatprep.subr.bf16.mxu0 %v2700_v1 }
 0xb6a   : > { %v1772_v3 = vpop.permute.xlu1 %1771 }
 0xb6b   : > { %v1777_v24 = vsel %vm617_vm2, %v1772_v3, 0 }
 0xb6f   : > { %2515 = vmatmul.mubr.msk.bf16.vlgmr.msra.gmra.mrb[28].mxu0 %vm617_vm2, %v1546_v19 }
 0xb70   : > { %2525 = vmatpush3.bf16.xpose.msra.mxu0 %v1665_v22  ;;  %2526 = vmatprep.mubr.msk.bf16.mxu0 %vm2701_vm0, %v2700_v1 }
 0xb71   : > { %2536 = vmatprep.subr.bf16.mxu0 %v2700_v1 }
 0xb77   : > { %2527 = vmatmul.mubr.msk.bf16.vlgmr.msra.gmra.mrb[32].mxu0 %vm617_vm2, %v1658_v23 }
 0xb78   : > { %2537 = vmatpush3.bf16.xpose.msra.mxu0 %v1777_v24  ;;  %2538 = vmatprep.mubr.msk.bf16.mxu0 %vm2701_vm0, %v2700_v1 }
 0xb79   : > { %2548 = vmatprep.subr.bf16.mxu0 %v2700_v1 }
 0xb7f   : > { %2539 = vmatmul.mubr.msk.bf16.vlgmr.msra.gmra.mrb[36].mxu0 %vm617_vm2, %v1770_v25 }
 0xb80   : > { %2552 = vmatprep.mubr.msk.bf16.mxu0 %vm2701_vm0, %v2700_v1 }
 0xc3a   : > { %v1477_v26 = vpop.f32.mrb[24].mxu0 }
 0xc3b   : > { %v1483_v27 = vmul.f32 0.35355338, %v1477_v26  ;;  %v2504_v28 = vpop.f32.mrb[25].mxu0 }
 0xc3c   : > { %v1480_v29 = vpop.f32.mrb[26].mxu0 }
 0xc3d   : > { %v2505_v30 = vpop.f32.mrb[27].mxu0  ;;  %v1484_v31 = vsel %vm2901_vm6, %v1483_v27, -1e+09 }
 0xc3e   : > { %v1485_v10 = vsel %vm617_vm2, %v1484_v31, -inf }
 0xc3f   : > { %1486 = vmax.xlane.f32.xlu1 %v1485_v10 }
 0xc42   : > { %v1589_v32 = vpop.f32.mrb[28].mxu0 }
 0xc43   : > { %v1595_v33 = vmul.f32 0.35355338, %v1589_v32  ;;  %v2516_v35 = vpop.f32.mrb[29].mxu0 }
 0xc44   : > { %v1592_v36 = vpop.f32.mrb[30].mxu0 }
 0xc45   : > { %v2517_v37 = vpop.f32.mrb[31].mxu0  ;;  %v1596_v38 = vsel %vm2901_vm6, %v1595_v33, -1e+09 }
 0xc46   : > { %v1597_v39 = vsel %vm617_vm2, %v1596_v38, -inf }
 0xc47   : > { %1598 = vmax.xlane.f32.xlu0 %v1597_v39 }
 0xc4a   : > { %v1701_v40 = vpop.f32.mrb[32].mxu0 }
 0xc4b   : > { %v1707_v41 = vmul.f32 0.35355338, %v1701_v40  ;;  %v2528_v42 = vpop.f32.mrb[33].mxu0 }
 0xc4c   : > { %v1704_v43 = vpop.f32.mrb[34].mxu0 }
 0xc4d   : > { %v2529_v44 = vpop.f32.mrb[35].mxu0  ;;  %v1708_v45 = vsel %vm2901_vm6, %v1707_v41, -1e+09 }
 0xc4e   : > { %v1709_v46 = vsel %vm617_vm2, %v1708_v45, -inf  ;;  %v2624_v44 = vld [vmem:[%s3202_s5 + $0x10] sm:$0xff]  }
 0xc4f   : > { %1710 = vmax.xlane.f32.xlu0 %v1709_v46  ;;  %2549 = vmatpush3.bf16.msra.mxu0 %v2624_v44 }
 0xc50   : > { %2550 = vmatprep.subr.bf16.mxu0 %v2700_v1 }
 0xc52   : > { %v1813_v47 = vpop.f32.mrb[36].mxu0 }
 0xc53   : > { %v1819_v48 = vmul.f32 0.35355338, %v1813_v47  ;;  %v2540_v49 = vpop.f32.mrb[37].mxu0 }
 0xc54   : > { %v1816_v50 = vpop.f32.mrb[38].mxu0 }
 0xc55   : > { %v2541_v51 = vpop.f32.mrb[39].mxu0  ;;  %v1820_v52 = vsel %vm2901_vm6, %v1819_v48, -1e+09 }
 0xc56   : > { %v1821_v53 = vsel %vm617_vm2, %v1820_v52, -inf }
 0xc57   : > { %1822 = vmax.xlane.f32.xlu1 %v1821_v53 }
 0xccc   : > { %v1487_v54 = vpop.xlane.xlu1 %1486 }
 0xccd   : > { %v1488_v55 = vsub.f32 %v1484_v31, %v1487_v54 }
 0xccf   : > { %v1489_v56 = vmul.f32 1.442695, %v1488_v55 }
 0xcd1   : > { %2652 = vpow2.f32 %v1489_v56 }
 0xcd4   : > { %v1599_v57 = vpop.xlane.xlu0 %1598 }
 0xcd5   : > { %v1600_v58 = vsub.f32 %v1596_v38, %v1599_v57 }
 0xcd7   : > { %v1601_v59 = vmul.f32 1.442695, %v1600_v58 }
 0xcd9   : > { %2654 = vpow2.f32 %v1601_v59 }
 0xcdb   : > { %v2653_v60 = vpop.eup %2652 }
 0xcdc   : > { %v1711_v61 = vpop.xlane.xlu0 %1710  ;;  %v1491_v62 = vsel %vm617_vm2, %v2653_v60, 0.0 }
 0xcdd   : > { %v1712_v63 = vsub.f32 %v1708_v45, %v1711_v61  ;;  %1492 = vadd.xlane.f32.xlu0 %v1491_v62  ;;  %v2625_v45 = vld [vmem:[%s3202_s5 + $0x18] sm:$0xff]   ;;  %v2312_v61 = vld [vmem:[%s3203_s6 + $0x1] ss:$0 sm:$0xff] }
 0xcde   : > { %2551 = vmatpush3.bf16.msra.mxu0 %v2625_v45 }
 0xcdf   : > { %v1713_v0 = vmul.f32 1.442695, %v1712_v63  ;;  %2564 = vmatprep.subr.bf16.mxu0 %v2700_v1 }
 0xce1   : > { %2656 = vpow2.f32 %v1713_v0 }
 0xce3   : > { %v2655_v34 = vpop.eup %2654 }
 0xce4   : > { %v1603_v2 = vsel %vm617_vm2, %v2655_v34, 0.0  ;;  %v1823_v7 = vpop.xlane.xlu1 %1822 }
 0xce5   : > { %1604 = vadd.xlane.f32.xlu1 %v1603_v2  ;;  %v1824_v8 = vsub.f32 %v1820_v52, %v1823_v7 }
 0xce7   : > { %v1825_v9 = vmul.f32 1.442695, %v1824_v8 }
 0xce9   : > { %2658 = vpow2.f32 %v1825_v9 }
 0xceb   : > { %v2657_v4 = vpop.eup %2656 }
 0xcec   : > { %v1715_v5 = vsel %vm617_vm2, %v2657_v4, 0.0 }
 0xced   : > { %1716 = vadd.xlane.f32.xlu0 %v1715_v5 }
 0xcf3   : > { %v2659_v11 = vpop.eup %2658 }
 0xcf4   : > { %v1827_v12 = vsel %vm617_vm2, %v2659_v11, 0.0 }
 0xcf6   : > { %1609 = vrot.lane.b32.xlu1 %v3040_v14, %s3228_s24 }
 0xd03   : > { %1497 = vrot.lane.b32.xlu0 %v3040_v14, %s3229_s25  ;;  %s517_s25 = scalar_lea.vmem %s3212_s15, %s3235_s16 }
 0xd07   : > { %1833 = vrot.lane.b32.xlu0 %v3040_v14, %s3230_s27 }
 0xd1a   : > { %1828 = vadd.xlane.f32.xlu1 %v1827_v12 }
 0xd2b   : > { %1721 = vrot.lane.b32.xlu1 %v3040_v14, %s3231_s29 }
 0xd6a   : > { %v1493_v13 = vpop.xlane.xlu0 %1492 }
 0xd6b   : > { %2660 = vrcp.f32 %v1493_v13  ;;  %v2626_v13 = vld [vmem:[%s3206_s9 + $0x10] sm:$0xff]  }
 0xd72   : > { %v1605_v15 = vpop.xlane.xlu1 %1604 }
 0xd73   : > { %2662 = vrcp.f32 %v1605_v15  ;;  %v2628_v15 = vld [vmem:[%s3208_s11 + $0x20] sm:$0xff]  }
 0xd75   : > { %v2661_v16 = vpop.eup %2660 }
 0xd76   : > { %v1495_v18 = vmul.f32 %v2661_v16, %v2653_v60  ;;  %v1610_v21 = vpop.permute.xlu1 %1609  ;;  %v2629_v16 = vld [vmem:[%s3208_s11 + $0x28] sm:$0xff]  }
 0xd77   : > { %v1615_v23 = vsel %vm683_vm7, %v1610_v21, 0  ;;  %v2316_v21 = vld [vmem:[%s3204_s7 + $0x1] ss:$0 sm:$0xff] }
 0xd78   : > { %v1496_v22 = vpack.c.bf16 %v1495_v18, %v1495_v18 }
 0xd7a   : > { %v1717_v17 = vpop.xlane.xlu0 %1716 }
 0xd7b   : > { %2664 = vrcp.f32 %v1717_v17 }
 0xd7d   : > { %v2663_v3 = vpop.eup %2662 }
 0xd7e   : > { %v1498_v19 = vpop.permute.xlu0 %1497  ;;  %v1607_v14 = vmul.f32 %v2663_v3, %v2655_v34  ;;  %v2317_v3 = vld [vmem:[%s3205_s8 + $0x1] ss:$0 sm:$0xff] }
 0xd7f   : > { %v1503_v20 = vsel %vm683_vm7, %v1498_v19, 0 }
 0xd80   : > { %2507 = vmatpush3.bf16.msra.mxu1 %v1503_v20  ;;  %v1608_v24 = vpack.c.bf16 %v1607_v14, %v1607_v14 }
 0xd81   : > { %2518 = vmatprep.subr.bf16.mxu1 %v2700_v1 }
 0xd82   : > { %v1834_v30 = vpop.permute.xlu0 %1833 }
 0xd83   : > { %2509 = vmatmul.mubr.msk.bf16.vlgmr.msra.gmra.mrb[28].mxu1 %vm617_vm2, %v1496_v22  ;;  %v1839_v10 = vsel %vm683_vm7, %v1834_v30, 0 }
 0xd84   : > { %2519 = vmatpush3.bf16.msra.mxu1 %v1615_v23  ;;  %2520 = vmatprep.mubr.msk.bf16.mxu1 %vm2701_vm0, %v2700_v1 }
 0xd85   : > { %2530 = vmatprep.subr.bf16.mxu1 %v2700_v1  ;;  %v2665_v25 = vpop.eup %2664 }
 0xd86   : > { %v1719_v27 = vmul.f32 %v2665_v25, %v2657_v4  ;;  %v2630_v25 = vld [vmem:[%s3208_s11 + $0x30] sm:$0xff]  }
 0xd88   : > { %v1720_v31 = vpack.c.bf16 %v1719_v27, %v1719_v27  ;;  %v2334_v27 = vld [vmem:[%s3207_s10 + $0x1] ss:$0 sm:$0xff] }
 0xd8b   : > { %2521 = vmatmul.mubr.msk.bf16.vlgmr.msra.gmra.mrb[32].mxu1 %vm617_vm2, %v1608_v24 }
 0xd8c   : > { %2532 = vmatprep.mubr.msk.bf16.mxu1 %vm2701_vm0, %v2700_v1 }
 0xda7   : > { %v1829_v26 = vpop.xlane.xlu1 %1828 }
 0xda8   : > { %2666 = vrcp.f32 %v1829_v26  ;;  %v2631_v26 = vld [vmem:[%s3208_s11 + $0x38] sm:$0xff]  }
 0xdab   : > { %v1722_v28 = vpop.permute.xlu1 %1721 }
 0xdac   : > { %v1727_v29 = vsel %vm683_vm7, %v1722_v28, 0 }
 0xdad   : > { %2531 = vmatpush3.bf16.msra.mxu1 %v1727_v29 }
 0xdae   : > { %2542 = vmatprep.subr.bf16.mxu1 %v2700_v1 }
 0xdb0   : > { %2533 = vmatmul.mubr.msk.bf16.vlgmr.msra.gmra.mrb[36].mxu1 %vm617_vm2, %v1720_v31 }
 0xdb1   : > { %2543 = vmatpush3.bf16.msra.mxu1 %v1839_v10  ;;  %2544 = vmatprep.mubr.msk.bf16.mxu1 %vm2701_vm0, %v2700_v1 }
 0xdb2   : > { %v2667_v32 = vpop.eup %2666  ;;  %2556 = vmatprep.subr.bf16.mxu1 %v2700_v1 }
 0xdb3   : > { %v1831_v33 = vmul.f32 %v2667_v32, %v2659_v11 }
 0xdb5   : > { %v1832_v35 = vpack.c.bf16 %v1831_v33, %v1831_v33 }
 0xdb8   : > { %2545 = vmatmul.mubr.msk.bf16.vlgmr.msra.gmra.mrb[40].mxu1 %vm617_vm2, %v1832_v35 }
 0xdb9   : > { %2560 = vmatprep.mubr.msk.bf16.mxu1 %vm2701_vm0, %v2700_v1  ;;  %2557 = vmatpush3.bf16.msra.mxu1 %v2626_v13 }
 0xdba   : > { %2558 = vmatprep.subr.bf16.mxu1 %v2700_v1 }
 0xe56   : > { %v1539_v36 = vpop.f32.mrb[28].mxu1 }
 0xe57   : > { %v2510_v37 = vpop.f32.mrb[29].mxu1 }
 0xe58   : > { %v1542_v38 = vpop.f32.mrb[30].mxu1 }
 0xe59   : > { %v2511_v39 = vpop.f32.mrb[31].mxu1 }
 0xe5e   : > { %v1651_v40 = vpop.f32.mrb[32].mxu1 }
 0xe5f   : > { %1882 = vrot.lane.b32.xlu1 %v1651_v40, %s3232_s17  ;;  %v2522_v41 = vpop.f32.mrb[33].mxu1 }
 0xe60   : > { %v1654_v42 = vpop.f32.mrb[34].mxu1 }
 0xe61   : > { %v2523_v43 = vpop.f32.mrb[35].mxu1 }
 0xe83   : > { %v1763_v46 = vpop.f32.mrb[36].mxu1 }
 0xe84   : > { %1886 = vrot.lane.b32.xlu0 %v1763_v46, %s3233_s26  ;;  %v2534_v47 = vpop.f32.mrb[37].mxu1 }
 0xe85   : > { %v1766_v48 = vpop.f32.mrb[38].mxu1 }
 0xe86   : > { %v2535_v49 = vpop.f32.mrb[39].mxu1 }
 0xe8b   : > { %v1875_v50 = vpop.f32.mrb[40].mxu1 }
 0xe8c   : > { %1890 = vrot.lane.b32.xlu1 %v1875_v50, %s3234_s28  ;;  %v2546_v51 = vpop.f32.mrb[41].mxu1 }
 0xe8d   : > { %v1878_v52 = vpop.f32.mrb[42].mxu1  ;;  %v2344_v51 = vld [vmem:[%s3210_s13 + $0x1] ss:$0 sm:$0xff] }
 0xe8e   : > { %v2547_v53 = vpop.f32.mrb[43].mxu1 }
 0xe8f   : > { %v2345_v53 = vld [vmem:[%s3211_s14 + $0x1] ss:$0 sm:$0xff] }
 0xed1   : > { %v1883_v54 = vpop.permute.xlu1 %1882 }
 0xed2   : > { %v1893_v56 = vsel %vm617_vm2, %v1539_v36, %v1883_v54 }
 0xef6   : > { %v1887_v55 = vpop.permute.xlu0 %1886 }
 0xef7   : > { %v1894_v57 = vsel %vm1076_vm8, %v1893_v56, %v1887_v55 }
 0xefe   : > { %v1891_v58 = vpop.permute.xlu1 %1890 }
 0xeff   : > { %v1895_v59 = vsel %vm1078_vm9, %v1894_v57, %v1891_v58 }
 0xf00   : > { %v1896_v60 = vpack.c.bf16 %v1895_v59, %v1895_v59 }
 0xf02   : > { %2553 = vmatmul.mubr.msk.bf16.vlgmr.msra.gmra.mrb[40].mxu0 %vm569_vm1, %v1896_v60 }
 0xf03   : > { %2572 = vmatprep.mubr.msk.bf16.mxu0 %vm2701_vm0, %v2700_v1  ;;  %2565 = vmatpush3.bf16.msra.mxu0 %v2628_v15 }
 0xf04   : > { %2566 = vmatprep.subr.bf16.mxu0 %v2700_v1 }
 0xf07   : > { %2567 = vmatpush3.bf16.msra.mxu0 %v2629_v16 }
 0xf08   : > { %2568 = vmatprep.subr.bf16.mxu0 %v2700_v1 }
 0xf0b   : > { %2569 = vmatpush3.bf16.msra.mxu0 %v2630_v25 }
 0xf0c   : > { %2570 = vmatprep.subr.bf16.mxu0 %v2700_v1  ;;  %v2338_v1 = vld [vmem:[%s3209_s12 + $0x1] ss:$0 sm:$0xff] }
 0xf0f   : > { %2571 = vmatpush3.bf16.msra.mxu0 %v2631_v26 }
 0xfd5   : > { %v1952_v62 = vpop.f32.mrb[40].mxu0 }
 0xfd6   : > { %v1953_v63 = vadd.f32 %v2312_v61, %v1952_v62  ;;  %v2554_v0 = vpop.f32.mrb[41].mxu0 }
 0xfd7   : > { %v1955_v34 = vpop.f32.mrb[42].mxu0 }
 0xfd8   : > { %v2555_v2 = vpop.f32.mrb[43].mxu0  ;;  %v1958_v4 = vadd.f32 %v1953_v63, %v3030_v6  ;;  %v2627_v6 = vld [vmem:[%s3206_s9 + $0x18] sm:$0xff]  }
 0xfd9   : > { %2559 = vmatpush3.bf16.msra.mxu1 %v2627_v6 }
 0xfda   : > { %v1959_v5 = vsel %vm569_vm1, %v1958_v4, 0.0 }
 0xfdb   : > { %1960 = vadd.xlane.f32.xlu0 %v1959_v5 }
0x1068   : > { %v1961_v7 = vpop.xlane.xlu0 %1960 }
0x1069   : > { %v1962_v8 = vmul.f32 0.03125, %v1961_v7 }
0x106b   : > { %v1963_v9 = vsub.f32 %v1958_v4, %v1962_v8 }
0x106d   : > { %v1964_v11 = vmul.f32 %v1963_v9, %v1963_v9 }
0x106f   : > { %v1965_v12 = vsel %vm569_vm1, %v1964_v11, 0.0 }
0x1070   : > { %1966 = vadd.xlane.f32.xlu1 %v1965_v12 }
0x10fd   : > { %v1967_v17 = vpop.xlane.xlu1 %1966 }
0x10fe   : > { %v1968_v18 = vmul.f32 0.03125, %v1967_v17 }
0x1100   : > { %v1969_v19 = vadd.f32 1e-05, %v1968_v18 }
0x1102   : > { %2668 = vrsqrt.f32 %v1969_v19 }
0x110c   : > { %v2669_v20 = vpop.eup %2668 }
0x110d   : > { %v1971_v22 = vmul.f32 %v2669_v20, %v1963_v9 }
0x110f   : > { %v1978_v23 = vmul.f32 %v2316_v21, %v1971_v22 }
0x1111   : > { %v1985_v14 = vadd.f32 %v2317_v3, %v1978_v23 }
0x1113   : > { %v2008_v24 = vpack.c.bf16 %v1985_v14, %v1985_v14 }
0x1115   : > { %2561 = vmatmul.mubr.msk.bf16.vlgmr.msra.gmra.mrb[44].mxu1 %vm569_vm1, %v2008_v24 }
0x11e8   : > { %v2064_v28 = vpop.f32.mrb[44].mxu1 }
0x11e9   : > { %v2065_v29 = vadd.f32 %v2334_v27, %v2064_v28  ;;  %v2562_v30 = vpop.f32.mrb[45].mxu1 }
0x11ea   : > { %v2067_v31 = vpop.f32.mrb[46].mxu1 }
0x11eb   : > { %v2070_v10 = vmax.f32 %v2065_v29, 0.0  ;;  %v2563_v32 = vpop.f32.mrb[47].mxu1 }
0x11ed   : > { %v2071_v33 = vpack.c.bf16 %v2070_v10, %v2070_v10 }
0x11ef   : > { %2573 = vmatmul.mubr.msk.bf16.vlgmr.msra.gmra.mrb[44].mxu0 %vm1281_vm10, %v2071_v33 }
0x12c2   : > { %v2139_v35 = vpop.f32.mrb[44].mxu0 }
0x12c3   : > { %v2140_v36 = vadd.f32 %v2338_v1, %v2139_v35  ;;  %v2574_v37 = vpop.f32.mrb[45].mxu0 }
0x12c4   : > { %v2142_v38 = vpop.f32.mrb[46].mxu0 }
0x12c5   : > { %v2575_v39 = vpop.f32.mrb[47].mxu0  ;;  %v2145_v40 = vadd.f32 %v2140_v36, %v1985_v14 }
0x12c7   : > { %v2146_v41 = vsel %vm569_vm1, %v2145_v40, 0.0 }
0x12c8   : > { %2147 = vadd.xlane.f32.xlu0 %v2146_v41 }
0x1355   : > { %v2148_v42 = vpop.xlane.xlu0 %2147 }
0x1356   : > { %v2149_v43 = vmul.f32 0.03125, %v2148_v42 }
0x1358   : > { %v2150_v44 = vsub.f32 %v2145_v40, %v2149_v43 }
0x135a   : > { %v2151_v45 = vmul.f32 %v2150_v44, %v2150_v44 }
0x135c   : > { %v2152_v46 = vsel %vm569_vm1, %v2151_v45, 0.0 }
0x135d   : > { %2153 = vadd.xlane.f32.xlu0 %v2152_v46 }
0x13ea   : > { %v2154_v47 = vpop.xlane.xlu0 %2153 }
0x13eb   : > { %v2155_v48 = vmul.f32 0.03125, %v2154_v47 }
0x13ed   : > { %v2156_v49 = vadd.f32 1e-05, %v2155_v48 }
0x13ef   : > { %2670 = vrsqrt.f32 %v2156_v49 }
0x13f9   : > { %v2671_v50 = vpop.eup %2670 }
0x13fa   : > { %v2158_v52 = vmul.f32 %v2671_v50, %v2150_v44 }
0x13fc   : > { %v2165_v54 = vmul.f32 %v2344_v51, %v2158_v52 }
0x13fe   : > { %v2172_v55 = vadd.f32 %v2345_v53, %v2165_v54 }
0x1400   : > { %2173 = vst.msk [vmem:[%s517_s25] sm:$0xff] %vm569_vm1, %v2172_v55 }
0x1401 PF: > { %s26_s18 = sadd.s32 1, %s2697_s18  }
0x1402   : > { %p23_p1 = scmp.ge.s32.totalorder %s26_s18, 6  }
0x1404   :  { %25 = sbr.rel (!%p23_p1) target bundleno = 1 (0x1), region = 130 }
0x140b   :  { %2193 = vsyncpa [#allocation3], 1 }
0x140c   :  { %2195 = vsyncpa [#allocation3 + $0x1], 1 }

// kernel: transformer_forward.6
= control target key start
LH: loop header
LB: loop body
LE: loop exit
PB: predicated region body
PF: predicated region fallthrough
CT: control target
= control target key end

     0   :  { %s5230_s0 = inlined_call_operand.vmem [shape: f32[4,8,32], index: 0, kind: input, shape index: {}]   ;;  %s5231_s1 = inlined_call_operand.vmem [shape: f32[4,8,32], index: 1, kind: input, shape index: {}]   ;;  %s5232_s2 = inlined_call_operand.vmem [shape: f32[4,1,8], index: 2, kind: input, shape index: {}]   ;;  %s5233_s3 = inlined_call_operand.vmem [shape: bf16[2,32,96], index: 3, kind: input, shape index: {}]   ;;  %s5234_s4 = inlined_call_operand.vmem [shape: f32[2,1,96], index: 4, kind: input, shape index: {}]   ;;  %s5235_s5 = inlined_call_operand.vmem [shape: bf16[2,32,32], index: 5, kind: input, shape index: {}]   ;;  %s5236_s6 = inlined_call_operand.vmem [shape: f32[2,1,32], index: 6, kind: input, shape index: {}]   ;;  %s5237_s7 = inlined_call_operand.vmem [shape: f32[2,1,32], index: 7, kind: input, shape index: {}]   ;;  %s5238_s8 = inlined_call_operand.vmem [shape: f32[2,1,32], index: 8, kind: input, shape index: {}]   ;;  %s5239_s9 = inlined_call_operand.vmem [shape: bf16[2,32,96], index: 9, kind: input, shape index: {}]   ;;  %s5240_s10 = inlined_call_operand.vmem [shape: f32[2,1,96], index: 10, kind: input, shape index: {}]   ;;  %s5241_s11 = inlined_call_operand.vmem [shape: bf16[2,32,32], index: 11, kind: input, shape index: {}]   ;;  %s5242_s12 = inlined_call_operand.vmem [shape: f32[2,1,32], index: 12, kind: input, shape index: {}]   ;;  %s5243_s13 = inlined_call_operand.vmem [shape: f32[2,1,32], index: 13, kind: input, shape index: {}]   ;;  %s5244_s14 = inlined_call_operand.vmem [shape: f32[2,1,32], index: 14, kind: input, shape index: {}]   ;;  %s5245_s15 = inlined_call_operand.vmem [shape: bf16[2,32,64], index: 15, kind: input, shape index: {}]   ;;  %s5246_s16 = inlined_call_operand.vmem [shape: f32[2,1,64], index: 16, kind: input, shape index: {}]   ;;  %s5247_s17 = inlined_call_operand.vmem [shape: bf16[2,64,32], index: 17, kind: input, shape index: {}]   ;;  %s5248_s18 = inlined_call_operand.vmem [shape: f32[2,1,32], index: 18, kind: input, shape index: {}]   ;;  %s5249_s19 = inlined_call_operand.vmem [shape: f32[2,1,32], index: 19, kind: input, shape index: {}]   ;;  %s5250_s20 = inlined_call_operand.vmem [shape: f32[2,1,32], index: 20, kind: input, shape index: {}]   ;;  %s5251_s21 = inlined_call_operand.vmem [shape: f32[4,8,32], index: 21, kind: output, shape index: {}]  }
   0x1   :  { %5281 = sst [smem:[#allocation4_spill]] %s5230_s0 }
   0x2   :  { %5282 = sst [smem:[#allocation5_spill]] %s5231_s1 }
   0x3   :  { %5283 = sst [smem:[#allocation6_spill]] %s5232_s2  ;;  %s4599_s2 = smov 0  }
   0x4   :  { %5284 = sst [smem:[#allocation7_spill]] %s5233_s3 }
   0x5   :  { %5285 = sst [smem:[#allocation8_spill]] %s5234_s4 }
   0x6   :  { %5286 = sst [smem:[#allocation9_spill]] %s5235_s5 }
   0x7   :  { %5287 = sst [smem:[#allocation10_spill]] %s5242_s12 }
   0x8   :  { %5288 = sst [smem:[#allocation11_spill]] %s5251_s21 }
   0x9 LB: > { %5289 = sst [smem:[#allocation2_spill]] %s4470_s2  ;;  %s3765_s25 = sadd.s32 4294967295, %s4470_s2   ;;  %s4470_s2 = sphi %s4599_s2, %s31_s2  }
   0xa   : > { %p3769_p0 = scmp.ge.s32.totalorder %s4470_s2, 1  ;;  %p603_p1 = scmp.lt.s32.totalorder %s4470_s2, 5 }
   0xc   : > { %p604_p2 = pnand %p3769_p0, %p603_p1 }
   0xe   : > { %607 = sbr.rel (%p604_p2) target bundleno = 8670 (0x21de), region = 104 }
  0x15   : > { %s5290_s3 = sld [smem:[#allocation7_spill]]  ;;  %v4472_v1 = vmov 0.0   ;;  %vm4473_vm0 = vmmov 0   ;;  %p668_p3 = scmp.lt.s32.totalorder %s3765_s25, 3  ;;  %vm732_vm1 = vcmask 261120   ;;  %vm780_vm2 = vcmask 64512  }
  0x16   : > { %4023 = vmatprep.subr.bf16.mxu1 %v4472_v1  ;;  %4037 = vmatprep.subr.bf16.mxu0 %v4472_v1  ;;  %s5292_s5 = sld [smem:[#allocation4_spill]]  ;;  %s5293_s24 = sld [smem:[#allocation8_spill]]  ;;  %v687_v23 = vlaneseq  ;;  %v4481_v28 = vmov 0   ;;  %vm846_vm7 = vcmask 1043456   ;;  %vm1239_vm8 = vcmask 130048  }
  0x17   : > { %4027 = vmatprep.mubr.msk.bf16.mxu1 %vm4473_vm0, %v4472_v1  ;;  %4039 = vmatprep.mubr.msk.bf16.mxu0 %vm4473_vm0, %v4472_v1  ;;  %s5319_s25 = smov (!%p668_p3, %s3765_s25), 3  ;;  %s5273_s26 = smov 120   ;;  %vm1241_vm9 = vcmask 195584   ;;  %vm2120_vm10 = vcmask 523264  }
  0x18   : > { %s4623_s0 = sshll.u32 %s5319_s25, 3  ;;  %s5277_s27 = smov 96   ;;  %v688_v25 = vshrl.u32 %v687_v23, 7  ;;  %v690_v27 = vand.u32 127, %v687_v23 }
  0x19   : > { %5291 = sst [smem:[#allocation3_spill]] %s4623_s0  ;;  %s5255_s28 = smov 80  }
  0x1a   : > { %s5263_s29 = smov 88   ;;  %s5261_s4 = smov 72   ;;  %v697_v26 = vsub.s32 0, %v688_v25  ;;  %v691_v31 = vsub.s32 %v690_v27, %v688_v25 }
  0x1b   : > { %v4360_v0 = vld [vmem:[%s5290_s3] sm:$0xff]   ;;  %v4361_v2 = vld [vmem:[%s5290_s3 + $0x8] sm:$0xff]   ;;  %s5275_s30 = smov 112   ;;  %s5294_s1 = sld [smem:[#allocation6_spill]] }
  0x1c   : > { %4024 = vmatpush3.bf16.msra.mxu1 %v4360_v0  ;;  %s671_s22 = scalar_lea.vmem %s5292_s5, %s4623_s0  ;;  %v3773_v5 = vld [vmem:[%s5293_s24] ss:$0 sm:$0xff]  ;;  %s5271_s5 = smov 104   ;;  %vm692_vm5 = vcmp.le.s32.totalorder %v691_v31, 0 }
  0x1d   : > { %4025 = vmatprep.subr.bf16.mxu1 %v4472_v1  ;;  %v4630_v3 = vld [vmem:[%s671_s22] sm:$0xff]  ;;  %s5258_s22 = smov 40   ;;  %s5257_s23 = smov 48  }
  0x1e   : > { %v713_v4 = vpack.c.bf16 %v4630_v3, %v4630_v3  ;;  %s5305_s12 = sld [smem:[#allocation10_spill]]  ;;  %s5310_s21 = smov 56  }
  0x1f   : > { %s5311_s2 = smov 64  }
  0x20   : > { %4026 = vmatpush3.bf16.msra.mxu1 %v4361_v2 }
  0x21   : > { %4031 = vmatprep.subr.bf16.mxu1 %v4472_v1 }
  0x23   : > { %4028 = vmatmul.mubr.msk.bf16.vlgmr.msra.gmra.mrb[0].mxu1 %vm732_vm1, %v713_v4 }
  0x24   : > { %4033 = vmatprep.mubr.msk.bf16.mxu1 %vm4473_vm0, %v4472_v1 }
  0xf6   : > { %v770_v6 = vpop.f32.mrb[0].mxu1 }
  0xf7   : > { %v771_v7 = vadd.f32 %v3773_v5, %v770_v6  ;;  %v4029_v8 = vpop.f32.mrb[1].mxu1 }
  0xf8   : > { %v773_v9 = vpop.f32.mrb[2].mxu1 }
  0xf9   : > { %v4640_v10 = vpack.c.bf16 %v771_v7, %v771_v7  ;;  %v4030_v11 = vpop.f32.mrb[3].mxu1 }
  0xfb   : > { %890 = vrot.lane.b32.xlu1 %v4640_v10, %s5273_s26  ;;  %778 = vrot.lane.b32.xlu0 %v4640_v10, %s5277_s27 }
  0xff   : > { %1004 = vrot.lane.b32.xlu1 %v4640_v10, %s5255_s28  ;;  %892 = vrot.lane.b32.xlu0 %v4640_v10, %s5263_s29  ;;  %s678_s28 = scalar_lea.vmem %s5294_s1, %s5319_s25  ;;  %s5260_s25 = smov 56  }
 0x100   : > { %v686_v24 = vld [vmem:[%s678_s28] sm:$0x1]  ;;  %s5259_s28 = smov 64   ;;  %s5269_s1 = smov 8  }
 0x101   : > { %vm693_vm3 = vcmp.gt.f32.partialorder %v686_v24, 0.5  ;;  %s5267_s29 = smov 16  }
 0x102   : > { %v694_v29 = vsel %vm693_vm3, 1, %v4481_v28 }
 0x103   : > { %1116 = vrot.lane.b32.xlu1 %v4640_v10, %s5261_s4  ;;  %1002 = vrot.lane.b32.xlu0 %v4640_v10, %s5275_s30  ;;  %v698_v30 = vrot.slane %v694_v29, %v697_v26  ;;  %s5299_s4 = smov 88  }
 0x105   : > { %vm699_vm4 = vcmp.eq.s32.totalorder %v698_v30, 1 }
 0x106   : > { %vm4681_vm6 = vmand %vm692_vm5, %vm699_vm4 }
 0x107   : > { %1114 = vrot.lane.b32.xlu0 %v4640_v10, %s5271_s5 }
 0x16d   : > { %v779_v12 = vpop.permute.xlu0 %778  ;;  %v891_v15 = vpop.permute.xlu1 %890 }
 0x16e   : > { %v785_v13 = vsel %vm780_vm2, %v779_v12, 0 }
 0x16f   : > { %4032 = vmatpush3.bf16.xpose.msra.mxu1 %v785_v13 }
 0x170   : > { %4043 = vmatprep.subr.bf16.mxu1 %v4472_v1 }
 0x171   : > { %v893_v14 = vpop.permute.xlu0 %892  ;;  %v1005_v17 = vpop.permute.xlu1 %1004 }
 0x172   : > { %v898_v16 = vsel %vm780_vm2, %v893_v14, 0  ;;  %v1010_v18 = vsel %vm780_vm2, %v1005_v17, 0 }
 0x175   : > { %v1117_v19 = vpop.permute.xlu1 %1116  ;;  %v1003_v20 = vpop.permute.xlu0 %1002 }
 0x176   : > { %4034 = vmatmul.mubr.msk.bf16.vlgmr.msra.gmra.mrb[4].mxu1 %vm780_vm2, %v4640_v10  ;;  %v1122_v21 = vsel %vm780_vm2, %v1117_v19, 0 }
 0x177   : > { %4044 = vmatpush3.bf16.xpose.msra.mxu1 %v898_v16  ;;  %4045 = vmatprep.mubr.msk.bf16.mxu1 %vm4473_vm0, %v4472_v1 }
 0x178   : > { %4055 = vmatprep.subr.bf16.mxu1 %v4472_v1 }
 0x179   : > { %v1115_v22 = vpop.permute.xlu0 %1114 }
 0x17e   : > { %4046 = vmatmul.mubr.msk.bf16.vlgmr.msra.gmra.mrb[8].mxu1 %vm780_vm2, %v891_v15 }
 0x17f   : > { %4056 = vmatpush3.bf16.xpose.msra.mxu1 %v1010_v18  ;;  %4057 = vmatprep.mubr.msk.bf16.mxu1 %vm4473_vm0, %v4472_v1 }
 0x180   : > { %4067 = vmatprep.subr.bf16.mxu1 %v4472_v1 }
 0x186   : > { %4058 = vmatmul.mubr.msk.bf16.vlgmr.msra.gmra.mrb[12].mxu1 %vm780_vm2, %v1003_v20 }
 0x187   : > { %4068 = vmatpush3.bf16.xpose.msra.mxu1 %v1122_v21  ;;  %4069 = vmatprep.mubr.msk.bf16.mxu1 %vm4473_vm0, %v4472_v1 }
 0x188   : > { %4079 = vmatprep.subr.bf16.mxu1 %v4472_v1 }
 0x18e   : > { %4070 = vmatmul.mubr.msk.bf16.vlgmr.msra.gmra.mrb[16].mxu1 %vm780_vm2, %v1115_v22 }
 0x18f   : > { %4083 = vmatprep.mubr.msk.bf16.mxu1 %vm4473_vm0, %v4472_v1 }
 0x249   : > { %v821_v32 = vpop.f32.mrb[4].mxu1 }
 0x24a   : > { %v827_v34 = vmul.f32 0.35355338, %v821_v32  ;;  %v4035_v35 = vpop.f32.mrb[5].mxu1 }
 0x24b   : > { %v824_v36 = vpop.f32.mrb[6].mxu1 }
 0x24c   : > { %v4036_v37 = vpop.f32.mrb[7].mxu1  ;;  %v828_v38 = vsel %vm4681_vm6, %v827_v34, -1e+09 }
 0x24d   : > { %v829_v39 = vsel %vm780_vm2, %v828_v38, -inf }
 0x24e   : > { %830 = vmax.xlane.f32.xlu1 %v829_v39 }
 0x251   : > { %v934_v40 = vpop.f32.mrb[8].mxu1 }
 0x252   : > { %v940_v41 = vmul.f32 0.35355338, %v934_v40  ;;  %v4047_v42 = vpop.f32.mrb[9].mxu1 }
 0x253   : > { %v937_v43 = vpop.f32.mrb[10].mxu1 }
 0x254   : > { %v4048_v44 = vpop.f32.mrb[11].mxu1  ;;  %v941_v45 = vsel %vm4681_vm6, %v940_v41, -1e+09 }
 0x255   : > { %v942_v46 = vsel %vm780_vm2, %v941_v45, -inf }
 0x256   : > { %943 = vmax.xlane.f32.xlu0 %v942_v46 }
 0x259   : > { %v1046_v47 = vpop.f32.mrb[12].mxu1 }
 0x25a   : > { %v1052_v48 = vmul.f32 0.35355338, %v1046_v47  ;;  %v4059_v49 = vpop.f32.mrb[13].mxu1 }
 0x25b   : > { %v1049_v50 = vpop.f32.mrb[14].mxu1 }
 0x25c   : > { %v4060_v51 = vpop.f32.mrb[15].mxu1  ;;  %v1053_v52 = vsel %vm4681_vm6, %v1052_v48, -1e+09 }
 0x25d   : > { %v1054_v53 = vsel %vm780_vm2, %v1053_v52, -inf }
 0x25e   : > { %1055 = vmax.xlane.f32.xlu0 %v1054_v53 }
 0x261   : > { %v1158_v54 = vpop.f32.mrb[16].mxu1 }
 0x262   : > { %v1164_v55 = vmul.f32 0.35355338, %v1158_v54  ;;  %v4071_v56 = vpop.f32.mrb[17].mxu1 }
 0x263   : > { %v1161_v57 = vpop.f32.mrb[18].mxu1 }
 0x264   : > { %v4072_v58 = vpop.f32.mrb[19].mxu1  ;;  %v1165_v59 = vsel %vm4681_vm6, %v1164_v55, -1e+09 }
 0x265   : > { %v1166_v60 = vsel %vm780_vm2, %v1165_v59, -inf }
 0x266   : > { %1167 = vmax.xlane.f32.xlu1 %v1166_v60 }
 0x2db   : > { %v831_v61 = vpop.xlane.xlu1 %830 }
 0x2dc   : > { %v832_v62 = vsub.f32 %v828_v38, %v831_v61 }
 0x2de   : > { %v833_v63 = vmul.f32 1.442695, %v832_v62 }
 0x2e0   : > { %4388 = vpow2.f32 %v833_v63 }
 0x2e3   : > { %v944_v0 = vpop.xlane.xlu0 %943 }
 0x2e4   : > { %v945_v2 = vsub.f32 %v941_v45, %v944_v0 }
 0x2e6   : > { %v946_v4 = vmul.f32 1.442695, %v945_v2 }
 0x2e8   : > { %4390 = vpow2.f32 %v946_v4 }
 0x2ea   : > { %v4389_v5 = vpop.eup %4388 }
 0x2eb   : > { %v1056_v6 = vpop.xlane.xlu0 %1055  ;;  %v835_v7 = vsel %vm780_vm2, %v4389_v5, 0.0 }
 0x2ec   : > { %v1057_v8 = vsub.f32 %v1053_v52, %v1056_v6  ;;  %836 = vadd.xlane.f32.xlu0 %v835_v7  ;;  %v3785_v7 = vld [vmem:[%s5236_s6] ss:$0 sm:$0xff] }
 0x2ee   : > { %v1058_v9 = vmul.f32 1.442695, %v1057_v8 }
 0x2f0   : > { %4392 = vpow2.f32 %v1058_v9 }
 0x2f2   : > { %v4391_v11 = vpop.eup %4390 }
 0x2f3   : > { %v948_v12 = vsel %vm780_vm2, %v4391_v11, 0.0  ;;  %v1168_v15 = vpop.xlane.xlu1 %1167 }
 0x2f4   : > { %949 = vadd.xlane.f32.xlu1 %v948_v12  ;;  %v1169_v16 = vsub.f32 %v1165_v59, %v1168_v15 }
 0x2f6   : > { %v1170_v17 = vmul.f32 1.442695, %v1169_v16  ;;  %v4364_v16 = vld [vmem:[%s5239_s9] sm:$0xff]  }
 0x2f8   : > { %4394 = vpow2.f32 %v1170_v17  ;;  %v4365_v17 = vld [vmem:[%s5239_s9 + $0x8] sm:$0xff]  }
 0x2fa   : > { %v4393_v13 = vpop.eup %4392 }
 0x2fb   : > { %v1060_v14 = vsel %vm780_vm2, %v4393_v13, 0.0 }
 0x2fc   : > { %1061 = vadd.xlane.f32.xlu0 %v1060_v14 }
 0x302   : > { %v4395_v18 = vpop.eup %4394 }
 0x303   : > { %v1172_v19 = vsel %vm780_vm2, %v4395_v18, 0.0 }
 0x305   : > { %954 = vrot.lane.b32.xlu1 %v4640_v10, %s5260_s25  ;;  %s5300_s25 = smov 72  }
 0x312   : > { %841 = vrot.lane.b32.xlu0 %v4640_v10, %s5259_s28  ;;  %s5297_s28 = sld [smem:[#allocation9_spill]] }
 0x316   : > { %1178 = vrot.lane.b32.xlu0 %v4640_v10, %s5258_s22  ;;  %s5265_s22 = smov 24  }
 0x318   : > { %v4362_v52 = vld [vmem:[%s5297_s28] sm:$0xff]   ;;  %v4363_v53 = vld [vmem:[%s5297_s28 + $0x8] sm:$0xff]  }
 0x319   : > { %4080 = vmatpush3.bf16.msra.mxu1 %v4362_v52 }
 0x31a   : > { %4081 = vmatprep.subr.bf16.mxu1 %v4472_v1 }
 0x31d   : > { %4082 = vmatpush3.bf16.msra.mxu1 %v4363_v53 }
 0x31e   : > { %4095 = vmatprep.subr.bf16.mxu1 %v4472_v1 }
 0x329   : > { %1173 = vadd.xlane.f32.xlu1 %v1172_v19 }
 0x33a   : > { %1066 = vrot.lane.b32.xlu1 %v4640_v10, %s5257_s23  ;;  %s5309_s23 = smov 104  }
 0x379   : > { %v837_v20 = vpop.xlane.xlu0 %836 }
 0x37a   : > { %4396 = vrcp.f32 %v837_v20 }
 0x381   : > { %v950_v21 = vpop.xlane.xlu1 %949 }
 0x382   : > { %4398 = vrcp.f32 %v950_v21 }
 0x384   : > { %v4397_v22 = vpop.eup %4396 }
 0x385   : > { %v839_v24 = vmul.f32 %v4397_v22, %v4389_v5  ;;  %v955_v27 = vpop.permute.xlu1 %954 }
 0x386   : > { %v960_v30 = vsel %vm846_vm7, %v955_v27, 0 }
 0x387   : > { %v840_v28 = vpack.c.bf16 %v839_v24, %v839_v24 }
 0x389   : > { %v1062_v23 = vpop.xlane.xlu0 %1061 }
 0x38a   : > { %4400 = vrcp.f32 %v1062_v23  ;;  %v3791_v23 = vld [vmem:[%s5240_s10] ss:$0 sm:$0xff] }
 0x38c   : > { %v4399_v29 = vpop.eup %4398 }
 0x38d   : > { %v842_v25 = vpop.permute.xlu0 %841  ;;  %v952_v10 = vmul.f32 %v4399_v29, %v4391_v11 }
 0x38e   : > { %v848_v26 = vsel %vm846_vm7, %v842_v25, 0 }
 0x38f   : > { %4038 = vmatpush3.bf16.msra.mxu0 %v848_v26  ;;  %v953_v31 = vpack.c.bf16 %v952_v10, %v952_v10  ;;  %v3789_v10 = vld [vmem:[%s5237_s7] ss:$0 sm:$0xff] }
 0x390   : > { %4049 = vmatprep.subr.bf16.mxu0 %v4472_v1 }
 0x391   : > { %v1179_v38 = vpop.permute.xlu0 %1178 }
 0x392   : > { %4040 = vmatmul.mubr.msk.bf16.vlgmr.msra.gmra.mrb[0].mxu0 %vm780_vm2, %v840_v28  ;;  %v1184_v40 = vsel %vm846_vm7, %v1179_v38, 0 }
 0x393   : > { %4050 = vmatpush3.bf16.msra.mxu0 %v960_v30  ;;  %4051 = vmatprep.mubr.msk.bf16.mxu0 %vm4473_vm0, %v4472_v1 }
 0x394   : > { %4061 = vmatprep.subr.bf16.mxu0 %v4472_v1  ;;  %v4401_v32 = vpop.eup %4400 }
 0x395   : > { %v1064_v35 = vmul.f32 %v4401_v32, %v4393_v13  ;;  %v3790_v32 = vld [vmem:[%s5238_s8] ss:$0 sm:$0xff] }
 0x397   : > { %v1065_v39 = vpack.c.bf16 %v1064_v35, %v1064_v35 }
 0x39a   : > { %4052 = vmatmul.mubr.msk.bf16.vlgmr.msra.gmra.mrb[4].mxu0 %vm780_vm2, %v953_v31 }
 0x39b   : > { %4063 = vmatprep.mubr.msk.bf16.mxu0 %vm4473_vm0, %v4472_v1 }
 0x3b6   : > { %v1174_v34 = vpop.xlane.xlu1 %1173 }
 0x3b7   : > { %4402 = vrcp.f32 %v1174_v34 }
 0x3ba   : > { %v1067_v36 = vpop.permute.xlu1 %1066 }
 0x3bb   : > { %v1072_v37 = vsel %vm846_vm7, %v1067_v36, 0 }
 0x3bc   : > { %4062 = vmatpush3.bf16.msra.mxu0 %v1072_v37 }
 0x3bd   : > { %4073 = vmatprep.subr.bf16.mxu0 %v4472_v1 }
 0x3bf   : > { %4064 = vmatmul.mubr.msk.bf16.vlgmr.msra.gmra.mrb[8].mxu0 %vm780_vm2, %v1065_v39 }
 0x3c0   : > { %4074 = vmatpush3.bf16.msra.mxu0 %v1184_v40  ;;  %4075 = vmatprep.mubr.msk.bf16.mxu0 %vm4473_vm0, %v4472_v1 }
 0x3c1   : > { %v4403_v41 = vpop.eup %4402  ;;  %4087 = vmatprep.subr.bf16.mxu0 %v4472_v1 }
 0x3c2   : > { %v1176_v42 = vmul.f32 %v4403_v41, %v4395_v18 }
 0x3c4   : > { %v1177_v43 = vpack.c.bf16 %v1176_v42, %v1176_v42 }
 0x3c7   : > { %4076 = vmatmul.mubr.msk.bf16.vlgmr.msra.gmra.mrb[12].mxu0 %vm780_vm2, %v1177_v43 }
 0x3c8   : > { %4091 = vmatprep.mubr.msk.bf16.mxu0 %vm4473_vm0, %v4472_v1  ;;  %4088 = vmatpush3.bf16.msra.mxu0 %v4364_v16 }
 0x3c9   : > { %4089 = vmatprep.subr.bf16.mxu0 %v4472_v1 }
 0x3cc   : > { %4090 = vmatpush3.bf16.msra.mxu0 %v4365_v17 }
 0x3cd   : > { %4103 = vmatprep.subr.bf16.mxu0 %v4472_v1 }
 0x465   : > { %v884_v44 = vpop.f32.mrb[0].mxu0 }
 0x466   : > { %v4041_v45 = vpop.f32.mrb[1].mxu0 }
 0x467   : > { %v887_v46 = vpop.f32.mrb[2].mxu0 }
 0x468   : > { %v4042_v47 = vpop.f32.mrb[3].mxu0 }
 0x46d   : > { %v996_v48 = vpop.f32.mrb[4].mxu0 }
 0x46e   : > { %1227 = vrot.lane.b32.xlu1 %v996_v48, %s5269_s1  ;;  %v4053_v49 = vpop.f32.mrb[5].mxu0 }
 0x46f   : > { %v999_v50 = vpop.f32.mrb[6].mxu0 }
 0x470   : > { %v4054_v51 = vpop.f32.mrb[7].mxu0 }
 0x492   : > { %v1108_v54 = vpop.f32.mrb[8].mxu0 }
 0x493   : > { %1231 = vrot.lane.b32.xlu0 %v1108_v54, %s5267_s29  ;;  %v4065_v55 = vpop.f32.mrb[9].mxu0  ;;  %s5298_s29 = sld [smem:[#allocation5_spill]] }
 0x494   : > { %v1111_v56 = vpop.f32.mrb[10].mxu0 }
 0x495   : > { %v4066_v57 = vpop.f32.mrb[11].mxu0 }
 0x499   : > { %s675_s1 = scalar_lea.vmem %s5298_s29, %s4623_s0  ;;  %s5302_s29 = smov 8  }
 0x49a   : > { %v1220_v58 = vpop.f32.mrb[12].mxu0  ;;  %v685_v26 = vld [vmem:[%s675_s1] sm:$0xff]  ;;  %s5308_s1 = smov 120   ;;  %s5313_s0 = smov 48  }
 0x49b   : > { %1235 = vrot.lane.b32.xlu1 %v1220_v58, %s5265_s22  ;;  %v4077_v59 = vpop.f32.mrb[13].mxu0  ;;  %v4771_v29 = vpack.c.bf16 %v685_v26, %v685_v26  ;;  %s5301_s22 = smov 80  }
 0x49c   : > { %v1223_v60 = vpop.f32.mrb[14].mxu0 }
 0x49d   : > { %v4078_v61 = vpop.f32.mrb[15].mxu0 }
 0x4e0   : > { %v1228_v62 = vpop.permute.xlu1 %1227 }
 0x4e1   : > { %v1238_v0 = vsel %vm780_vm2, %v884_v44, %v1228_v62 }
 0x505   : > { %v1232_v63 = vpop.permute.xlu0 %1231 }
 0x506   : > { %v1240_v2 = vsel %vm1239_vm8, %v1238_v0, %v1232_v63 }
 0x50d   : > { %v1236_v4 = vpop.permute.xlu1 %1235 }
 0x50e   : > { %v1242_v5 = vsel %vm1241_vm9, %v1240_v2, %v1236_v4 }
 0x50f   : > { %v1243_v6 = vpack.c.bf16 %v1242_v5, %v1242_v5 }
 0x511   : > { %4084 = vmatmul.mubr.msk.bf16.vlgmr.msra.gmra.mrb[20].mxu1 %vm732_vm1, %v1243_v6 }
 0x512   : > { %4099 = vmatprep.mubr.msk.bf16.mxu1 %vm4473_vm0, %v4472_v1 }
 0x5e4   : > { %v1299_v8 = vpop.f32.mrb[20].mxu1 }
 0x5e5   : > { %v1300_v9 = vadd.f32 %v3785_v7, %v1299_v8  ;;  %v4085_v11 = vpop.f32.mrb[21].mxu1 }
 0x5e6   : > { %v1302_v12 = vpop.f32.mrb[22].mxu1 }
 0x5e7   : > { %v4086_v13 = vpop.f32.mrb[23].mxu1  ;;  %v1305_v14 = vadd.f32 %v1300_v9, %v4630_v3 }
 0x5e9   : > { %v1306_v15 = vsel %vm732_vm1, %v1305_v14, 0.0 }
 0x5ea   : > { %1307 = vadd.xlane.f32.xlu0 %v1306_v15 }
 0x600   : > { %1409 = vrot.lane.b32.xlu0 %v4364_v16, %s5277_s27 }
 0x604   : > { %1415 = vrot.lane.b32.xlu0 %v3791_v23, %s5277_s27 }
 0x677   : > { %v1308_v3 = vpop.xlane.xlu0 %1307 }
 0x678   : > { %v1310_v18 = vmul.f32 0.03125, %v1308_v3 }
 0x67a   : > { %v1311_v19 = vsub.f32 %v1305_v14, %v1310_v18 }
 0x67b   : > { %v1410_v22 = vpop.permute.xlu0 %1409 }
 0x67c   : > { %v1312_v20 = vmul.f32 %v1311_v19, %v1311_v19  ;;  %4096 = vmatpush3.bf16.msra.mxu1 %v1410_v22 }
 0x67d   : > { %4097 = vmatprep.subr.bf16.mxu1 %v4472_v1 }
 0x67e   : > { %v1313_v21 = vsel %vm732_vm1, %v1312_v20, 0.0 }
 0x67f   : > { %1314 = vadd.xlane.f32.xlu1 %v1313_v21  ;;  %v1416_v37 = vpop.permute.xlu0 %1415 }
 0x690   : > { %1411 = vrot.lane.b32.xlu1 %v4365_v17, %s5277_s27 }
 0x70c   : > { %v1315_v24 = vpop.xlane.xlu1 %1314 }
 0x70d   : > { %v1316_v25 = vmul.f32 0.03125, %v1315_v24 }
 0x70f   : > { %v1317_v27 = vadd.f32 1e-05, %v1316_v25 }
 0x710   : > { %v1412_v28 = vpop.permute.xlu1 %1411 }
 0x711   : > { %4404 = vrsqrt.f32 %v1317_v27  ;;  %4098 = vmatpush3.bf16.msra.mxu1 %v1412_v28 }
 0x712   : > { %4109 = vmatprep.subr.bf16.mxu1 %v4472_v1 }
 0x714   : > { %4100 = vmatmul.mubr.msk.bf16.vlgmr.msra.gmra.mrb[24].mxu1 %vm732_vm1, %v4771_v29 }
 0x715   : > { %4111 = vmatprep.mubr.msk.bf16.mxu1 %vm4473_vm0, %v4472_v1 }
 0x71b   : > { %v4405_v30 = vpop.eup %4404 }
 0x71c   : > { %v1319_v31 = vmul.f32 %v4405_v30, %v1311_v19 }
 0x71e   : > { %v1326_v34 = vmul.f32 %v3789_v10, %v1319_v31 }
 0x720   : > { %v4784_v35 = vadd.f32 %v3790_v32, %v1326_v34 }
 0x722   : > { %v1346_v36 = vpack.c.bf16 %v4784_v35, %v4784_v35 }
 0x724   : > { %4092 = vmatmul.mubr.msk.bf16.vlgmr.msra.gmra.mrb[16].mxu0 %vm732_vm1, %v1346_v36 }
 0x725   : > { %4105 = vmatprep.mubr.msk.bf16.mxu0 %vm4473_vm0, %v4472_v1 }
 0x7e7   : > { %v1455_v38 = vpop.f32.mrb[24].mxu1 }
 0x7e8   : > { %v1456_v39 = vadd.f32 %v1455_v38, %v1416_v37  ;;  %v4101_v40 = vpop.f32.mrb[25].mxu1 }
 0x7e9   : > { %v1458_v41 = vpop.f32.mrb[26].mxu1 }
 0x7ea   : > { %v4791_v42 = vpack.c.bf16 %v1456_v39, %v1456_v39  ;;  %v4102_v43 = vpop.f32.mrb[27].mxu1 }
 0x7ec   : > { %1574 = vrot.lane.b32.xlu1 %v4791_v42, %s5273_s26  ;;  %v1467_v44 = vsel %vm780_vm2, %v4791_v42, 0 }
 0x7ed   : > { %4104 = vmatpush3.bf16.xpose.msra.mxu0 %v1467_v44 }
 0x7ee   : > { %4115 = vmatprep.subr.bf16.mxu0 %v4472_v1 }
 0x7f0   : > { %1685 = vrot.lane.b32.xlu1 %v4791_v42, %s5275_s30 }
 0x7f4   : > { %1796 = vrot.lane.b32.xlu1 %v4791_v42, %s5271_s5 }
 0x7f7   : > { %v1402_v45 = vpop.f32.mrb[16].mxu0 }
 0x7f8   : > { %v1403_v46 = vadd.f32 %v3791_v23, %v1402_v45  ;;  %v4093_v47 = vpop.f32.mrb[17].mxu0 }
 0x7f9   : > { %v1405_v48 = vpop.f32.mrb[18].mxu0 }
 0x7fa   : > { %v1461_v49 = vpack.c.bf16 %v1403_v46, %v1403_v46  ;;  %v4094_v50 = vpop.f32.mrb[19].mxu0 }
 0x7fc   : > { %1572 = vrot.lane.b32.xlu0 %v1461_v49, %s5273_s26  ;;  %4106 = vmatmul.mubr.msk.bf16.vlgmr.msra.gmra.mrb[20].mxu0 %vm780_vm2, %v1461_v49  ;;  %s5306_s26 = smov 96  }
 0x7fd   : > { %4117 = vmatprep.mubr.msk.bf16.mxu0 %vm4473_vm0, %v4472_v1 }
 0x800   : > { %1683 = vrot.lane.b32.xlu0 %v1461_v49, %s5275_s30  ;;  %s5303_s30 = smov 16  }
 0x804   : > { %1794 = vrot.lane.b32.xlu0 %v1461_v49, %s5271_s5  ;;  %s5307_s5 = smov 112  }
 0x85e   : > { %v1575_v51 = vpop.permute.xlu1 %1574 }
 0x85f   : > { %v1580_v52 = vsel %vm780_vm2, %v1575_v51, 0 }
 0x860   : > { %4116 = vmatpush3.bf16.xpose.msra.mxu0 %v1580_v52 }
 0x861   : > { %4127 = vmatprep.subr.bf16.mxu0 %v4472_v1 }
 0x862   : > { %v1686_v53 = vpop.permute.xlu1 %1685 }
 0x863   : > { %v1691_v55 = vsel %vm780_vm2, %v1686_v53, 0 }
 0x866   : > { %v1797_v56 = vpop.permute.xlu1 %1796 }
 0x867   : > { %v1802_v58 = vsel %vm780_vm2, %v1797_v56, 0 }
 0x86e   : > { %v1573_v54 = vpop.permute.xlu0 %1572 }
 0x86f   : > { %4118 = vmatmul.mubr.msk.bf16.vlgmr.msra.gmra.mrb[24].mxu0 %vm780_vm2, %v1573_v54 }
 0x870   : > { %4128 = vmatpush3.bf16.xpose.msra.mxu0 %v1691_v55  ;;  %4129 = vmatprep.mubr.msk.bf16.mxu0 %vm4473_vm0, %v4472_v1 }
 0x871   : > { %4139 = vmatprep.subr.bf16.mxu0 %v4472_v1 }
 0x872   : > { %v1684_v57 = vpop.permute.xlu0 %1683 }
 0x876   : > { %v1795_v59 = vpop.permute.xlu0 %1794 }
 0x877   : > { %4130 = vmatmul.mubr.msk.bf16.vlgmr.msra.gmra.mrb[28].mxu0 %vm780_vm2, %v1684_v57 }
 0x878   : > { %4140 = vmatpush3.bf16.xpose.msra.mxu0 %v1802_v58  ;;  %4141 = vmatprep.mubr.msk.bf16.mxu0 %vm4473_vm0, %v4472_v1 }
 0x879   : > { %4151 = vmatprep.subr.bf16.mxu0 %v4472_v1 }
 0x87f   : > { %4142 = vmatmul.mubr.msk.bf16.vlgmr.msra.gmra.mrb[32].mxu0 %vm780_vm2, %v1795_v59 }
 0x880   : > { %4155 = vmatprep.mubr.msk.bf16.mxu0 %vm4473_vm0, %v4472_v1 }
 0x8cf   : > { %v1503_v60 = vpop.f32.mrb[20].mxu0 }
 0x8d0   : > { %v1509_v61 = vmul.f32 0.35355338, %v1503_v60  ;;  %v4107_v62 = vpop.f32.mrb[21].mxu0 }
 0x8d1   : > { %v1506_v63 = vpop.f32.mrb[22].mxu0 }
 0x8d2   : > { %v4108_v0 = vpop.f32.mrb[23].mxu0  ;;  %v1510_v2 = vsel %vm780_vm2, %v1509_v61, -inf }
 0x8d3   : > { %1511 = vmax.xlane.f32.xlu1 %v1510_v2 }
 0x942   : > { %v1616_v4 = vpop.f32.mrb[24].mxu0 }
 0x943   : > { %v1622_v5 = vmul.f32 0.35355338, %v1616_v4  ;;  %v4119_v6 = vpop.f32.mrb[25].mxu0 }
 0x944   : > { %v1619_v7 = vpop.f32.mrb[26].mxu0 }
 0x945   : > { %v4120_v8 = vpop.f32.mrb[27].mxu0  ;;  %v1623_v9 = vsel %vm780_vm2, %v1622_v5, -inf }
 0x946   : > { %1624 = vmax.xlane.f32.xlu0 %v1623_v9 }
 0x94a   : > { %v1727_v11 = vpop.f32.mrb[28].mxu0 }
 0x94b   : > { %v1733_v12 = vmul.f32 0.35355338, %v1727_v11  ;;  %v4131_v13 = vpop.f32.mrb[29].mxu0 }
 0x94c   : > { %v1730_v14 = vpop.f32.mrb[30].mxu0 }
 0x94d   : > { %v4132_v15 = vpop.f32.mrb[31].mxu0  ;;  %v1734_v16 = vsel %vm780_vm2, %v1733_v12, -inf }
 0x94e   : > { %1735 = vmax.xlane.f32.xlu0 %v1734_v16  ;;  %v4366_v15 = vld [vmem:[%s5241_s11] sm:$0xff]   ;;  %v4367_v16 = vld [vmem:[%s5241_s11 + $0x8] sm:$0xff]  }
 0x94f   : > { %4152 = vmatpush3.bf16.msra.mxu0 %v4366_v15 }
 0x950   : > { %4153 = vmatprep.subr.bf16.mxu0 %v4472_v1 }
 0x952   : > { %v1838_v17 = vpop.f32.mrb[32].mxu0 }
 0x953   : > { %v1844_v3 = vmul.f32 0.35355338, %v1838_v17  ;;  %v4143_v18 = vpop.f32.mrb[33].mxu0  ;;  %4154 = vmatpush3.bf16.msra.mxu0 %v4367_v16 }
 0x954   : > { %v1841_v19 = vpop.f32.mrb[34].mxu0  ;;  %4167 = vmatprep.subr.bf16.mxu0 %v4472_v1 }
 0x955   : > { %v4144_v20 = vpop.f32.mrb[35].mxu0  ;;  %v1845_v21 = vsel %vm780_vm2, %v1844_v3, -inf }
 0x956   : > { %1846 = vmax.xlane.f32.xlu1 %v1845_v21 }
 0x960   : > { %v1512_v22 = vpop.xlane.xlu1 %1511 }
 0x961   : > { %v1513_v23 = vsub.f32 %v1509_v61, %v1512_v22 }
 0x963   : > { %v1514_v24 = vmul.f32 1.442695, %v1513_v23 }
 0x965   : > { %4406 = vpow2.f32 %v1514_v24 }
 0x96f   : > { %v4407_v25 = vpop.eup %4406 }
 0x970   : > { %v1516_v26 = vsel %vm780_vm2, %v4407_v25, 0.0 }
 0x971   : > { %1517 = vadd.xlane.f32.xlu0 %v1516_v26 }
 0x9d3   : > { %v1625_v27 = vpop.xlane.xlu0 %1624 }
 0x9d4   : > { %v1626_v28 = vsub.f32 %v1622_v5, %v1625_v27 }
 0x9d6   : > { %v1627_v30 = vmul.f32 1.442695, %v1626_v28 }
 0x9d8   : > { %4408 = vpow2.f32 %v1627_v30 }
 0x9db   : > { %v1736_v10 = vpop.xlane.xlu0 %1735 }
 0x9dc   : > { %v1737_v31 = vsub.f32 %v1733_v12, %v1736_v10 }
 0x9de   : > { %v1738_v32 = vmul.f32 1.442695, %v1737_v31  ;;  %v3804_v31 = vld [vmem:[%s5305_s12] ss:$0 sm:$0xff]  ;;  %s5312_s12 = smov 40  }
 0x9e0   : > { %4410 = vpow2.f32 %v1738_v32 }
 0x9e2   : > { %v4409_v34 = vpop.eup %4408 }
 0x9e3   : > { %v1629_v36 = vsel %vm780_vm2, %v4409_v34, 0.0  ;;  %v1847_v39 = vpop.xlane.xlu1 %1846 }
 0x9e4   : > { %1630 = vadd.xlane.f32.xlu1 %v1629_v36  ;;  %v1848_v40 = vsub.f32 %v1844_v3, %v1847_v39 }
 0x9e6   : > { %v1849_v41 = vmul.f32 1.442695, %v1848_v40 }
 0x9e8   : > { %4412 = vpow2.f32 %v1849_v41 }
 0x9ea   : > { %v4411_v37 = vpop.eup %4410 }
 0x9eb   : > { %v1740_v38 = vsel %vm780_vm2, %v4411_v37, 0.0 }
 0x9ec   : > { %1741 = vadd.xlane.f32.xlu0 %v1740_v38 }
 0x9f2   : > { %v4413_v43 = vpop.eup %4412 }
 0x9f3   : > { %v1851_v44 = vsel %vm780_vm2, %v4413_v43, 0.0 }
 0x9f5   : > { %1635 = vrot.lane.b32.xlu1 %v4791_v42, %s5299_s4 }
 0x9fe   : > { %v1518_v45 = vpop.xlane.xlu0 %1517 }
 0x9ff   : > { %4414 = vrcp.f32 %v1518_v45 }
 0xa02   : > { %1523 = vrot.lane.b32.xlu0 %v4791_v42, %s5277_s27  ;;  %s5304_s27 = smov 24  }
 0xa06   : > { %1857 = vrot.lane.b32.xlu0 %v4791_v42, %s5300_s25 }
 0xa09   : > { %v4415_v47 = vpop.eup %4414 }
 0xa0a   : > { %v1520_v49 = vmul.f32 %v4415_v47, %v4407_v25  ;;  %v4368_v47 = vld [vmem:[%s5245_s15] sm:$0xff]  }
 0xa0c   : > { %v1521_v53 = vpack.c.bf16 %v1520_v49, %v1520_v49  ;;  %v4371_v49 = vld [vmem:[%s5247_s17 + $0x8] sm:$0xff]  }
 0xa19   : > { %1852 = vadd.xlane.f32.xlu1 %v1851_v44 }
 0xa2a   : > { %1746 = vrot.lane.b32.xlu1 %v4791_v42, %s5301_s22 }
 0xa71   : > { %v1631_v46 = vpop.xlane.xlu1 %1630 }
 0xa72   : > { %4416 = vrcp.f32 %v1631_v46 }
 0xa75   : > { %v1636_v52 = vpop.permute.xlu1 %1635 }
 0xa76   : > { %v1641_v55 = vsel %vm846_vm7, %v1636_v52, 0 }
 0xa79   : > { %v1742_v48 = vpop.xlane.xlu0 %1741 }
 0xa7a   : > { %4418 = vrcp.f32 %v1742_v48  ;;  %v4369_v48 = vld [vmem:[%s5245_s15 + $0x8] sm:$0xff]  }
 0xa7c   : > { %v4417_v54 = vpop.eup %4416 }
 0xa7d   : > { %v1524_v50 = vpop.permute.xlu0 %1523  ;;  %v1633_v42 = vmul.f32 %v4417_v54, %v4409_v34  ;;  %v3808_v54 = vld [vmem:[%s5243_s13] ss:$0 sm:$0xff] }
 0xa7e   : > { %v1529_v51 = vsel %vm846_vm7, %v1524_v50, 0 }
 0xa7f   : > { %4110 = vmatpush3.bf16.msra.mxu1 %v1529_v51  ;;  %v1634_v56 = vpack.c.bf16 %v1633_v42, %v1633_v42  ;;  %v3809_v42 = vld [vmem:[%s5244_s14] ss:$0 sm:$0xff] }
 0xa80   : > { %4121 = vmatprep.subr.bf16.mxu1 %v4472_v1 }
 0xa81   : > { %v1858_v62 = vpop.permute.xlu0 %1857 }
 0xa82   : > { %4112 = vmatmul.mubr.msk.bf16.vlgmr.msra.gmra.mrb[28].mxu1 %vm780_vm2, %v1521_v53  ;;  %v1863_v0 = vsel %vm846_vm7, %v1858_v62, 0 }
 0xa83   : > { %4122 = vmatpush3.bf16.msra.mxu1 %v1641_v55  ;;  %4123 = vmatprep.mubr.msk.bf16.mxu1 %vm4473_vm0, %v4472_v1 }
 0xa84   : > { %4133 = vmatprep.subr.bf16.mxu1 %v4472_v1  ;;  %v4419_v57 = vpop.eup %4418 }
 0xa85   : > { %v1744_v59 = vmul.f32 %v4419_v57, %v4411_v37 }
 0xa87   : > { %v1745_v63 = vpack.c.bf16 %v1744_v59, %v1744_v59  ;;  %v4372_v59 = vld [vmem:[%s5247_s17 + $0x10] sm:$0xff]  }
 0xa8a   : > { %4124 = vmatmul.mubr.msk.bf16.vlgmr.msra.gmra.mrb[32].mxu1 %vm780_vm2, %v1634_v56 }
 0xa8b   : > { %4135 = vmatprep.mubr.msk.bf16.mxu1 %vm4473_vm0, %v4472_v1 }
 0xaa6   : > { %v1853_v58 = vpop.xlane.xlu1 %1852 }
 0xaa7   : > { %4420 = vrcp.f32 %v1853_v58 }
 0xaaa   : > { %v1747_v60 = vpop.permute.xlu1 %1746 }
 0xaab   : > { %v1752_v61 = vsel %vm846_vm7, %v1747_v60, 0  ;;  %v4373_v60 = vld [vmem:[%s5247_s17 + $0x18] sm:$0xff]  }
 0xaac   : > { %4134 = vmatpush3.bf16.msra.mxu1 %v1752_v61  ;;  %v3810_v61 = vld [vmem:[%s5246_s16] ss:$0 sm:$0xff] }
 0xaad   : > { %4145 = vmatprep.subr.bf16.mxu1 %v4472_v1 }
 0xaaf   : > { %4136 = vmatmul.mubr.msk.bf16.vlgmr.msra.gmra.mrb[36].mxu1 %vm780_vm2, %v1745_v63 }
 0xab0   : > { %4146 = vmatpush3.bf16.msra.mxu1 %v1863_v0  ;;  %4147 = vmatprep.mubr.msk.bf16.mxu1 %vm4473_vm0, %v4472_v1 }
 0xab1   : > { %v4421_v2 = vpop.eup %4420  ;;  %4159 = vmatprep.subr.bf16.mxu1 %v4472_v1 }
 0xab2   : > { %v1855_v4 = vmul.f32 %v4421_v2, %v4413_v43 }
 0xab4   : > { %v1856_v5 = vpack.c.bf16 %v1855_v4, %v1855_v4 }
 0xab7   : > { %4148 = vmatmul.mubr.msk.bf16.vlgmr.msra.gmra.mrb[40].mxu1 %vm780_vm2, %v1856_v5 }
 0xab8   : > { %4163 = vmatprep.mubr.msk.bf16.mxu1 %vm4473_vm0, %v4472_v1  ;;  %4160 = vmatpush3.bf16.msra.mxu1 %v4368_v47 }
 0xab9   : > { %4161 = vmatprep.subr.bf16.mxu1 %v4472_v1 }
 0xabc   : > { %4162 = vmatpush3.bf16.msra.mxu1 %v4369_v48 }
 0xabd   : > { %4179 = vmatprep.subr.bf16.mxu1 %v4472_v1 }
 0xb55   : > { %v1565_v6 = vpop.f32.mrb[28].mxu1 }
 0xb56   : > { %v4113_v7 = vpop.f32.mrb[29].mxu1 }
 0xb57   : > { %v1568_v8 = vpop.f32.mrb[30].mxu1  ;;  %v3814_v7 = vld [vmem:[%s5248_s18] ss:$0 sm:$0xff] }
 0xb58   : > { %v4114_v9 = vpop.f32.mrb[31].mxu1 }
 0xb5d   : > { %v1677_v11 = vpop.f32.mrb[32].mxu1 }
 0xb5e   : > { %1906 = vrot.lane.b32.xlu1 %v1677_v11, %s5302_s29  ;;  %v4125_v12 = vpop.f32.mrb[33].mxu1 }
 0xb5f   : > { %v1680_v13 = vpop.f32.mrb[34].mxu1 }
 0xb60   : > { %v4126_v14 = vpop.f32.mrb[35].mxu1 }
 0xb82   : > { %v1788_v17 = vpop.f32.mrb[36].mxu1 }
 0xb83   : > { %1910 = vrot.lane.b32.xlu0 %v1788_v17, %s5303_s30  ;;  %v4137_v3 = vpop.f32.mrb[37].mxu1 }
 0xb84   : > { %v1791_v18 = vpop.f32.mrb[38].mxu1 }
 0xb85   : > { %v4138_v19 = vpop.f32.mrb[39].mxu1 }
 0xb8a   : > { %v1899_v20 = vpop.f32.mrb[40].mxu1 }
 0xb8b   : > { %1914 = vrot.lane.b32.xlu1 %v1899_v20, %s5304_s27  ;;  %v4149_v21 = vpop.f32.mrb[41].mxu1  ;;  %v4374_v20 = vld [vmem:[%s5290_s3 + $0x10] sm:$0xff]  }
 0xb8c   : > { %v1902_v22 = vpop.f32.mrb[42].mxu1  ;;  %v4375_v21 = vld [vmem:[%s5290_s3 + $0x18] sm:$0xff]  }
 0xb8d   : > { %v4150_v23 = vpop.f32.mrb[43].mxu1 }
 0xbd0   : > { %v1907_v24 = vpop.permute.xlu1 %1906 }
 0xbd1   : > { %v1917_v26 = vsel %vm780_vm2, %v1565_v6, %v1907_v24 }
 0xbf5   : > { %v1911_v25 = vpop.permute.xlu0 %1910 }
 0xbf6   : > { %v1918_v27 = vsel %vm1239_vm8, %v1917_v26, %v1911_v25  ;;  %v3820_v26 = vld [vmem:[%s5249_s19] ss:$0 sm:$0xff] }
 0xbfd   : > { %v1915_v28 = vpop.permute.xlu1 %1914 }
 0xbfe   : > { %v1919_v30 = vsel %vm1241_vm9, %v1918_v27, %v1915_v28  ;;  %v3821_v28 = vld [vmem:[%s5250_s20] ss:$0 sm:$0xff] }
 0xbff   : > { %v1920_v10 = vpack.c.bf16 %v1919_v30, %v1919_v30 }
 0xc01   : > { %4156 = vmatmul.mubr.msk.bf16.vlgmr.msra.gmra.mrb[36].mxu0 %vm732_vm1, %v1920_v10 }
 0xc02   : > { %4175 = vmatprep.mubr.msk.bf16.mxu0 %vm4473_vm0, %v4472_v1 }
 0xcd4   : > { %v1976_v32 = vpop.f32.mrb[36].mxu0 }
 0xcd5   : > { %v1977_v34 = vadd.f32 %v3804_v31, %v1976_v32  ;;  %v4157_v36 = vpop.f32.mrb[37].mxu0  ;;  %v3834_v32 = vld [vmem:[%s5293_s24 + $0x1] ss:$0 sm:$0xff] }
 0xcd6   : > { %v1979_v37 = vpop.f32.mrb[38].mxu0 }
 0xcd7   : > { %v4158_v38 = vpop.f32.mrb[39].mxu0  ;;  %v1982_v39 = vadd.f32 %v1977_v34, %v4784_v35  ;;  %v4370_v35 = vld [vmem:[%s5247_s17] sm:$0xff]  }
 0xcd8   : > { %4168 = vmatpush3.bf16.msra.mxu0 %v4370_v35 }
 0xcd9   : > { %v1983_v40 = vsel %vm732_vm1, %v1982_v39, 0.0  ;;  %4169 = vmatprep.subr.bf16.mxu0 %v4472_v1 }
 0xcda   : > { %1984 = vadd.xlane.f32.xlu0 %v1983_v40 }
 0xcdc   : > { %4170 = vmatpush3.bf16.msra.mxu0 %v4371_v49 }
 0xcdd   : > { %4171 = vmatprep.subr.bf16.mxu0 %v4472_v1 }
 0xce0   : > { %4172 = vmatpush3.bf16.msra.mxu0 %v4372_v59 }
 0xce1   : > { %4173 = vmatprep.subr.bf16.mxu0 %v4472_v1 }
 0xce4   : > { %4174 = vmatpush3.bf16.msra.mxu0 %v4373_v60 }
 0xce5   : > { %4193 = vmatprep.subr.bf16.mxu0 %v4472_v1 }
 0xd67   : > { %v1985_v41 = vpop.xlane.xlu0 %1984 }
 0xd68   : > { %v1986_v43 = vmul.f32 0.03125, %v1985_v41 }
 0xd6a   : > { %v1987_v44 = vsub.f32 %v1982_v39, %v1986_v43 }
 0xd6c   : > { %v1988_v45 = vmul.f32 %v1987_v44, %v1987_v44 }
 0xd6e   : > { %v1989_v46 = vsel %vm732_vm1, %v1988_v45, 0.0 }
 0xd6f   : > { %1990 = vadd.xlane.f32.xlu1 %v1989_v46 }
 0xdfc   : > { %v1991_v50 = vpop.xlane.xlu1 %1990 }
 0xdfd   : > { %v1992_v51 = vmul.f32 0.03125, %v1991_v50 }
 0xdff   : > { %v1993_v52 = vadd.f32 1e-05, %v1992_v51 }
 0xe01   : > { %4422 = vrsqrt.f32 %v1993_v52 }
 0xe0b   : > { %v4423_v53 = vpop.eup %4422 }
 0xe0c   : > { %v1995_v55 = vmul.f32 %v4423_v53, %v1987_v44 }
 0xe0e   : > { %v2002_v56 = vmul.f32 %v3808_v54, %v1995_v55 }
 0xe10   : > { %v2009_v57 = vadd.f32 %v3809_v42, %v2002_v56 }
 0xe12   : > { %v2026_v58 = vpack.c.bf16 %v2009_v57, %v2009_v57 }
 0xe14   : > { %4164 = vmatmul.mubr.msk.bf16.vlgmr.msra.gmra.mrb[44].mxu1 %vm732_vm1, %v2026_v58 }
 0xe15   : > { %4183 = vmatprep.mubr.msk.bf16.mxu1 %vm4473_vm0, %v4472_v1  ;;  %4180 = vmatpush3.bf16.msra.mxu1 %v4374_v20 }
 0xe16   : > { %4181 = vmatprep.subr.bf16.mxu1 %v4472_v1 }
 0xe19   : > { %4182 = vmatpush3.bf16.msra.mxu1 %v4375_v21 }
 0xe1a   : > { %4187 = vmatprep.subr.bf16.mxu1 %v4472_v1 }
 0xee7   : > { %v2082_v62 = vpop.f32.mrb[44].mxu1 }
 0xee8   : > { %v2083_v63 = vadd.f32 %v3810_v61, %v2082_v62  ;;  %v4165_v0 = vpop.f32.mrb[45].mxu1 }
 0xee9   : > { %v2085_v2 = vpop.f32.mrb[46].mxu1 }
 0xeea   : > { %v2088_v4 = vmax.f32 %v2083_v63, 0.0  ;;  %v4166_v5 = vpop.f32.mrb[47].mxu1 }
 0xeec   : > { %v2089_v6 = vpack.c.bf16 %v2088_v4, %v2088_v4 }
 0xeee   : > { %4176 = vmatmul.mubr.msk.bf16.vlgmr.msra.gmra.mrb[40].mxu0 %vm2120_vm10, %v2089_v6 }
 0xeef   : > { %4195 = vmatprep.mubr.msk.bf16.mxu0 %vm4473_vm0, %v4472_v1 }
 0xfc1   : > { %v2158_v8 = vpop.f32.mrb[40].mxu0 }
 0xfc2   : > { %v2159_v9 = vadd.f32 %v3814_v7, %v2158_v8  ;;  %v4177_v11 = vpop.f32.mrb[41].mxu0 }
 0xfc3   : > { %v2161_v12 = vpop.f32.mrb[42].mxu0 }
 0xfc4   : > { %v4178_v13 = vpop.f32.mrb[43].mxu0  ;;  %v2164_v14 = vadd.f32 %v2159_v9, %v2009_v57 }
 0xfc6   : > { %v2165_v15 = vsel %vm732_vm1, %v2164_v14, 0.0 }
 0xfc7   : > { %2166 = vadd.xlane.f32.xlu0 %v2165_v15 }
0x1054   : > { %v2167_v16 = vpop.xlane.xlu0 %2166 }
0x1055   : > { %v2168_v17 = vmul.f32 0.03125, %v2167_v16 }
0x1057   : > { %v2169_v3 = vsub.f32 %v2164_v14, %v2168_v17 }
0x1059   : > { %v2170_v18 = vmul.f32 %v2169_v3, %v2169_v3 }
0x105b   : > { %v2171_v19 = vsel %vm732_vm1, %v2170_v18, 0.0 }
0x105c   : > { %2172 = vadd.xlane.f32.xlu0 %v2171_v19 }
0x10e9   : > { %v2173_v22 = vpop.xlane.xlu0 %2172 }
0x10ea   : > { %v2174_v23 = vmul.f32 0.03125, %v2173_v22 }
0x10ec   : > { %v2175_v24 = vadd.f32 1e-05, %v2174_v23 }
0x10ee   : > { %4424 = vrsqrt.f32 %v2175_v24 }
0x10f8   : > { %v4425_v25 = vpop.eup %4424 }
0x10f9   : > { %v2177_v27 = vmul.f32 %v4425_v25, %v2169_v3 }
0x10fb   : > { %v2184_v30 = vmul.f32 %v3820_v26, %v2177_v27 }
0x10fd   : > { %v4940_v10 = vadd.f32 %v3821_v28, %v2184_v30 }
0x10ff   : > { %v2210_v31 = vpack.c.bf16 %v4940_v10, %v4940_v10 }
0x1101   : > { %4184 = vmatmul.mubr.msk.bf16.vlgmr.msra.gmra.mrb[48].mxu1 %vm732_vm1, %v2210_v31 }
0x1102   : > { %4189 = vmatprep.mubr.msk.bf16.mxu1 %vm4473_vm0, %v4472_v1 }
0x11d4   : > { %v2266_v34 = vpop.f32.mrb[48].mxu1 }
0x11d5   : > { %v2267_v36 = vadd.f32 %v3834_v32, %v2266_v34  ;;  %v4185_v37 = vpop.f32.mrb[49].mxu1 }
0x11d6   : > { %v2269_v38 = vpop.f32.mrb[50].mxu1 }
0x11d7   : > { %v4950_v39 = vpack.c.bf16 %v2267_v36, %v2267_v36  ;;  %v4186_v40 = vpop.f32.mrb[51].mxu1 }
0x11d9   : > { %2386 = vrot.lane.b32.xlu0 %v4950_v39, %s5299_s4  ;;  %2274 = vrot.lane.b32.xlu1 %v4950_v39, %s5306_s26 }
0x11dd   : > { %2496 = vrot.lane.b32.xlu0 %v4950_v39, %s5307_s5  ;;  %2384 = vrot.lane.b32.xlu1 %v4950_v39, %s5308_s1 }
0x11e1   : > { %2608 = vrot.lane.b32.xlu0 %v4950_v39, %s5309_s23  ;;  %2498 = vrot.lane.b32.xlu1 %v4950_v39, %s5301_s22 }
0x11e5   : > { %2610 = vrot.lane.b32.xlu1 %v4950_v39, %s5300_s25 }
0x124b   : > { %v2275_v41 = vpop.permute.xlu1 %2274  ;;  %v2387_v44 = vpop.permute.xlu0 %2386 }
0x124c   : > { %v2280_v43 = vsel %vm780_vm2, %v2275_v41, 0  ;;  %v2392_v46 = vsel %vm780_vm2, %v2387_v44, 0 }
0x124d   : > { %4188 = vmatpush3.bf16.xpose.msra.mxu1 %v2280_v43 }
0x124e   : > { %4199 = vmatprep.subr.bf16.mxu1 %v4472_v1 }
0x124f   : > { %v2385_v45 = vpop.permute.xlu1 %2384  ;;  %v2497_v49 = vpop.permute.xlu0 %2496 }
0x1253   : > { %v2499_v47 = vpop.permute.xlu1 %2498  ;;  %v2609_v51 = vpop.permute.xlu0 %2608 }
0x1254   : > { %4190 = vmatmul.mubr.msk.bf16.vlgmr.msra.gmra.mrb[52].mxu1 %vm780_vm2, %v4950_v39  ;;  %v2504_v48 = vsel %vm780_vm2, %v2499_v47, 0 }
0x1255   : > { %4200 = vmatpush3.bf16.xpose.msra.mxu1 %v2392_v46  ;;  %4201 = vmatprep.mubr.msk.bf16.mxu1 %vm4473_vm0, %v4472_v1 }
0x1256   : > { %4211 = vmatprep.subr.bf16.mxu1 %v4472_v1 }
0x1257   : > { %v2611_v35 = vpop.permute.xlu1 %2610 }
0x1258   : > { %v2616_v50 = vsel %vm780_vm2, %v2611_v35, 0 }
0x125c   : > { %4202 = vmatmul.mubr.msk.bf16.vlgmr.msra.gmra.mrb[56].mxu1 %vm780_vm2, %v2385_v45 }
0x125d   : > { %4212 = vmatpush3.bf16.xpose.msra.mxu1 %v2504_v48  ;;  %4213 = vmatprep.mubr.msk.bf16.mxu1 %vm4473_vm0, %v4472_v1 }
0x125e   : > { %4223 = vmatprep.subr.bf16.mxu1 %v4472_v1 }
0x1264   : > { %4214 = vmatmul.mubr.msk.bf16.vlgmr.msra.gmra.mrb[60].mxu1 %vm780_vm2, %v2497_v49 }
0x1265   : > { %4224 = vmatpush3.bf16.xpose.msra.mxu1 %v2616_v50  ;;  %4225 = vmatprep.mubr.msk.bf16.mxu1 %vm4473_vm0, %v4472_v1 }
0x1266   : > { %4235 = vmatprep.subr.bf16.mxu1 %v4472_v1 }
0x126c   : > { %4226 = vmatmul.mubr.msk.bf16.vlgmr.msra.gmra.mrb[64].mxu1 %vm780_vm2, %v2609_v51 }
0x126d   : > { %4239 = vmatprep.mubr.msk.bf16.mxu1 %vm4473_vm0, %v4472_v1 }
0x1327   : > { %v2316_v52 = vpop.f32.mrb[52].mxu1 }
0x1328   : > { %v2322_v53 = vmul.f32 0.35355338, %v2316_v52  ;;  %v4191_v54 = vpop.f32.mrb[53].mxu1 }
0x1329   : > { %v2319_v55 = vpop.f32.mrb[54].mxu1 }
0x132a   : > { %v4192_v42 = vpop.f32.mrb[55].mxu1  ;;  %v2323_v56 = vsel %vm4681_vm6, %v2322_v53, -1e+09 }
0x132b   : > { %v2324_v57 = vsel %vm780_vm2, %v2323_v56, -inf }
0x132c   : > { %2325 = vmax.xlane.f32.xlu1 %v2324_v57 }
0x132f   : > { %v2428_v58 = vpop.f32.mrb[56].mxu1 }
0x1330   : > { %v2434_v59 = vmul.f32 0.35355338, %v2428_v58  ;;  %v4203_v60 = vpop.f32.mrb[57].mxu1 }
0x1331   : > { %v2431_v61 = vpop.f32.mrb[58].mxu1 }
0x1332   : > { %v4204_v62 = vpop.f32.mrb[59].mxu1  ;;  %v2435_v63 = vsel %vm4681_vm6, %v2434_v59, -1e+09 }
0x1333   : > { %v2436_v0 = vsel %vm780_vm2, %v2435_v63, -inf }
0x1334   : > { %2437 = vmax.xlane.f32.xlu0 %v2436_v0 }
0x1337   : > { %v2540_v2 = vpop.f32.mrb[60].mxu1 }
0x1338   : > { %v2546_v4 = vmul.f32 0.35355338, %v2540_v2  ;;  %v4215_v5 = vpop.f32.mrb[61].mxu1 }
0x1339   : > { %v2543_v6 = vpop.f32.mrb[62].mxu1 }
0x133a   : > { %v4216_v7 = vpop.f32.mrb[63].mxu1  ;;  %v2547_v8 = vsel %vm4681_vm6, %v2546_v4, -1e+09 }
0x133b   : > { %v2548_v9 = vsel %vm780_vm2, %v2547_v8, -inf }
0x133c   : > { %2549 = vmax.xlane.f32.xlu0 %v2548_v9  ;;  %v4377_v9 = vld [vmem:[%s5297_s28 + $0x18] sm:$0xff]  }
0x133f   : > { %v2652_v11 = vpop.f32.mrb[64].mxu1 }
0x1340   : > { %v2658_v12 = vmul.f32 0.35355338, %v2652_v11  ;;  %v4227_v13 = vpop.f32.mrb[65].mxu1 }
0x1341   : > { %v2655_v14 = vpop.f32.mrb[66].mxu1 }
0x1342   : > { %v4228_v15 = vpop.f32.mrb[67].mxu1  ;;  %v2659_v16 = vsel %vm4681_vm6, %v2658_v12, -1e+09 }
0x1343   : > { %v2660_v17 = vsel %vm780_vm2, %v2659_v16, -inf }
0x1344   : > { %2661 = vmax.xlane.f32.xlu1 %v2660_v17 }
0x13b9   : > { %v2326_v3 = vpop.xlane.xlu1 %2325 }
0x13ba   : > { %v2327_v18 = vsub.f32 %v2323_v56, %v2326_v3 }
0x13bc   : > { %v2328_v19 = vmul.f32 1.442695, %v2327_v18 }
0x13be   : > { %4426 = vpow2.f32 %v2328_v19 }
0x13c1   : > { %v2438_v20 = vpop.xlane.xlu0 %2437 }
0x13c2   : > { %v2439_v21 = vsub.f32 %v2435_v63, %v2438_v20 }
0x13c4   : > { %v2440_v22 = vmul.f32 1.442695, %v2439_v21 }
0x13c6   : > { %4428 = vpow2.f32 %v2440_v22 }
0x13c8   : > { %v4427_v23 = vpop.eup %4426 }
0x13c9   : > { %v2550_v24 = vpop.xlane.xlu0 %2549  ;;  %v2330_v25 = vsel %vm780_vm2, %v4427_v23, 0.0 }
0x13ca   : > { %v2551_v26 = vsub.f32 %v2547_v8, %v2550_v24  ;;  %2331 = vadd.xlane.f32.xlu0 %v2330_v25  ;;  %v4376_v8 = vld [vmem:[%s5297_s28 + $0x10] sm:$0xff]   ;;  %v3846_v25 = vld [vmem:[%s5236_s6 + $0x1] ss:$0 sm:$0xff] }
0x13cb   : > { %4236 = vmatpush3.bf16.msra.mxu1 %v4376_v8 }
0x13cc   : > { %v2552_v27 = vmul.f32 1.442695, %v2551_v26  ;;  %4237 = vmatprep.subr.bf16.mxu1 %v4472_v1 }
0x13ce   : > { %4430 = vpow2.f32 %v2552_v27 }
0x13cf   : > { %4238 = vmatpush3.bf16.msra.mxu1 %v4377_v9 }
0x13d0   : > { %v4429_v33 = vpop.eup %4428  ;;  %4251 = vmatprep.subr.bf16.mxu1 %v4472_v1 }
0x13d1   : > { %v2442_v28 = vsel %vm780_vm2, %v4429_v33, 0.0  ;;  %v2662_v32 = vpop.xlane.xlu1 %2661 }
0x13d2   : > { %2443 = vadd.xlane.f32.xlu1 %v2442_v28  ;;  %v2663_v34 = vsub.f32 %v2659_v16, %v2662_v32 }
0x13d4   : > { %v2664_v36 = vmul.f32 1.442695, %v2663_v34  ;;  %v4378_v34 = vld [vmem:[%s5239_s9 + $0x10] sm:$0xff]  }
0x13d6   : > { %4432 = vpow2.f32 %v2664_v36  ;;  %v4379_v36 = vld [vmem:[%s5239_s9 + $0x18] sm:$0xff]  }
0x13d8   : > { %v4431_v30 = vpop.eup %4430 }
0x13d9   : > { %v2554_v31 = vsel %vm780_vm2, %v4431_v30, 0.0 }
0x13da   : > { %2555 = vadd.xlane.f32.xlu0 %v2554_v31 }
0x13e0   : > { %v4433_v37 = vpop.eup %4432 }
0x13e1   : > { %v2666_v38 = vsel %vm780_vm2, %v4433_v37, 0.0 }
0x13e3   : > { %2448 = vrot.lane.b32.xlu1 %v4950_v39, %s5310_s21 }
0x13f0   : > { %2336 = vrot.lane.b32.xlu0 %v4950_v39, %s5311_s2 }
0x13f4   : > { %2672 = vrot.lane.b32.xlu0 %v4950_v39, %s5312_s12 }
0x1407   : > { %2667 = vadd.xlane.f32.xlu1 %v2666_v38 }
0x1418   : > { %2560 = vrot.lane.b32.xlu1 %v4950_v39, %s5313_s0  ;;  %s5315_s0 = sld [smem:[#allocation3_spill]] }
0x1457   : > { %v2332_v40 = vpop.xlane.xlu0 %2331 }
0x1458   : > { %4434 = vrcp.f32 %v2332_v40 }
0x145f   : > { %v2444_v41 = vpop.xlane.xlu1 %2443 }
0x1460   : > { %4436 = vrcp.f32 %v2444_v41 }
0x1462   : > { %v4435_v43 = vpop.eup %4434 }
0x1463   : > { %v2334_v45 = vmul.f32 %v4435_v43, %v4427_v23  ;;  %v2449_v48 = vpop.permute.xlu1 %2448 }
0x1464   : > { %v2454_v50 = vsel %vm846_vm7, %v2449_v48, 0 }
0x1465   : > { %v2335_v35 = vpack.c.bf16 %v2334_v45, %v2334_v45 }
0x1467   : > { %v2556_v44 = vpop.xlane.xlu0 %2555 }
0x1468   : > { %4438 = vrcp.f32 %v2556_v44  ;;  %v3864_v44 = vld [vmem:[%s5240_s10 + $0x1] ss:$0 sm:$0xff] }
0x146a   : > { %v4437_v49 = vpop.eup %4436 }
0x146b   : > { %v2337_v46 = vpop.permute.xlu0 %2336  ;;  %v2446_v39 = vmul.f32 %v4437_v49, %v4429_v33  ;;  %v3850_v49 = vld [vmem:[%s5237_s7 + $0x1] ss:$0 sm:$0xff] }
0x146c   : > { %v2342_v47 = vsel %vm846_vm7, %v2337_v46, 0 }
0x146d   : > { %4194 = vmatpush3.bf16.msra.mxu0 %v2342_v47  ;;  %v2447_v51 = vpack.c.bf16 %v2446_v39, %v2446_v39  ;;  %v3851_v39 = vld [vmem:[%s5238_s8 + $0x1] ss:$0 sm:$0xff] }
0x146e   : > { %4205 = vmatprep.subr.bf16.mxu0 %v4472_v1 }
0x146f   : > { %v2673_v56 = vpop.permute.xlu0 %2672 }
0x1470   : > { %4196 = vmatmul.mubr.msk.bf16.vlgmr.msra.gmra.mrb[44].mxu0 %vm780_vm2, %v2335_v35  ;;  %v2678_v58 = vsel %vm846_vm7, %v2673_v56, 0 }
0x1471   : > { %4206 = vmatpush3.bf16.msra.mxu0 %v2454_v50  ;;  %4207 = vmatprep.mubr.msk.bf16.mxu0 %vm4473_vm0, %v4472_v1 }
0x1472   : > { %4217 = vmatprep.subr.bf16.mxu0 %v4472_v1  ;;  %v4439_v52 = vpop.eup %4438 }
0x1473   : > { %v2558_v54 = vmul.f32 %v4439_v52, %v4431_v30 }
0x1475   : > { %v2559_v57 = vpack.c.bf16 %v2558_v54, %v2558_v54 }
0x1478   : > { %4208 = vmatmul.mubr.msk.bf16.vlgmr.msra.gmra.mrb[48].mxu0 %vm780_vm2, %v2447_v51 }
0x1479   : > { %4219 = vmatprep.mubr.msk.bf16.mxu0 %vm4473_vm0, %v4472_v1 }
0x1494   : > { %v2668_v53 = vpop.xlane.xlu1 %2667 }
0x1495   : > { %4440 = vrcp.f32 %v2668_v53 }
0x1498   : > { %v2561_v55 = vpop.permute.xlu1 %2560 }
0x1499   : > { %v2566_v42 = vsel %vm846_vm7, %v2561_v55, 0 }
0x149a   : > { %4218 = vmatpush3.bf16.msra.mxu0 %v2566_v42 }
0x149b   : > { %4229 = vmatprep.subr.bf16.mxu0 %v4472_v1 }
0x149d   : > { %4220 = vmatmul.mubr.msk.bf16.vlgmr.msra.gmra.mrb[52].mxu0 %vm780_vm2, %v2559_v57 }
0x149e   : > { %4230 = vmatpush3.bf16.msra.mxu0 %v2678_v58  ;;  %4231 = vmatprep.mubr.msk.bf16.mxu0 %vm4473_vm0, %v4472_v1 }
0x149f   : > { %v4441_v59 = vpop.eup %4440  ;;  %4243 = vmatprep.subr.bf16.mxu0 %v4472_v1 }
0x14a0   : > { %v2670_v60 = vmul.f32 %v4441_v59, %v4433_v37 }
0x14a2   : > { %v2671_v61 = vpack.c.bf16 %v2670_v60, %v2670_v60 }
0x14a5   : > { %4232 = vmatmul.mubr.msk.bf16.vlgmr.msra.gmra.mrb[56].mxu0 %vm780_vm2, %v2671_v61 }
0x14a6   : > { %4247 = vmatprep.mubr.msk.bf16.mxu0 %vm4473_vm0, %v4472_v1  ;;  %4244 = vmatpush3.bf16.msra.mxu0 %v4378_v34 }
0x14a7   : > { %4245 = vmatprep.subr.bf16.mxu0 %v4472_v1 }
0x14aa   : > { %4246 = vmatpush3.bf16.msra.mxu0 %v4379_v36 }
0x14ab   : > { %4259 = vmatprep.subr.bf16.mxu0 %v4472_v1 }
0x1543   : > { %v2378_v62 = vpop.f32.mrb[44].mxu0 }
0x1544   : > { %v4197_v63 = vpop.f32.mrb[45].mxu0 }
0x1545   : > { %v2381_v0 = vpop.f32.mrb[46].mxu0 }
0x1546   : > { %v4198_v2 = vpop.f32.mrb[47].mxu0 }
0x154b   : > { %v2490_v4 = vpop.f32.mrb[48].mxu0 }
0x154c   : > { %2721 = vrot.lane.b32.xlu1 %v2490_v4, %s5302_s29  ;;  %v4209_v5 = vpop.f32.mrb[49].mxu0 }
0x154d   : > { %v2493_v6 = vpop.f32.mrb[50].mxu0 }
0x154e   : > { %v4210_v7 = vpop.f32.mrb[51].mxu0 }
0x1570   : > { %v2602_v11 = vpop.f32.mrb[52].mxu0 }
0x1571   : > { %2725 = vrot.lane.b32.xlu0 %v2602_v11, %s5303_s30  ;;  %v4221_v12 = vpop.f32.mrb[53].mxu0 }
0x1572   : > { %v2605_v13 = vpop.f32.mrb[54].mxu0 }
0x1573   : > { %v4222_v14 = vpop.f32.mrb[55].mxu0 }
0x1578   : > { %v2714_v15 = vpop.f32.mrb[56].mxu0 }
0x1579   : > { %2729 = vrot.lane.b32.xlu1 %v2714_v15, %s5304_s27  ;;  %v4233_v16 = vpop.f32.mrb[57].mxu0 }
0x157a   : > { %v2717_v17 = vpop.f32.mrb[58].mxu0 }
0x157b   : > { %v4234_v3 = vpop.f32.mrb[59].mxu0 }
0x15be   : > { %v2722_v18 = vpop.permute.xlu1 %2721 }
0x15bf   : > { %v2732_v20 = vsel %vm780_vm2, %v2378_v62, %v2722_v18 }
0x15e3   : > { %v2726_v19 = vpop.permute.xlu0 %2725 }
0x15e4   : > { %v2733_v21 = vsel %vm1239_vm8, %v2732_v20, %v2726_v19 }
0x15eb   : > { %v2730_v22 = vpop.permute.xlu1 %2729 }
0x15ec   : > { %v2734_v23 = vsel %vm1241_vm9, %v2733_v21, %v2730_v22 }
0x15ed   : > { %v2735_v24 = vpack.c.bf16 %v2734_v23, %v2734_v23 }
0x15ef   : > { %4240 = vmatmul.mubr.msk.bf16.vlgmr.msra.gmra.mrb[68].mxu1 %vm732_vm1, %v2735_v24 }
0x15f0   : > { %4255 = vmatprep.mubr.msk.bf16.mxu1 %vm4473_vm0, %v4472_v1 }
0x16c2   : > { %v2791_v26 = vpop.f32.mrb[68].mxu1 }
0x16c3   : > { %v2792_v27 = vadd.f32 %v3846_v25, %v2791_v26  ;;  %v4241_v33 = vpop.f32.mrb[69].mxu1 }
0x16c4   : > { %v2794_v28 = vpop.f32.mrb[70].mxu1 }
0x16c5   : > { %v4242_v30 = vpop.f32.mrb[71].mxu1  ;;  %v2797_v31 = vadd.f32 %v2792_v27, %v4940_v10 }
0x16c7   : > { %v2798_v32 = vsel %vm732_vm1, %v2797_v31, 0.0 }
0x16c8   : > { %2799 = vadd.xlane.f32.xlu0 %v2798_v32 }
0x16de   : > { %2905 = vrot.lane.b32.xlu0 %v4378_v34, %s5306_s26 }
0x16e2   : > { %2911 = vrot.lane.b32.xlu0 %v3864_v44, %s5306_s26 }
0x1755   : > { %v2800_v10 = vpop.xlane.xlu0 %2799 }
0x1756   : > { %v2801_v37 = vmul.f32 0.03125, %v2800_v10 }
0x1758   : > { %v2802_v38 = vsub.f32 %v2797_v31, %v2801_v37 }
0x1759   : > { %v2906_v43 = vpop.permute.xlu0 %2905 }
0x175a   : > { %v2803_v40 = vmul.f32 %v2802_v38, %v2802_v38  ;;  %4252 = vmatpush3.bf16.msra.mxu1 %v2906_v43 }
0x175b   : > { %4253 = vmatprep.subr.bf16.mxu1 %v4472_v1 }
0x175c   : > { %v2804_v41 = vsel %vm732_vm1, %v2803_v40, 0.0 }
0x175d   : > { %2805 = vadd.xlane.f32.xlu1 %v2804_v41 }
0x176e   : > { %2907 = vrot.lane.b32.xlu1 %v4379_v36, %s5306_s26 }
0x17ea   : > { %v2806_v45 = vpop.xlane.xlu1 %2805 }
0x17eb   : > { %v2807_v46 = vmul.f32 0.03125, %v2806_v45 }
0x17ed   : > { %v2808_v47 = vadd.f32 1e-05, %v2807_v46 }
0x17ee   : > { %v2908_v48 = vpop.permute.xlu1 %2907 }
0x17ef   : > { %4442 = vrsqrt.f32 %v2808_v47  ;;  %4254 = vmatpush3.bf16.msra.mxu1 %v2908_v48 }
0x17f0   : > { %4265 = vmatprep.subr.bf16.mxu1 %v4472_v1 }
0x17f2   : > { %4256 = vmatmul.mubr.msk.bf16.vlgmr.msra.gmra.mrb[72].mxu1 %vm732_vm1, %v4771_v29  ;;  %v2912_v29 = vpop.permute.xlu0 %2911 }
0x17f3   : > { %4267 = vmatprep.mubr.msk.bf16.mxu1 %vm4473_vm0, %v4472_v1 }
0x17f9   : > { %v4443_v35 = vpop.eup %4442 }
0x17fa   : > { %v2810_v50 = vmul.f32 %v4443_v35, %v2802_v38 }
0x17fc   : > { %v2817_v51 = vmul.f32 %v3850_v49, %v2810_v50 }
0x17fe   : > { %v5080_v52 = vadd.f32 %v3851_v39, %v2817_v51 }
0x1800   : > { %v2843_v53 = vpack.c.bf16 %v5080_v52, %v5080_v52 }
0x1802   : > { %4248 = vmatmul.mubr.msk.bf16.vlgmr.msra.gmra.mrb[60].mxu0 %vm732_vm1, %v2843_v53 }
0x1803   : > { %4261 = vmatprep.mubr.msk.bf16.mxu0 %vm4473_vm0, %v4472_v1 }
0x18c5   : > { %v2948_v54 = vpop.f32.mrb[72].mxu1 }
0x18c6   : > { %v2949_v55 = vadd.f32 %v2948_v54, %v2912_v29  ;;  %v4257_v42 = vpop.f32.mrb[73].mxu1 }
0x18c7   : > { %v2951_v56 = vpop.f32.mrb[74].mxu1 }
0x18c8   : > { %v5087_v57 = vpack.c.bf16 %v2949_v55, %v2949_v55  ;;  %v4258_v58 = vpop.f32.mrb[75].mxu1 }
0x18ca   : > { %3067 = vrot.lane.b32.xlu1 %v5087_v57, %s5308_s1  ;;  %v2960_v59 = vsel %vm780_vm2, %v5087_v57, 0 }
0x18cb   : > { %4260 = vmatpush3.bf16.xpose.msra.mxu0 %v2960_v59 }
0x18cc   : > { %4271 = vmatprep.subr.bf16.mxu0 %v4472_v1 }
0x18ce   : > { %3178 = vrot.lane.b32.xlu1 %v5087_v57, %s5307_s5 }
0x18d2   : > { %3289 = vrot.lane.b32.xlu1 %v5087_v57, %s5309_s23 }
0x18d5   : > { %v2899_v60 = vpop.f32.mrb[60].mxu0 }
0x18d6   : > { %v2900_v61 = vadd.f32 %v3864_v44, %v2899_v60  ;;  %v4249_v62 = vpop.f32.mrb[61].mxu0 }
0x18d7   : > { %v2902_v63 = vpop.f32.mrb[62].mxu0 }
0x18d8   : > { %v2954_v0 = vpack.c.bf16 %v2900_v61, %v2900_v61  ;;  %v4250_v2 = vpop.f32.mrb[63].mxu0 }
0x18da   : > { %3065 = vrot.lane.b32.xlu0 %v2954_v0, %s5308_s1  ;;  %4262 = vmatmul.mubr.msk.bf16.vlgmr.msra.gmra.mrb[64].mxu0 %vm780_vm2, %v2954_v0 }
0x18db   : > { %4273 = vmatprep.mubr.msk.bf16.mxu0 %vm4473_vm0, %v4472_v1 }
0x18de   : > { %3176 = vrot.lane.b32.xlu0 %v2954_v0, %s5307_s5 }
0x18e2   : > { %3287 = vrot.lane.b32.xlu0 %v2954_v0, %s5309_s23 }
0x193c   : > { %v3068_v4 = vpop.permute.xlu1 %3067 }
0x193d   : > { %v3073_v5 = vsel %vm780_vm2, %v3068_v4, 0 }
0x193e   : > { %4272 = vmatpush3.bf16.xpose.msra.mxu0 %v3073_v5 }
0x193f   : > { %4283 = vmatprep.subr.bf16.mxu0 %v4472_v1 }
0x1940   : > { %v3179_v6 = vpop.permute.xlu1 %3178 }
0x1941   : > { %v3184_v8 = vsel %vm780_vm2, %v3179_v6, 0 }
0x1944   : > { %v3290_v9 = vpop.permute.xlu1 %3289 }
0x1945   : > { %v3295_v12 = vsel %vm780_vm2, %v3290_v9, 0 }
0x194c   : > { %v3066_v7 = vpop.permute.xlu0 %3065 }
0x194d   : > { %4274 = vmatmul.mubr.msk.bf16.vlgmr.msra.gmra.mrb[68].mxu0 %vm780_vm2, %v3066_v7 }
0x194e   : > { %4284 = vmatpush3.bf16.xpose.msra.mxu0 %v3184_v8  ;;  %4285 = vmatprep.mubr.msk.bf16.mxu0 %vm4473_vm0, %v4472_v1 }
0x194f   : > { %4295 = vmatprep.subr.bf16.mxu0 %v4472_v1 }
0x1950   : > { %v3177_v11 = vpop.permute.xlu0 %3176 }
0x1954   : > { %v3288_v13 = vpop.permute.xlu0 %3287 }
0x1955   : > { %4286 = vmatmul.mubr.msk.bf16.vlgmr.msra.gmra.mrb[72].mxu0 %vm780_vm2, %v3177_v11 }
0x1956   : > { %4296 = vmatpush3.bf16.xpose.msra.mxu0 %v3295_v12  ;;  %4297 = vmatprep.mubr.msk.bf16.mxu0 %vm4473_vm0, %v4472_v1 }
0x1957   : > { %4307 = vmatprep.subr.bf16.mxu0 %v4472_v1 }
0x195d   : > { %4298 = vmatmul.mubr.msk.bf16.vlgmr.msra.gmra.mrb[76].mxu0 %vm780_vm2, %v3288_v13 }
0x195e   : > { %4311 = vmatprep.mubr.msk.bf16.mxu0 %vm4473_vm0, %v4472_v1 }
0x19ad   : > { %v2996_v14 = vpop.f32.mrb[64].mxu0 }
0x19ae   : > { %v3002_v15 = vmul.f32 0.35355338, %v2996_v14  ;;  %v4263_v16 = vpop.f32.mrb[65].mxu0 }
0x19af   : > { %v2999_v17 = vpop.f32.mrb[66].mxu0 }
0x19b0   : > { %v4264_v3 = vpop.f32.mrb[67].mxu0  ;;  %v3003_v18 = vsel %vm780_vm2, %v3002_v15, -inf }
0x19b1   : > { %3004 = vmax.xlane.f32.xlu1 %v3003_v18 }
0x1a20   : > { %v3109_v19 = vpop.f32.mrb[68].mxu0 }
0x1a21   : > { %v3115_v20 = vmul.f32 0.35355338, %v3109_v19  ;;  %v4275_v21 = vpop.f32.mrb[69].mxu0 }
0x1a22   : > { %v3112_v22 = vpop.f32.mrb[70].mxu0 }
0x1a23   : > { %v4276_v23 = vpop.f32.mrb[71].mxu0  ;;  %v3116_v24 = vsel %vm780_vm2, %v3115_v20, -inf }
0x1a24   : > { %3117 = vmax.xlane.f32.xlu0 %v3116_v24 }
0x1a28   : > { %v3220_v25 = vpop.f32.mrb[72].mxu0 }
0x1a29   : > { %v3226_v26 = vmul.f32 0.35355338, %v3220_v25  ;;  %v4287_v27 = vpop.f32.mrb[73].mxu0 }
0x1a2a   : > { %v3223_v33 = vpop.f32.mrb[74].mxu0  ;;  %v4380_v27 = vld [vmem:[%s5241_s11 + $0x10] sm:$0xff]  }
0x1a2b   : > { %v4288_v28 = vpop.f32.mrb[75].mxu0  ;;  %v3227_v30 = vsel %vm780_vm2, %v3226_v26, -inf  ;;  %4308 = vmatpush3.bf16.msra.mxu0 %v4380_v27  ;;  %v4381_v33 = vld [vmem:[%s5241_s11 + $0x18] sm:$0xff]  }
0x1a2c   : > { %3228 = vmax.xlane.f32.xlu0 %v3227_v30  ;;  %4309 = vmatprep.subr.bf16.mxu0 %v4472_v1 }
0x1a2f   : > { %4310 = vmatpush3.bf16.msra.mxu0 %v4381_v33 }
0x1a30   : > { %v3331_v31 = vpop.f32.mrb[76].mxu0  ;;  %4323 = vmatprep.subr.bf16.mxu0 %v4472_v1 }
0x1a31   : > { %v3337_v32 = vmul.f32 0.35355338, %v3331_v31  ;;  %v4299_v34 = vpop.f32.mrb[77].mxu0 }
0x1a32   : > { %v3334_v36 = vpop.f32.mrb[78].mxu0 }
0x1a33   : > { %v4300_v10 = vpop.f32.mrb[79].mxu0  ;;  %v3338_v37 = vsel %vm780_vm2, %v3337_v32, -inf }
0x1a34   : > { %3339 = vmax.xlane.f32.xlu1 %v3338_v37 }
0x1a3e   : > { %v3005_v38 = vpop.xlane.xlu1 %3004 }
0x1a3f   : > { %v3006_v40 = vsub.f32 %v3002_v15, %v3005_v38 }
0x1a41   : > { %v3007_v41 = vmul.f32 1.442695, %v3006_v40 }
0x1a43   : > { %4444 = vpow2.f32 %v3007_v41 }
0x1a4d   : > { %v4445_v43 = vpop.eup %4444 }
0x1a4e   : > { %v3009_v44 = vsel %vm780_vm2, %v4445_v43, 0.0 }
0x1a4f   : > { %3010 = vadd.xlane.f32.xlu0 %v3009_v44 }
0x1ab1   : > { %v3118_v45 = vpop.xlane.xlu0 %3117 }
0x1ab2   : > { %v3119_v46 = vsub.f32 %v3115_v20, %v3118_v45 }
0x1ab4   : > { %v3120_v47 = vmul.f32 1.442695, %v3119_v46 }
0x1ab6   : > { %4446 = vpow2.f32 %v3120_v47 }
0x1ab9   : > { %v3229_v48 = vpop.xlane.xlu0 %3228 }
0x1aba   : > { %v3230_v35 = vsub.f32 %v3226_v26, %v3229_v48 }
0x1abc   : > { %v3231_v49 = vmul.f32 1.442695, %v3230_v35 }
0x1abe   : > { %4448 = vpow2.f32 %v3231_v49 }
0x1ac0   : > { %v4447_v50 = vpop.eup %4446 }
0x1ac1   : > { %v3122_v39 = vsel %vm780_vm2, %v4447_v50, 0.0  ;;  %v3340_v29 = vpop.xlane.xlu1 %3339 }
0x1ac2   : > { %3123 = vadd.xlane.f32.xlu1 %v3122_v39  ;;  %v3341_v54 = vsub.f32 %v3337_v32, %v3340_v29 }
0x1ac4   : > { %v3342_v55 = vmul.f32 1.442695, %v3341_v54 }
0x1ac6   : > { %4450 = vpow2.f32 %v3342_v55 }
0x1ac8   : > { %v4449_v51 = vpop.eup %4448 }
0x1ac9   : > { %v3233_v53 = vsel %vm780_vm2, %v4449_v51, 0.0 }
0x1aca   : > { %3234 = vadd.xlane.f32.xlu0 %v3233_v53 }
0x1ad0   : > { %v4451_v42 = vpop.eup %4450 }
0x1ad1   : > { %v3344_v56 = vsel %vm780_vm2, %v4451_v42, 0.0 }
0x1ad3   : > { %3128 = vrot.lane.b32.xlu1 %v5087_v57, %s5299_s4 }
0x1adc   : > { %v3011_v58 = vpop.xlane.xlu0 %3010 }
0x1add   : > { %4452 = vrcp.f32 %v3011_v58  ;;  %v4382_v58 = vld [vmem:[%s5245_s15 + $0x10] sm:$0xff]  }
0x1ae0   : > { %3016 = vrot.lane.b32.xlu0 %v5087_v57, %s5306_s26 }
0x1ae4   : > { %3350 = vrot.lane.b32.xlu0 %v5087_v57, %s5300_s25 }
0x1ae7   : > { %v4453_v60 = vpop.eup %4452 }
0x1ae8   : > { %v3013_v62 = vmul.f32 %v4453_v60, %v4445_v43  ;;  %v4385_v60 = vld [vmem:[%s5247_s17 + $0x28] sm:$0xff]  }
0x1aea   : > { %v3014_v4 = vpack.c.bf16 %v3013_v62, %v3013_v62 }
0x1af7   : > { %3345 = vadd.xlane.f32.xlu1 %v3344_v56 }
0x1b08   : > { %3239 = vrot.lane.b32.xlu1 %v5087_v57, %s5301_s22 }
0x1b4f   : > { %v3124_v59 = vpop.xlane.xlu1 %3123 }
0x1b50   : > { %4454 = vrcp.f32 %v3124_v59  ;;  %v4384_v59 = vld [vmem:[%s5247_s17 + $0x20] sm:$0xff]  }
0x1b53   : > { %v3129_v2 = vpop.permute.xlu1 %3128 }
0x1b54   : > { %v3134_v6 = vsel %vm846_vm7, %v3129_v2, 0  ;;  %v3881_v2 = vld [vmem:[%s5243_s13 + $0x1] ss:$0 sm:$0xff] }
0x1b57   : > { %v3235_v61 = vpop.xlane.xlu0 %3234 }
0x1b58   : > { %4456 = vrcp.f32 %v3235_v61 }
0x1b5a   : > { %v4455_v5 = vpop.eup %4454 }
0x1b5b   : > { %v3017_v63 = vpop.permute.xlu0 %3016  ;;  %v3126_v57 = vmul.f32 %v4455_v5, %v4447_v50  ;;  %v3882_v5 = vld [vmem:[%s5244_s14 + $0x1] ss:$0 sm:$0xff] }
0x1b5c   : > { %v3022_v0 = vsel %vm846_vm7, %v3017_v63, 0 }
0x1b5d   : > { %4266 = vmatpush3.bf16.msra.mxu1 %v3022_v0  ;;  %v3127_v7 = vpack.c.bf16 %v3126_v57, %v3126_v57 }
0x1b5e   : > { %4277 = vmatprep.subr.bf16.mxu1 %v4472_v1 }
0x1b5f   : > { %v3351_v14 = vpop.permute.xlu0 %3350 }
0x1b60   : > { %4268 = vmatmul.mubr.msk.bf16.vlgmr.msra.gmra.mrb[76].mxu1 %vm780_vm2, %v3014_v4  ;;  %v3356_v16 = vsel %vm846_vm7, %v3351_v14, 0 }
0x1b61   : > { %4278 = vmatpush3.bf16.msra.mxu1 %v3134_v6  ;;  %4279 = vmatprep.mubr.msk.bf16.mxu1 %vm4473_vm0, %v4472_v1 }
0x1b62   : > { %4289 = vmatprep.subr.bf16.mxu1 %v4472_v1  ;;  %v4457_v8 = vpop.eup %4456 }
0x1b63   : > { %v3237_v11 = vmul.f32 %v4457_v8, %v4449_v51  ;;  %v4386_v8 = vld [vmem:[%s5247_s17 + $0x30] sm:$0xff]  }
0x1b65   : > { %v3238_v15 = vpack.c.bf16 %v3237_v11, %v3237_v11  ;;  %v3899_v11 = vld [vmem:[%s5246_s16 + $0x1] ss:$0 sm:$0xff] }
0x1b68   : > { %4280 = vmatmul.mubr.msk.bf16.vlgmr.msra.gmra.mrb[80].mxu1 %vm780_vm2, %v3127_v7 }
0x1b69   : > { %4291 = vmatprep.mubr.msk.bf16.mxu1 %vm4473_vm0, %v4472_v1 }
0x1b84   : > { %v3346_v9 = vpop.xlane.xlu1 %3345 }
0x1b85   : > { %4458 = vrcp.f32 %v3346_v9  ;;  %v4387_v9 = vld [vmem:[%s5247_s17 + $0x38] sm:$0xff]  }
0x1b88   : > { %v3240_v12 = vpop.permute.xlu1 %3239 }
0x1b89   : > { %v3245_v13 = vsel %vm846_vm7, %v3240_v12, 0 }
0x1b8a   : > { %4290 = vmatpush3.bf16.msra.mxu1 %v3245_v13 }
0x1b8b   : > { %4301 = vmatprep.subr.bf16.mxu1 %v4472_v1 }
0x1b8d   : > { %4292 = vmatmul.mubr.msk.bf16.vlgmr.msra.gmra.mrb[84].mxu1 %vm780_vm2, %v3238_v15 }
0x1b8e   : > { %4302 = vmatpush3.bf16.msra.mxu1 %v3356_v16  ;;  %4303 = vmatprep.mubr.msk.bf16.mxu1 %vm4473_vm0, %v4472_v1 }
0x1b8f   : > { %v4459_v17 = vpop.eup %4458  ;;  %4315 = vmatprep.subr.bf16.mxu1 %v4472_v1 }
0x1b90   : > { %v3348_v3 = vmul.f32 %v4459_v17, %v4451_v42 }
0x1b92   : > { %v3349_v18 = vpack.c.bf16 %v3348_v3, %v3348_v3 }
0x1b95   : > { %4304 = vmatmul.mubr.msk.bf16.vlgmr.msra.gmra.mrb[88].mxu1 %vm780_vm2, %v3349_v18 }
0x1b96   : > { %4319 = vmatprep.mubr.msk.bf16.mxu1 %vm4473_vm0, %v4472_v1  ;;  %4316 = vmatpush3.bf16.msra.mxu1 %v4382_v58 }
0x1b97   : > { %4317 = vmatprep.subr.bf16.mxu1 %v4472_v1 }
0x1c33   : > { %v3058_v19 = vpop.f32.mrb[76].mxu1 }
0x1c34   : > { %v4269_v20 = vpop.f32.mrb[77].mxu1 }
0x1c35   : > { %v3061_v21 = vpop.f32.mrb[78].mxu1 }
0x1c36   : > { %v4270_v22 = vpop.f32.mrb[79].mxu1 }
0x1c3b   : > { %v3170_v23 = vpop.f32.mrb[80].mxu1 }
0x1c3c   : > { %3399 = vrot.lane.b32.xlu1 %v3170_v23, %s5302_s29  ;;  %v4281_v24 = vpop.f32.mrb[81].mxu1  ;;  %s5314_s29 = sld [smem:[#allocation10_spill]] }
0x1c3d   : > { %v3173_v25 = vpop.f32.mrb[82].mxu1 }
0x1c3e   : > { %v4282_v26 = vpop.f32.mrb[83].mxu1 }
0x1c42   : > { %v3877_v47 = vld [vmem:[%s5314_s29 + $0x1] ss:$0 sm:$0xff]  ;;  %s5316_s29 = sld [smem:[#allocation11_spill]] }
0x1c48   : > { %s682_s5 = scalar_lea.vmem %s5316_s29, %s5315_s0 }
0x1c60   : > { %v3281_v28 = vpop.f32.mrb[84].mxu1 }
0x1c61   : > { %3403 = vrot.lane.b32.xlu0 %v3281_v28, %s5303_s30  ;;  %v4293_v30 = vpop.f32.mrb[85].mxu1 }
0x1c62   : > { %v3284_v31 = vpop.f32.mrb[86].mxu1 }
0x1c63   : > { %v4294_v32 = vpop.f32.mrb[87].mxu1 }
0x1c68   : > { %v3392_v34 = vpop.f32.mrb[88].mxu1 }
0x1c69   : > { %3407 = vrot.lane.b32.xlu1 %v3392_v34, %s5304_s27  ;;  %v4305_v36 = vpop.f32.mrb[89].mxu1 }
0x1c6a   : > { %v3395_v10 = vpop.f32.mrb[90].mxu1  ;;  %v3909_v36 = vld [vmem:[%s5249_s19 + $0x1] ss:$0 sm:$0xff] }
0x1c6b   : > { %v4306_v37 = vpop.f32.mrb[91].mxu1 }
0x1c6c   : > { %v3910_v37 = vld [vmem:[%s5250_s20 + $0x1] ss:$0 sm:$0xff] }
0x1cae   : > { %v3400_v38 = vpop.permute.xlu1 %3399 }
0x1caf   : > { %v3410_v41 = vsel %vm780_vm2, %v3058_v19, %v3400_v38 }
0x1cd3   : > { %v3404_v40 = vpop.permute.xlu0 %3403 }
0x1cd4   : > { %v3411_v43 = vsel %vm1239_vm8, %v3410_v41, %v3404_v40 }
0x1cdb   : > { %v3408_v44 = vpop.permute.xlu1 %3407 }
0x1cdc   : > { %v3412_v45 = vsel %vm1241_vm9, %v3411_v43, %v3408_v44 }
0x1cdd   : > { %v3413_v46 = vpack.c.bf16 %v3412_v45, %v3412_v45 }
0x1cdf   : > { %4312 = vmatmul.mubr.msk.bf16.vlgmr.msra.gmra.mrb[80].mxu0 %vm732_vm1, %v3413_v46 }
0x1ce0   : > { %4331 = vmatprep.mubr.msk.bf16.mxu0 %vm4473_vm0, %v4472_v1  ;;  %4324 = vmatpush3.bf16.msra.mxu0 %v4384_v59 }
0x1ce1   : > { %4325 = vmatprep.subr.bf16.mxu0 %v4472_v1 }
0x1ce4   : > { %4326 = vmatpush3.bf16.msra.mxu0 %v4385_v60 }
0x1ce5   : > { %4327 = vmatprep.subr.bf16.mxu0 %v4472_v1 }
0x1ce8   : > { %4328 = vmatpush3.bf16.msra.mxu0 %v4386_v8 }
0x1ce9   : > { %4329 = vmatprep.subr.bf16.mxu0 %v4472_v1  ;;  %v3903_v1 = vld [vmem:[%s5248_s18 + $0x1] ss:$0 sm:$0xff] }
0x1cec   : > { %4330 = vmatpush3.bf16.msra.mxu0 %v4387_v9 }
0x1db2   : > { %v3469_v48 = vpop.f32.mrb[80].mxu0 }
0x1db3   : > { %v3470_v35 = vadd.f32 %v3877_v47, %v3469_v48  ;;  %v4313_v49 = vpop.f32.mrb[81].mxu0 }
0x1db4   : > { %v3472_v50 = vpop.f32.mrb[82].mxu0 }
0x1db5   : > { %v3475_v39 = vadd.f32 %v3470_v35, %v5080_v52  ;;  %v4314_v51 = vpop.f32.mrb[83].mxu0  ;;  %v4383_v52 = vld [vmem:[%s5245_s15 + $0x18] sm:$0xff]  }
0x1db6   : > { %4318 = vmatpush3.bf16.msra.mxu1 %v4383_v52 }
0x1db7   : > { %v3476_v53 = vsel %vm732_vm1, %v3475_v39, 0.0 }
0x1db8   : > { %3477 = vadd.xlane.f32.xlu0 %v3476_v53 }
0x1e45   : > { %v3478_v29 = vpop.xlane.xlu0 %3477 }
0x1e46   : > { %v3479_v54 = vmul.f32 0.03125, %v3478_v29 }
0x1e48   : > { %v3480_v55 = vsub.f32 %v3475_v39, %v3479_v54 }
0x1e4a   : > { %v3481_v42 = vmul.f32 %v3480_v55, %v3480_v55 }
0x1e4c   : > { %v3482_v56 = vsel %vm732_vm1, %v3481_v42, 0.0 }
0x1e4d   : > { %3483 = vadd.xlane.f32.xlu1 %v3482_v56 }
0x1eda   : > { %v3484_v61 = vpop.xlane.xlu1 %3483 }
0x1edb   : > { %v3485_v62 = vmul.f32 0.03125, %v3484_v61 }
0x1edd   : > { %v3486_v63 = vadd.f32 1e-05, %v3485_v62 }
0x1edf   : > { %4460 = vrsqrt.f32 %v3486_v63 }
0x1ee9   : > { %v4461_v0 = vpop.eup %4460 }
0x1eea   : > { %v3488_v4 = vmul.f32 %v4461_v0, %v3480_v55 }
0x1eec   : > { %v3495_v6 = vmul.f32 %v3881_v2, %v3488_v4 }
0x1eee   : > { %v3502_v57 = vadd.f32 %v3882_v5, %v3495_v6 }
0x1ef0   : > { %v3525_v7 = vpack.c.bf16 %v3502_v57, %v3502_v57 }
0x1ef2   : > { %4320 = vmatmul.mubr.msk.bf16.vlgmr.msra.gmra.mrb[92].mxu1 %vm732_vm1, %v3525_v7 }
0x1fc5   : > { %v3581_v12 = vpop.f32.mrb[92].mxu1 }
0x1fc6   : > { %v3582_v13 = vadd.f32 %v3899_v11, %v3581_v12  ;;  %v4321_v14 = vpop.f32.mrb[93].mxu1 }
0x1fc7   : > { %v3584_v15 = vpop.f32.mrb[94].mxu1 }
0x1fc8   : > { %v3587_v16 = vmax.f32 %v3582_v13, 0.0  ;;  %v4322_v17 = vpop.f32.mrb[95].mxu1 }
0x1fca   : > { %v3588_v3 = vpack.c.bf16 %v3587_v16, %v3587_v16 }
0x1fcc   : > { %4332 = vmatmul.mubr.msk.bf16.vlgmr.msra.gmra.mrb[84].mxu0 %vm2120_vm10, %v3588_v3 }
0x209f   : > { %v3656_v18 = vpop.f32.mrb[84].mxu0 }
0x20a0   : > { %v3657_v19 = vadd.f32 %v3903_v1, %v3656_v18  ;;  %v4333_v20 = vpop.f32.mrb[85].mxu0 }
0x20a1   : > { %v3659_v21 = vpop.f32.mrb[86].mxu0 }
0x20a2   : > { %v3662_v22 = vadd.f32 %v3657_v19, %v3502_v57  ;;  %v4334_v23 = vpop.f32.mrb[87].mxu0 }
0x20a4   : > { %v3663_v24 = vsel %vm732_vm1, %v3662_v22, 0.0 }
0x20a5   : > { %3664 = vadd.xlane.f32.xlu0 %v3663_v24 }
0x2132   : > { %v3665_v25 = vpop.xlane.xlu0 %3664 }
0x2133   : > { %v3666_v26 = vmul.f32 0.03125, %v3665_v25 }
0x2135   : > { %v3667_v27 = vsub.f32 %v3662_v22, %v3666_v26 }
0x2137   : > { %v3668_v33 = vmul.f32 %v3667_v27, %v3667_v27 }
0x2139   : > { %v3669_v28 = vsel %vm732_vm1, %v3668_v33, 0.0 }
0x213a   : > { %3670 = vadd.xlane.f32.xlu0 %v3669_v28 }
0x21c7   : > { %v3671_v30 = vpop.xlane.xlu0 %3670 }
0x21c8   : > { %v3672_v31 = vmul.f32 0.03125, %v3671_v30 }
0x21ca   : > { %v3673_v32 = vadd.f32 1e-05, %v3672_v31 }
0x21cc   : > { %4462 = vrsqrt.f32 %v3673_v32 }
0x21d6   : > { %v4463_v34 = vpop.eup %4462 }
0x21d7   : > { %v3675_v10 = vmul.f32 %v4463_v34, %v3667_v27 }
0x21d9   : > { %v3682_v38 = vmul.f32 %v3909_v36, %v3675_v10 }
0x21db   : > { %v3689_v40 = vadd.f32 %v3910_v37, %v3682_v38 }
0x21dd   : > { %3690 = vst.msk [vmem:[%s682_s5] sm:$0xff] %vm732_vm1, %v3689_v40 }
0x21de PF: > { %s5317_s1 = sld [smem:[#allocation2_spill]] }
0x21e4   : > { %s31_s2 = sadd.s32 1, %s5317_s1  }
0x21e5   : > { %p28_p4 = scmp.ge.s32.totalorder %s31_s2, 6  }
0x21e7   :  { %30 = sbr.rel (!%p28_p4) target bundleno = 9 (0x9), region = 158 }

</bundles_post_ra>
